<compile_context>
chip_gen: v5e
topology: v5e:2x2
jax: 0.10.0
libtpu: 0.0.40
codegen_flags: <defaults>
</compile_context>

<pallas_src>
import functools

import jax
import jax.numpy as jnp
from jax import lax
from jax.experimental import pallas as pl
from jax.experimental.pallas import tpu as pltpu


# ----------------------------- Pallas kernel ------------------------------- #
def _efadlif_chunk_kernel(x_ref, wT_ref, recT_ref, prm_ref,
                          u0_ref, z0_ref, w0_ref,
                          z_seq_ref, u_fin_ref, z_fin_ref, w_fin_ref,
                          soma_s, u_s, z_s, w_s, *, thr, t_total):
    """One (batch-tile, time-chunk) grid step: runs TT timesteps."""
    tc = pl.program_id(1)                     # time-chunk index (innermost axis)
    tt, bb, in_f = x_ref.shape                # TT, block_b, In
    out_f = u_s.shape[-1]

    # Load the initial state into VMEM scratch at the first chunk of this batch
    # tile; it stays resident across the whole sequence.
    @pl.when(tc == 0)
    def _():
        u_s[...] = u0_ref[...]
        z_s[...] = z0_ref[...].astype(z_s.dtype)
        w_s[...] = w0_ref[...]

    # Per-neuron constants: slice + sublane-broadcast ONCE per chunk (JAX does
    # not CSE broadcast_in_dim -> keep these out of the per-timestep path).
    bias  = prm_ref[0:1, :]
    dec_u = jnp.broadcast_to(prm_ref[1:2, :], (bb, out_f))
    omdu  = jnp.broadcast_to(prm_ref[2:3, :], (bb, out_f))   # 1 - decay_u
    dec_w = jnp.broadcast_to(prm_ref[3:4, :], (bb, out_f))
    a_eff = jnp.broadcast_to(prm_ref[4:5, :], (bb, out_f))   # (1-decay_w)*q*a
    b_eff = jnp.broadcast_to(prm_ref[5:6, :], (bb, out_f))   # (1-decay_w)*q*b

    # Batched feed-forward matmul for the whole time chunk: one fat
    # (TT*block_b, In) @ (In, Out) MXU call instead of TT skinny ones.
    x2d = x_ref[...].reshape(tt * bb, in_f)
    soma_s[...] = (jnp.dot(x2d, wT_ref[...], preferred_element_type=jnp.float32)
                   .reshape(tt, bb, out_f) + bias)

    needs_mask = (t_total % tt) != 0          # only the last chunk can be padded

    def step(i, carry):
        u_tm1 = u_s[...]
        z_tm1 = z_s[...]                      # bf16, exactly 0/1
        w_tm1 = w_s[...]
        # Recurrent contribution: (block_b, Out) @ (Out, Out) on the MXU.
        soma = soma_s[i] + jnp.dot(z_tm1, recT_ref[...],
                                   preferred_element_type=jnp.float32)
        u_t = dec_u * u_tm1 + omdu * (soma - w_tm1)
        spike = u_t > thr                     # torch.heaviside(u_t - thr, 0.0)
        z_t = spike.astype(z_s.dtype)
        u_t = jnp.where(spike, 0.0, u_t)      # fused reset
        w_t = dec_w * w_tm1 + a_eff * u_tm1 + b_eff * z_tm1.astype(jnp.float32)

        if needs_mask:                        # keep state frozen on padded steps
            valid = tc * tt + i < t_total
            u_t = jnp.where(valid, u_t, u_tm1)
            z_t = jnp.where(valid, z_t, z_tm1)
            w_t = jnp.where(valid, w_t, w_tm1)

        u_s[...] = u_t
        z_s[...] = z_t
        w_s[...] = w_t
        z_seq_ref[i] = z_t                    # padded rows are sliced off outside
        return carry

    lax.fori_loop(0, tt, step, 0, unroll=True)

    # Emit the final state once per batch tile.
    @pl.when(tc == pl.num_programs(1) - 1)
    def _():
        u_fin_ref[...] = u_s[...]
        z_fin_ref[...] = z_s[...].astype(z_fin_ref.dtype)
        w_fin_ref[...] = w_s[...]


# ------------------------- one-time parameter prep ------------------------- #
def prepare_params(params, *, q=60.0, matmul_dtype=jnp.bfloat16):
    """Pre-transpose / cast weights and pack per-neuron constants (done once)."""
    out_features, in_features = params["weight"].shape
    wT = jnp.asarray(params["weight"].T, matmul_dtype)        # (In, Out)
    recT = jnp.asarray(params["recurrent"].T, matmul_dtype)   # (Out, Out)

    decay_u = params["decay_u"].astype(jnp.float32)
    decay_w = params["decay_w"].astype(jnp.float32)
    omdw_q = (1.0 - decay_w) * jnp.float32(q)
    rows = jnp.stack([
        params["bias"].astype(jnp.float32),
        decay_u,
        1.0 - decay_u,
        decay_w,
        omdw_q * params["a"].astype(jnp.float32),
        omdw_q * params["b"].astype(jnp.float32),
    ])
    # Pad to 8 rows (a (1, Out) input would be padded to an (8, Out) VMEM tile
    # anyway) -> one DMA for all per-neuron constants.
    prm = jnp.zeros((8, out_features), jnp.float32).at[:rows.shape[0]].set(rows)
    return dict(wT=wT, recT=recT, prm=prm)


# ------------------------------ sequence call ------------------------------ #
def efadlif_sequence(x_seq, prepared, state0, *, thr=1.0, block_b=None, tt=None,
                     donate_state=False):
    """Run T EFAdLIF steps with weights resident in VMEM.

    x_seq:    (T, B, In) float32 (cast to the matmul dtype internally)
    prepared: output of prepare_params
    state0:   (u0, z0, w0), each (B, Out) float32
    Returns (z_seq (T, B, Out) bfloat16 (binary, lossless), (u_T, z_T, w_T) f32).
    """
    u0, z0, w0 = state0
    T, B, In = x_seq.shape
    Out = prepared["recT"].shape[0]
    mm_dtype = prepared["wT"].dtype
    mm_bytes = jnp.dtype(mm_dtype).itemsize
    z_dtype = jnp.bfloat16                     # z is binary -> lossless in bf16
    z_bytes = jnp.dtype(z_dtype).itemsize

    # --- batch tiling: MXU-shaped tiles when B allows; >=2 tiles also lets the
    #     "parallel" batch axis feed both TensorCores on v7x.
    if block_b is None:
        if B >= 512 and B % 256 == 0:
            block_b = 256
        elif B >= 256 and B % 128 == 0:
            block_b = 128
        else:
            block_b = B
    assert B % block_b == 0 and (block_b == B or block_b % 8 == 0), \
        "block_b must divide B and be 8-aligned (or equal to B)"
    nb = B // block_b

    # --- time chunking: amortize the ~0.35 us per-grid-step pipeline overhead
    #     while keeping the per-chunk f32 soma scratch modest.
    if tt is None:
        tt = min(16, T)
        while tt > 1 and tt * block_b * Out * 4 > (8 << 20):
            tt //= 2
    tt = max(1, min(int(tt), T))
    nT = pl.cdiv(T, tt)
    T_pad = nT * tt

    x_seq = x_seq.astype(mm_dtype)             # halves the activation stream
    if T_pad != T:
        x_seq = jnp.pad(x_seq, ((0, T_pad - T), (0, 0), (0, 0)))

    out_shape = (
        jax.ShapeDtypeStruct((T_pad, B, Out), z_dtype),   # z_seq (binary)
        jax.ShapeDtypeStruct((B, Out), jnp.float32),      # u_T
        jax.ShapeDtypeStruct((B, Out), jnp.float32),      # z_T
        jax.ShapeDtypeStruct((B, Out), jnp.float32),      # w_T
    )
    out_specs = (
        pl.BlockSpec((tt, block_b, Out), lambda b, t: (t, b, 0)),
        pl.BlockSpec((block_b, Out), lambda b, t: (b, 0)),
        pl.BlockSpec((block_b, Out), lambda b, t: (b, 0)),
        pl.BlockSpec((block_b, Out), lambda b, t: (b, 0)),
    )
    scratch_shapes = [
        pltpu.VMEM((tt, block_b, Out), jnp.float32),      # batched FF soma chunk
        pltpu.VMEM((block_b, Out), jnp.float32),          # u state
        pltpu.VMEM((block_b, Out), z_dtype),              # z state (bf16)
        pltpu.VMEM((block_b, Out), jnp.float32),          # w state
    ]

    # Generation-aware VMEM cap (v5e/v6e: 128 MiB, v7x: 64 MiB per core).
    try:
        vmem_cap = int(pltpu.get_tpu_info().vmem_capacity_bytes)
    except Exception:
        vmem_cap = 64 << 20                    # assume the tightest generation

    cost = pl.CostEstimate(
        flops=2 * T * B * (In + Out) * Out + 10 * T * B * Out,
        transcendentals=0,
        bytes_accessed=(T_pad * B * In * mm_bytes            # x stream
                        + nb * (In + Out) * Out * mm_bytes   # weights (per tile)
                        + 8 * Out * 4                        # packed params
                        + 6 * B * Out * 4                    # state in/out
                        + T_pad * B * Out * z_bytes),        # z_seq out (bf16)
    )

    kernel = functools.partial(_efadlif_chunk_kernel, thr=float(thr), t_total=T)
    # Inputs: x, wT, recT, prm, u0, z0, w0 ; Outputs: z_seq, u_T, z_T, w_T.
    io_aliases = {4: 1, 5: 2, 6: 3} if donate_state else {}

    def run(single_buffer_weights):
        wbufs = 1 if single_buffer_weights else 2

        def resident(shape):
            # Constant block index -> fetched once, stays VMEM-resident.
            # Buffered(1) avoids double-buffering the (potentially huge) recT.
            if single_buffer_weights:
                return pl.BlockSpec(shape, lambda b, t: (0, 0),
                                    pipeline_mode=pl.Buffered(1))
            return pl.BlockSpec(shape, lambda b, t: (0, 0))

        in_specs = [
            pl.BlockSpec((tt, block_b, In), lambda b, t: (t, b, 0)),  # x chunk
            resident((In, Out)),                                      # wT
            resident((Out, Out)),                                     # recT
            resident((8, Out)),                                       # packed params
            pl.BlockSpec((block_b, Out), lambda b, t: (b, 0)),        # u0
            pl.BlockSpec((block_b, Out), lambda b, t: (b, 0)),        # z0
            pl.BlockSpec((block_b, Out), lambda b, t: (b, 0)),        # w0
        ]

        # VMEM budget from the *actual* buffer counts + Mosaic scratch headroom.
        need = (wbufs * ((In + Out) * Out * mm_bytes + 8 * Out * 4)   # weights+prm
                + 2 * 3 * block_b * Out * 4                           # u0/z0/w0 in
                + 2 * tt * block_b * In * mm_bytes                    # x stream
                + 2 * tt * block_b * Out * z_bytes                    # z_seq stream
                + 2 * 3 * block_b * Out * 4                           # state outs
                + tt * block_b * Out * 4                              # soma scratch
                + 2 * block_b * Out * 4 + block_b * Out * z_bytes)    # u/w/z scratch
        need = int(1.25 * need) + (4 << 20)
        vmem_limit = int(min(max(need, 16 << 20), int(0.85 * vmem_cap)))

        call = pl.pallas_call(
            kernel,
            out_shape=out_shape,
            grid=(nb, nT),
            in_specs=in_specs,
            out_specs=out_specs,
            scratch_shapes=scratch_shapes,
            compiler_params=pltpu.CompilerParams(
                dimension_semantics=("parallel", "arbitrary"),
                vmem_limit_bytes=vmem_limit),
            cost_estimate=cost,
            input_output_aliases=io_aliases,
        )
        return call(x_seq, prepared["wT"], prepared["recT"], prepared["prm"],
                    u0, z0, w0)

    try:
        z_seq, u_T, z_T, w_T = run(True)       # single-buffered resident weights
    except Exception:
        # pipeline_mode=pl.Buffered(1) unsupported on this jax build; fall back
        # to the default double-buffered (still correct) path.
        z_seq, u_T, z_T, w_T = run(False)

    if T_pad != T:
        z_seq = z_seq[:T]
    return z_seq, (u_T, z_T, w_T)


def efadlif_forward(x, prepared, state, *, thr=1.0):
    """Single EFAdLIF step (same signature semantics as the module's forward)."""
    z_seq, new_state = efadlif_sequence(x[None], prepared, state, thr=thr)
    return z_seq[0].astype(jnp.float32), new_state


# ------------------------ deterministic parameter init --------------------- #
def init_params(key, in_features, out_features,
                tau_u_range=(5.0, 25.0), tau_w_range=(60.0, 300.0), dt=1.0):
    ks = jax.random.split(key, 6)
    lim = 1.0 / jnp.sqrt(jnp.float32(in_features))
    weight = jax.random.uniform(ks[0], (out_features, in_features),
                                jnp.float32, -lim, lim)
    bias = jnp.zeros((out_features,), jnp.float32)
    recurrent = jax.nn.initializers.orthogonal(scale=1.0)(
        ks[1], (out_features, out_features), jnp.float32)
    a = jax.random.uniform(ks[2], (out_features,), jnp.float32, 0.0, 1.0)
    b = jax.random.uniform(ks[3], (out_features,), jnp.float32, 0.0, 2.0)
    tau_u = jax.random.uniform(ks[4], (out_features,), jnp.float32,
                               tau_u_range[0], tau_u_range[1])
    tau_w = jax.random.uniform(ks[5], (out_features,), jnp.float32,
                               tau_w_range[0], tau_w_range[1])
    decay_u = jnp.exp(-dt / tau_u)
    decay_w = jnp.exp(-dt / tau_w)
    return dict(weight=weight, bias=bias, recurrent=recurrent,
                a=a, b=b, decay_u=decay_u, decay_w=decay_w)


# ----------------------------- pure-JAX reference --------------------------- #
def efadlif_reference_step(x, p, state, *, thr=1.0, q=60.0,
                           matmul_dtype=jnp.bfloat16):
    """One reference step, with the same bf16-matmul / f32-accumulate policy."""
    u_tm1, z_tm1, w_tm1 = state
    W = p["weight"].astype(matmul_dtype)
    R = p["recurrent"].astype(matmul_dtype)
    soma = jnp.dot(x.astype(matmul_dtype), W.T,
                   preferred_element_type=jnp.float32) + p["bias"]
    soma = soma + jnp.dot(z_tm1.astype(matmul_dtype), R.T,
                          preferred_element_type=jnp.float32)
    u_t = p["decay_u"] * u_tm1 + (1.0 - p["decay_u"]) * (soma - w_tm1)
    z_t = ((u_t - thr) > 0.0).astype(jnp.float32)
    u_t = u_t * (1.0 - z_t)
    w_t = p["decay_w"] * w_tm1 + (1.0 - p["decay_w"]) * (
        p["a"] * u_tm1 + p["b"] * z_tm1) * q
    return z_t, (u_t, z_t, w_t)


if __name__ == "__main__":
    T, B, IN, OUT = 8, 8, 32, 128
    THR, Q = 1.0, 60.0

    key = jax.random.PRNGKey(0)
    k_par, k_x, k_u, k_z, k_w = jax.random.split(key, 5)

    params = init_params(k_par, IN, OUT)
    x_seq = jax.random.normal(k_x, (T, B, IN), jnp.float32)
    u0 = jax.random.normal(k_u, (B, OUT), jnp.float32) * 0.5
    z0 = (jax.random.uniform(k_z, (B, OUT), jnp.float32) > 0.7).astype(jnp.float32)
    w0 = jax.random.normal(k_w, (B, OUT), jnp.float32) * 0.1
    state0 = (u0, z0, w0)

    prepared = prepare_params(params, q=Q)

    # Fused-sequence kernel: one pallas_call for all T steps (time-chunked).
    z_seq, (u_T, z_T, w_T) = efadlif_sequence(x_seq, prepared, state0, thr=THR)
    jax.block_until_ready((z_seq, u_T, z_T, w_T))

    # Reference: T unrolled pure-JAX single steps (same bf16-matmul policy).
    state = state0
    z_ref_list = []
    for t in range(T):
        z_t, state = efadlif_reference_step(x_seq[t], params, state, thr=THR, q=Q)
        z_ref_list.append(z_t)
    z_ref = jnp.stack(z_ref_list)
    u_r, z_r, w_r = state

    assert jnp.allclose(z_seq.astype(jnp.float32), z_ref, atol=1e-5), "z mismatch"
    assert jnp.allclose(u_T, u_r, atol=1e-3, rtol=1e-3), "u_T mismatch"
    assert jnp.allclose(z_T, z_r, atol=1e-5), "z_T mismatch"
    assert jnp.allclose(w_T, w_r, atol=1e-3, rtol=1e-3), "w_T mismatch"

    # Time-remainder path (T % tt != 0 -> masked final chunk).
    z_seq_m, (u_Tm, z_Tm, w_Tm) = efadlif_sequence(x_seq, prepared, state0,
                                                   thr=THR, tt=3)
    jax.block_until_ready((z_seq_m, u_Tm, z_Tm, w_Tm))
    assert z_seq_m.shape == (T, B, OUT)
    assert jnp.allclose(z_seq_m.astype(jnp.float32), z_ref, atol=1e-5), \
        "masked z mismatch"
    assert jnp.allclose(u_Tm, u_r, atol=1e-3, rtol=1e-3), "masked u_T mismatch"
    assert jnp.allclose(w_Tm, w_r, atol=1e-3, rtol=1e-3), "masked w_T mismatch"

    # Single-step wrapper (module forward semantics).
    z1, (u1, _, w1) = efadlif_forward(x_seq[0], prepared, state0, thr=THR)
    z1_r, (u1_r, _, w1_r) = efadlif_reference_step(x_seq[0], params, state0,
                                                   thr=THR, q=Q)
    assert jnp.allclose(z1, z1_r, atol=1e-5), "single-step z mismatch"
    assert jnp.allclose(u1, u1_r, atol=1e-3, rtol=1e-3), "single-step u mismatch"
    assert jnp.allclose(w1, w1_r, atol=1e-3, rtol=1e-3), "single-step w mismatch"

    print("KERNEL_OK")
</pallas_src>

<mosaic_0001>
module attributes {stable_mosaic.version = 11 : i64} {
  func.func @_efadlif_chunk_kernel(%arg0: i32, %arg1: i32, %arg2: memref<8x8x32xbf16, #tpu.memory_space<vmem>>, %arg3: memref<32x128xbf16, #tpu.memory_space<vmem>>, %arg4: memref<128x128xbf16, #tpu.memory_space<vmem>>, %arg5: memref<8x128xf32, #tpu.memory_space<vmem>>, %arg6: memref<8x128xf32, #tpu.memory_space<vmem>>, %arg7: memref<8x128xf32, #tpu.memory_space<vmem>>, %arg8: memref<8x128xf32, #tpu.memory_space<vmem>>, %arg9: memref<8x8x128xbf16, #tpu.memory_space<vmem>>, %arg10: memref<8x128xf32, #tpu.memory_space<vmem>>, %arg11: memref<8x128xf32, #tpu.memory_space<vmem>>, %arg12: memref<8x128xf32, #tpu.memory_space<vmem>>, %arg13: memref<8x8x128xf32, #tpu.memory_space<vmem>>, %arg14: memref<8x128xf32, #tpu.memory_space<vmem>>, %arg15: memref<8x128xbf16, #tpu.memory_space<vmem>>, %arg16: memref<8x128xf32, #tpu.memory_space<vmem>>) attributes {dimension_semantics = [#tpu.dimension_semantics<parallel>, #tpu.dimension_semantics<arbitrary>], iteration_bounds = array<i64: 1, 1>, scalar_prefetch = 0 : i64, scratch_operands = 4 : i64, tpu.core_type = #tpu.core_type<tc>, window_params = [{transform_indices = @transform_0, window_bounds = array<i64: 8, 8, 32>}, {pipeline_mode = #tpu.pipeline_mode<synchronous>, transform_indices = @transform_1, window_bounds = array<i64: 32, 128>}, {pipeline_mode = #tpu.pipeline_mode<synchronous>, transform_indices = @transform_2, window_bounds = array<i64: 128, 128>}, {pipeline_mode = #tpu.pipeline_mode<synchronous>, transform_indices = @transform_3, window_bounds = array<i64: 8, 128>}, {transform_indices = @transform_4, window_bounds = array<i64: 8, 128>}, {transform_indices = @transform_5, window_bounds = array<i64: 8, 128>}, {transform_indices = @transform_6, window_bounds = array<i64: 8, 128>}, {transform_indices = @transform_7, window_bounds = array<i64: 8, 8, 128>}, {transform_indices = @transform_8, window_bounds = array<i64: 8, 128>}, {transform_indices = @transform_9, window_bounds = array<i64: 8, 128>}, {transform_indices = @transform_10, window_bounds = array<i64: 8, 128>}]} {
    %c0_i32 = arith.constant 0 : i32
    %0 = arith.cmpi eq, %arg1, %c0_i32 : i32
    %1 = arith.extui %0 : i1 to i32
    %c0_i32_0 = arith.constant 0 : i32
    %2 = arith.cmpi ne, %1, %c0_i32_0 : i32
    scf.if %2 {
      %c0_186 = arith.constant 0 : index
      %c0_187 = arith.constant 0 : index
      %295 = vector.load %arg6[%c0_186, %c0_187] : memref<8x128xf32, #tpu.memory_space<vmem>>, vector<8x128xf32>
      %c0_188 = arith.constant 0 : index
      %c0_189 = arith.constant 0 : index
      %296 = vector.load %arg14[%c0_188, %c0_189] : memref<8x128xf32, #tpu.memory_space<vmem>>, vector<8x128xf32>
      tpu.vector_store %arg14[%c0_188, %c0_189], %295 {strides = array<i32>} : memref<8x128xf32, #tpu.memory_space<vmem>>, vector<8x128xf32>,
      %c0_190 = arith.constant 0 : index
      %c0_191 = arith.constant 0 : index
      %297 = vector.load %arg7[%c0_190, %c0_191] : memref<8x128xf32, #tpu.memory_space<vmem>>, vector<8x128xf32>
      %298 = arith.truncf %297 : vector<8x128xf32> to vector<8x128xbf16>
      %c0_192 = arith.constant 0 : index
      %c0_193 = arith.constant 0 : index
      %299 = vector.load %arg15[%c0_192, %c0_193] : memref<8x128xbf16, #tpu.memory_space<vmem>>, vector<8x128xbf16>
      tpu.vector_store %arg15[%c0_192, %c0_193], %298 {strides = array<i32>} : memref<8x128xbf16, #tpu.memory_space<vmem>>, vector<8x128xbf16>,
      %c0_194 = arith.constant 0 : index
      %c0_195 = arith.constant 0 : index
      %300 = vector.load %arg8[%c0_194, %c0_195] : memref<8x128xf32, #tpu.memory_space<vmem>>, vector<8x128xf32>
      %c0_196 = arith.constant 0 : index
      %c0_197 = arith.constant 0 : index
      %301 = vector.load %arg16[%c0_196, %c0_197] : memref<8x128xf32, #tpu.memory_space<vmem>>, vector<8x128xf32>
      tpu.vector_store %arg16[%c0_196, %c0_197], %300 {strides = array<i32>} : memref<8x128xf32, #tpu.memory_space<vmem>>, vector<8x128xf32>,
    } else {
    }
    %c0 = arith.constant 0 : index
    %c0_1 = arith.constant 0 : index
    %3 = vector.load %arg5[%c0, %c0_1] : memref<8x128xf32, #tpu.memory_space<vmem>>, vector<1x128xf32>
    %c1 = arith.constant 1 : index
    %c0_2 = arith.constant 0 : index
    %4 = vector.load %arg5[%c1, %c0_2] : memref<8x128xf32, #tpu.memory_space<vmem>>, vector<1x128xf32>
    %5 = vector.shape_cast %4 : vector<1x128xf32> to vector<1x128xf32>
    %6 = vector.broadcast %5 : vector<1x128xf32> to vector<8x128xf32>
    %c2 = arith.constant 2 : index
    %c0_3 = arith.constant 0 : index
    %7 = vector.load %arg5[%c2, %c0_3] : memref<8x128xf32, #tpu.memory_space<vmem>>, vector<1x128xf32>
    %8 = vector.shape_cast %7 : vector<1x128xf32> to vector<1x128xf32>
    %9 = vector.broadcast %8 : vector<1x128xf32> to vector<8x128xf32>
    %c3 = arith.constant 3 : index
    %c0_4 = arith.constant 0 : index
    %10 = vector.load %arg5[%c3, %c0_4] : memref<8x128xf32, #tpu.memory_space<vmem>>, vector<1x128xf32>
    %11 = vector.shape_cast %10 : vector<1x128xf32> to vector<1x128xf32>
    %12 = vector.broadcast %11 : vector<1x128xf32> to vector<8x128xf32>
    %c4 = arith.constant 4 : index
    %c0_5 = arith.constant 0 : index
    %13 = vector.load %arg5[%c4, %c0_5] : memref<8x128xf32, #tpu.memory_space<vmem>>, vector<1x128xf32>
    %14 = vector.shape_cast %13 : vector<1x128xf32> to vector<1x128xf32>
    %15 = vector.broadcast %14 : vector<1x128xf32> to vector<8x128xf32>
    %c5 = arith.constant 5 : index
    %c0_6 = arith.constant 0 : index
    %16 = vector.load %arg5[%c5, %c0_6] : memref<8x128xf32, #tpu.memory_space<vmem>>, vector<1x128xf32>
    %17 = vector.shape_cast %16 : vector<1x128xf32> to vector<1x128xf32>
    %18 = vector.broadcast %17 : vector<1x128xf32> to vector<8x128xf32>
    %c0_7 = arith.constant 0 : index
    %c0_8 = arith.constant 0 : index
    %c0_9 = arith.constant 0 : index
    %19 = vector.load %arg2[%c0_7, %c0_8, %c0_9] : memref<8x8x32xbf16, #tpu.memory_space<vmem>>, vector<8x8x32xbf16>
    %20 = vector.shape_cast %19 : vector<8x8x32xbf16> to vector<64x32xbf16>
    %c0_10 = arith.constant 0 : index
    %c0_11 = arith.constant 0 : index
    %21 = vector.load %arg3[%c0_10, %c0_11] : memref<32x128xbf16, #tpu.memory_space<vmem>>, vector<32x128xbf16>
    %cst = arith.constant dense<0.000000e+00> : vector<64x128xf32>
    %22 = tpu.matmul %20, %21, %cst {dimension_numbers = #tpu.dot_dimension_numbers<[1], [0], [0], [1], [0, 0, 1, 1], [], []>} : vector<64x32xbf16>, vector<32x128xbf16>, vector<64x128xf32> -> vector<64x128xf32>
    %23 = vector.shape_cast %22 : vector<64x128xf32> to vector<8x8x128xf32>
    %24 = vector.shape_cast %3 : vector<1x128xf32> to vector<1x1x128xf32>
    %25 = vector.broadcast %24 : vector<1x1x128xf32> to vector<8x8x128xf32>
    %26 = arith.addf %23, %25 : vector<8x8x128xf32>
    %c0_12 = arith.constant 0 : index
    %c0_13 = arith.constant 0 : index
    %c0_14 = arith.constant 0 : index
    %27 = vector.load %arg13[%c0_12, %c0_13, %c0_14] : memref<8x8x128xf32, #tpu.memory_space<vmem>>, vector<8x8x128xf32>
    tpu.vector_store %arg13[%c0_12, %c0_13, %c0_14], %26 {strides = array<i32>} : memref<8x8x128xf32, #tpu.memory_space<vmem>>, vector<8x8x128xf32>,
    %c0_i32_15 = arith.constant 0 : i32
    %c0_16 = arith.constant 0 : index
    %c0_17 = arith.constant 0 : index
    %28 = vector.load %arg14[%c0_16, %c0_17] : memref<8x128xf32, #tpu.memory_space<vmem>>, vector<8x128xf32>
    %c0_18 = arith.constant 0 : index
    %c0_19 = arith.constant 0 : index
    %29 = vector.load %arg15[%c0_18, %c0_19] : memref<8x128xbf16, #tpu.memory_space<vmem>>, vector<8x128xbf16>
    %c0_20 = arith.constant 0 : index
    %c0_21 = arith.constant 0 : index
    %30 = vector.load %arg16[%c0_20, %c0_21] : memref<8x128xf32, #tpu.memory_space<vmem>>, vector<8x128xf32>
    %31 = arith.index_cast %c0_i32_15 : i32 to index
    %c0_22 = arith.constant 0 : index
    %c0_23 = arith.constant 0 : index
    %32 = vector.load %arg13[%31, %c0_22, %c0_23] : memref<8x8x128xf32, #tpu.memory_space<vmem>>, vector<1x8x128xf32>
    %33 = vector.shape_cast %32 : vector<1x8x128xf32> to vector<8x128xf32>
    %c0_24 = arith.constant 0 : index
    %c0_25 = arith.constant 0 : index
    %34 = vector.load %arg4[%c0_24, %c0_25] : memref<128x128xbf16, #tpu.memory_space<vmem>>, vector<128x128xbf16>
    %cst_26 = arith.constant dense<0.000000e+00> : vector<8x128xf32>
    %35 = tpu.matmul %29, %34, %cst_26 {dimension_numbers = #tpu.dot_dimension_numbers<[1], [0], [0], [1], [0, 0, 1, 1], [], []>} : vector<8x128xbf16>, vector<128x128xbf16>, vector<8x128xf32> -> vector<8x128xf32>
    %36 = arith.addf %33, %35 : vector<8x128xf32>
    %37 = arith.mulf %6, %28 : vector<8x128xf32>
    %38 = arith.subf %36, %30 : vector<8x128xf32>
    %39 = arith.mulf %9, %38 : vector<8x128xf32>
    %40 = arith.addf %37, %39 : vector<8x128xf32>
    %cst_27 = arith.constant 1.000000e+00 : f32
    %41 = vector.broadcast %cst_27 : f32 to vector<8x128xf32>
    %42 = arith.cmpf ogt, %40, %41 : vector<8x128xf32>
    %43 = arith.extui %42 : vector<8x128xi1> to vector<8x128xi32>
    %44 = arith.sitofp %43 : vector<8x128xi32> to vector<8x128xf32>
    %45 = arith.truncf %44 : vector<8x128xf32> to vector<8x128xbf16>
    %cst_28 = arith.constant 0.000000e+00 : f32
    %46 = vector.broadcast %cst_28 : f32 to vector<8x128xf32>
    %47 = arith.select %42, %46, %40 : vector<8x128xi1>, vector<8x128xf32>
    %48 = arith.mulf %12, %30 : vector<8x128xf32>
    %49 = arith.mulf %15, %28 : vector<8x128xf32>
    %50 = arith.addf %48, %49 : vector<8x128xf32>
    %51 = arith.extf %29 : vector<8x128xbf16> to vector<8x128xf32>
    %52 = arith.mulf %18, %51 : vector<8x128xf32>
    %53 = arith.addf %50, %52 : vector<8x128xf32>
    %c0_29 = arith.constant 0 : index
    %c0_30 = arith.constant 0 : index
    %54 = vector.load %arg14[%c0_29, %c0_30] : memref<8x128xf32, #tpu.memory_space<vmem>>, vector<8x128xf32>
    tpu.vector_store %arg14[%c0_29, %c0_30], %47 {strides = array<i32>} : memref<8x128xf32, #tpu.memory_space<vmem>>, vector<8x128xf32>,
    %c0_31 = arith.constant 0 : index
    %c0_32 = arith.constant 0 : index
    %55 = vector.load %arg15[%c0_31, %c0_32] : memref<8x128xbf16, #tpu.memory_space<vmem>>, vector<8x128xbf16>
    tpu.vector_store %arg15[%c0_31, %c0_32], %45 {strides = array<i32>} : memref<8x128xbf16, #tpu.memory_space<vmem>>, vector<8x128xbf16>,
    %c0_33 = arith.constant 0 : index
    %c0_34 = arith.constant 0 : index
    %56 = vector.load %arg16[%c0_33, %c0_34] : memref<8x128xf32, #tpu.memory_space<vmem>>, vector<8x128xf32>
    tpu.vector_store %arg16[%c0_33, %c0_34], %53 {strides = array<i32>} : memref<8x128xf32, #tpu.memory_space<vmem>>, vector<8x128xf32>,
    %57 = arith.index_cast %c0_i32_15 : i32 to index
    %c0_35 = arith.constant 0 : index
    %c0_36 = arith.constant 0 : index
    %58 = vector.load %arg9[%57, %c0_35, %c0_36] : memref<8x8x128xbf16, #tpu.memory_space<vmem>>, vector<1x8x128xbf16>
    %59 = vector.shape_cast %58 : vector<1x8x128xbf16> to vector<8x128xbf16>
    %60 = vector.shape_cast %45 : vector<8x128xbf16> to vector<1x8x128xbf16>
    tpu.vector_store %arg9[%57, %c0_35, %c0_36], %60 {strides = array<i32>} : memref<8x8x128xbf16, #tpu.memory_space<vmem>>, vector<1x8x128xbf16>,
    %c1_i32 = arith.constant 1 : i32
    %c0_37 = arith.constant 0 : index
    %c0_38 = arith.constant 0 : index
    %61 = vector.load %arg14[%c0_37, %c0_38] : memref<8x128xf32, #tpu.memory_space<vmem>>, vector<8x128xf32>
    %c0_39 = arith.constant 0 : index
    %c0_40 = arith.constant 0 : index
    %62 = vector.load %arg15[%c0_39, %c0_40] : memref<8x128xbf16, #tpu.memory_space<vmem>>, vector<8x128xbf16>
    %c0_41 = arith.constant 0 : index
    %c0_42 = arith.constant 0 : index
    %63 = vector.load %arg16[%c0_41, %c0_42] : memref<8x128xf32, #tpu.memory_space<vmem>>, vector<8x128xf32>
    %64 = arith.index_cast %c1_i32 : i32 to index
    %c0_43 = arith.constant 0 : index
    %c0_44 = arith.constant 0 : index
    %65 = vector.load %arg13[%64, %c0_43, %c0_44] : memref<8x8x128xf32, #tpu.memory_space<vmem>>, vector<1x8x128xf32>
    %66 = vector.shape_cast %65 : vector<1x8x128xf32> to vector<8x128xf32>
    %c0_45 = arith.constant 0 : index
    %c0_46 = arith.constant 0 : index
    %67 = vector.load %arg4[%c0_45, %c0_46] : memref<128x128xbf16, #tpu.memory_space<vmem>>, vector<128x128xbf16>
    %cst_47 = arith.constant dense<0.000000e+00> : vector<8x128xf32>
    %68 = tpu.matmul %62, %67, %cst_47 {dimension_numbers = #tpu.dot_dimension_numbers<[1], [0], [0], [1], [0, 0, 1, 1], [], []>} : vector<8x128xbf16>, vector<128x128xbf16>, vector<8x128xf32> -> vector<8x128xf32>
    %69 = arith.addf %66, %68 : vector<8x128xf32>
    %70 = arith.mulf %6, %61 : vector<8x128xf32>
    %71 = arith.subf %69, %63 : vector<8x128xf32>
    %72 = arith.mulf %9, %71 : vector<8x128xf32>
    %73 = arith.addf %70, %72 : vector<8x128xf32>
    %cst_48 = arith.constant 1.000000e+00 : f32
    %74 = vector.broadcast %cst_48 : f32 to vector<8x128xf32>
    %75 = arith.cmpf ogt, %73, %74 : vector<8x128xf32>
    %76 = arith.extui %75 : vector<8x128xi1> to vector<8x128xi32>
    %77 = arith.sitofp %76 : vector<8x128xi32> to vector<8x128xf32>
    %78 = arith.truncf %77 : vector<8x128xf32> to vector<8x128xbf16>
    %cst_49 = arith.constant 0.000000e+00 : f32
    %79 = vector.broadcast %cst_49 : f32 to vector<8x128xf32>
    %80 = arith.select %75, %79, %73 : vector<8x128xi1>, vector<8x128xf32>
    %81 = arith.mulf %12, %63 : vector<8x128xf32>
    %82 = arith.mulf %15, %61 : vector<8x128xf32>
    %83 = arith.addf %81, %82 : vector<8x128xf32>
    %84 = arith.extf %62 : vector<8x128xbf16> to vector<8x128xf32>
    %85 = arith.mulf %18, %84 : vector<8x128xf32>
    %86 = arith.addf %83, %85 : vector<8x128xf32>
    %c0_50 = arith.constant 0 : index
    %c0_51 = arith.constant 0 : index
    %87 = vector.load %arg14[%c0_50, %c0_51] : memref<8x128xf32, #tpu.memory_space<vmem>>, vector<8x128xf32>
    tpu.vector_store %arg14[%c0_50, %c0_51], %80 {strides = array<i32>} : memref<8x128xf32, #tpu.memory_space<vmem>>, vector<8x128xf32>,
    %c0_52 = arith.constant 0 : index
    %c0_53 = arith.constant 0 : index
    %88 = vector.load %arg15[%c0_52, %c0_53] : memref<8x128xbf16, #tpu.memory_space<vmem>>, vector<8x128xbf16>
    tpu.vector_store %arg15[%c0_52, %c0_53], %78 {strides = array<i32>} : memref<8x128xbf16, #tpu.memory_space<vmem>>, vector<8x128xbf16>,
    %c0_54 = arith.constant 0 : index
    %c0_55 = arith.constant 0 : index
    %89 = vector.load %arg16[%c0_54, %c0_55] : memref<8x128xf32, #tpu.memory_space<vmem>>, vector<8x128xf32>
    tpu.vector_store %arg16[%c0_54, %c0_55], %86 {strides = array<i32>} : memref<8x128xf32, #tpu.memory_space<vmem>>, vector<8x128xf32>,
    %90 = arith.index_cast %c1_i32 : i32 to index
    %c0_56 = arith.constant 0 : index
    %c0_57 = arith.constant 0 : index
    %91 = vector.load %arg9[%90, %c0_56, %c0_57] : memref<8x8x128xbf16, #tpu.memory_space<vmem>>, vector<1x8x128xbf16>
    %92 = vector.shape_cast %91 : vector<1x8x128xbf16> to vector<8x128xbf16>
    %93 = vector.shape_cast %78 : vector<8x128xbf16> to vector<1x8x128xbf16>
    tpu.vector_store %arg9[%90, %c0_56, %c0_57], %93 {strides = array<i32>} : memref<8x8x128xbf16, #tpu.memory_space<vmem>>, vector<1x8x128xbf16>,
    %c2_i32 = arith.constant 2 : i32
    %c0_58 = arith.constant 0 : index
    %c0_59 = arith.constant 0 : index
    %94 = vector.load %arg14[%c0_58, %c0_59] : memref<8x128xf32, #tpu.memory_space<vmem>>, vector<8x128xf32>
    %c0_60 = arith.constant 0 : index
    %c0_61 = arith.constant 0 : index
    %95 = vector.load %arg15[%c0_60, %c0_61] : memref<8x128xbf16, #tpu.memory_space<vmem>>, vector<8x128xbf16>
    %c0_62 = arith.constant 0 : index
    %c0_63 = arith.constant 0 : index
    %96 = vector.load %arg16[%c0_62, %c0_63] : memref<8x128xf32, #tpu.memory_space<vmem>>, vector<8x128xf32>
    %97 = arith.index_cast %c2_i32 : i32 to index
    %c0_64 = arith.constant 0 : index
    %c0_65 = arith.constant 0 : index
    %98 = vector.load %arg13[%97, %c0_64, %c0_65] : memref<8x8x128xf32, #tpu.memory_space<vmem>>, vector<1x8x128xf32>
    %99 = vector.shape_cast %98 : vector<1x8x128xf32> to vector<8x128xf32>
    %c0_66 = arith.constant 0 : index
    %c0_67 = arith.constant 0 : index
    %100 = vector.load %arg4[%c0_66, %c0_67] : memref<128x128xbf16, #tpu.memory_space<vmem>>, vector<128x128xbf16>
    %cst_68 = arith.constant dense<0.000000e+00> : vector<8x128xf32>
    %101 = tpu.matmul %95, %100, %cst_68 {dimension_numbers = #tpu.dot_dimension_numbers<[1], [0], [0], [1], [0, 0, 1, 1], [], []>} : vector<8x128xbf16>, vector<128x128xbf16>, vector<8x128xf32> -> vector<8x128xf32>
    %102 = arith.addf %99, %101 : vector<8x128xf32>
    %103 = arith.mulf %6, %94 : vector<8x128xf32>
    %104 = arith.subf %102, %96 : vector<8x128xf32>
    %105 = arith.mulf %9, %104 : vector<8x128xf32>
    %106 = arith.addf %103, %105 : vector<8x128xf32>
    %cst_69 = arith.constant 1.000000e+00 : f32
    %107 = vector.broadcast %cst_69 : f32 to vector<8x128xf32>
    %108 = arith.cmpf ogt, %106, %107 : vector<8x128xf32>
    %109 = arith.extui %108 : vector<8x128xi1> to vector<8x128xi32>
    %110 = arith.sitofp %109 : vector<8x128xi32> to vector<8x128xf32>
    %111 = arith.truncf %110 : vector<8x128xf32> to vector<8x128xbf16>
    %cst_70 = arith.constant 0.000000e+00 : f32
    %112 = vector.broadcast %cst_70 : f32 to vector<8x128xf32>
    %113 = arith.select %108, %112, %106 : vector<8x128xi1>, vector<8x128xf32>
    %114 = arith.mulf %12, %96 : vector<8x128xf32>
    %115 = arith.mulf %15, %94 : vector<8x128xf32>
    %116 = arith.addf %114, %115 : vector<8x128xf32>
    %117 = arith.extf %95 : vector<8x128xbf16> to vector<8x128xf32>
    %118 = arith.mulf %18, %117 : vector<8x128xf32>
    %119 = arith.addf %116, %118 : vector<8x128xf32>
    %c0_71 = arith.constant 0 : index
    %c0_72 = arith.constant 0 : index
    %120 = vector.load %arg14[%c0_71, %c0_72] : memref<8x128xf32, #tpu.memory_space<vmem>>, vector<8x128xf32>
    tpu.vector_store %arg14[%c0_71, %c0_72], %113 {strides = array<i32>} : memref<8x128xf32, #tpu.memory_space<vmem>>, vector<8x128xf32>,
    %c0_73 = arith.constant 0 : index
    %c0_74 = arith.constant 0 : index
    %121 = vector.load %arg15[%c0_73, %c0_74] : memref<8x128xbf16, #tpu.memory_space<vmem>>, vector<8x128xbf16>
    tpu.vector_store %arg15[%c0_73, %c0_74], %111 {strides = array<i32>} : memref<8x128xbf16, #tpu.memory_space<vmem>>, vector<8x128xbf16>,
    %c0_75 = arith.constant 0 : index
    %c0_76 = arith.constant 0 : index
    %122 = vector.load %arg16[%c0_75, %c0_76] : memref<8x128xf32, #tpu.memory_space<vmem>>, vector<8x128xf32>
    tpu.vector_store %arg16[%c0_75, %c0_76], %119 {strides = array<i32>} : memref<8x128xf32, #tpu.memory_space<vmem>>, vector<8x128xf32>,
    %123 = arith.index_cast %c2_i32 : i32 to index
    %c0_77 = arith.constant 0 : index
    %c0_78 = arith.constant 0 : index
    %124 = vector.load %arg9[%123, %c0_77, %c0_78] : memref<8x8x128xbf16, #tpu.memory_space<vmem>>, vector<1x8x128xbf16>
    %125 = vector.shape_cast %124 : vector<1x8x128xbf16> to vector<8x128xbf16>
    %126 = vector.shape_cast %111 : vector<8x128xbf16> to vector<1x8x128xbf16>
    tpu.vector_store %arg9[%123, %c0_77, %c0_78], %126 {strides = array<i32>} : memref<8x8x128xbf16, #tpu.memory_space<vmem>>, vector<1x8x128xbf16>,
    %c3_i32 = arith.constant 3 : i32
    %c0_79 = arith.constant 0 : index
    %c0_80 = arith.constant 0 : index
    %127 = vector.load %arg14[%c0_79, %c0_80] : memref<8x128xf32, #tpu.memory_space<vmem>>, vector<8x128xf32>
    %c0_81 = arith.constant 0 : index
    %c0_82 = arith.constant 0 : index
    %128 = vector.load %arg15[%c0_81, %c0_82] : memref<8x128xbf16, #tpu.memory_space<vmem>>, vector<8x128xbf16>
    %c0_83 = arith.constant 0 : index
    %c0_84 = arith.constant 0 : index
    %129 = vector.load %arg16[%c0_83, %c0_84] : memref<8x128xf32, #tpu.memory_space<vmem>>, vector<8x128xf32>
    %130 = arith.index_cast %c3_i32 : i32 to index
    %c0_85 = arith.constant 0 : index
    %c0_86 = arith.constant 0 : index
    %131 = vector.load %arg13[%130, %c0_85, %c0_86] : memref<8x8x128xf32, #tpu.memory_space<vmem>>, vector<1x8x128xf32>
    %132 = vector.shape_cast %131 : vector<1x8x128xf32> to vector<8x128xf32>
    %c0_87 = arith.constant 0 : index
    %c0_88 = arith.constant 0 : index
    %133 = vector.load %arg4[%c0_87, %c0_88] : memref<128x128xbf16, #tpu.memory_space<vmem>>, vector<128x128xbf16>
    %cst_89 = arith.constant dense<0.000000e+00> : vector<8x128xf32>
    %134 = tpu.matmul %128, %133, %cst_89 {dimension_numbers = #tpu.dot_dimension_numbers<[1], [0], [0], [1], [0, 0, 1, 1], [], []>} : vector<8x128xbf16>, vector<128x128xbf16>, vector<8x128xf32> -> vector<8x128xf32>
    %135 = arith.addf %132, %134 : vector<8x128xf32>
    %136 = arith.mulf %6, %127 : vector<8x128xf32>
    %137 = arith.subf %135, %129 : vector<8x128xf32>
    %138 = arith.mulf %9, %137 : vector<8x128xf32>
    %139 = arith.addf %136, %138 : vector<8x128xf32>
    %cst_90 = arith.constant 1.000000e+00 : f32
    %140 = vector.broadcast %cst_90 : f32 to vector<8x128xf32>
    %141 = arith.cmpf ogt, %139, %140 : vector<8x128xf32>
    %142 = arith.extui %141 : vector<8x128xi1> to vector<8x128xi32>
    %143 = arith.sitofp %142 : vector<8x128xi32> to vector<8x128xf32>
    %144 = arith.truncf %143 : vector<8x128xf32> to vector<8x128xbf16>
    %cst_91 = arith.constant 0.000000e+00 : f32
    %145 = vector.broadcast %cst_91 : f32 to vector<8x128xf32>
    %146 = arith.select %141, %145, %139 : vector<8x128xi1>, vector<8x128xf32>
    %147 = arith.mulf %12, %129 : vector<8x128xf32>
    %148 = arith.mulf %15, %127 : vector<8x128xf32>
    %149 = arith.addf %147, %148 : vector<8x128xf32>
    %150 = arith.extf %128 : vector<8x128xbf16> to vector<8x128xf32>
    %151 = arith.mulf %18, %150 : vector<8x128xf32>
    %152 = arith.addf %149, %151 : vector<8x128xf32>
    %c0_92 = arith.constant 0 : index
    %c0_93 = arith.constant 0 : index
    %153 = vector.load %arg14[%c0_92, %c0_93] : memref<8x128xf32, #tpu.memory_space<vmem>>, vector<8x128xf32>
    tpu.vector_store %arg14[%c0_92, %c0_93], %146 {strides = array<i32>} : memref<8x128xf32, #tpu.memory_space<vmem>>, vector<8x128xf32>,
    %c0_94 = arith.constant 0 : index
    %c0_95 = arith.constant 0 : index
    %154 = vector.load %arg15[%c0_94, %c0_95] : memref<8x128xbf16, #tpu.memory_space<vmem>>, vector<8x128xbf16>
    tpu.vector_store %arg15[%c0_94, %c0_95], %144 {strides = array<i32>} : memref<8x128xbf16, #tpu.memory_space<vmem>>, vector<8x128xbf16>,
    %c0_96 = arith.constant 0 : index
    %c0_97 = arith.constant 0 : index
    %155 = vector.load %arg16[%c0_96, %c0_97] : memref<8x128xf32, #tpu.memory_space<vmem>>, vector<8x128xf32>
    tpu.vector_store %arg16[%c0_96, %c0_97], %152 {strides = array<i32>} : memref<8x128xf32, #tpu.memory_space<vmem>>, vector<8x128xf32>,
    %156 = arith.index_cast %c3_i32 : i32 to index
    %c0_98 = arith.constant 0 : index
    %c0_99 = arith.constant 0 : index
    %157 = vector.load %arg9[%156, %c0_98, %c0_99] : memref<8x8x128xbf16, #tpu.memory_space<vmem>>, vector<1x8x128xbf16>
    %158 = vector.shape_cast %157 : vector<1x8x128xbf16> to vector<8x128xbf16>
    %159 = vector.shape_cast %144 : vector<8x128xbf16> to vector<1x8x128xbf16>
    tpu.vector_store %arg9[%156, %c0_98, %c0_99], %159 {strides = array<i32>} : memref<8x8x128xbf16, #tpu.memory_space<vmem>>, vector<1x8x128xbf16>,
    %c4_i32 = arith.constant 4 : i32
    %c0_100 = arith.constant 0 : index
    %c0_101 = arith.constant 0 : index
    %160 = vector.load %arg14[%c0_100, %c0_101] : memref<8x128xf32, #tpu.memory_space<vmem>>, vector<8x128xf32>
    %c0_102 = arith.constant 0 : index
    %c0_103 = arith.constant 0 : index
    %161 = vector.load %arg15[%c0_102, %c0_103] : memref<8x128xbf16, #tpu.memory_space<vmem>>, vector<8x128xbf16>
    %c0_104 = arith.constant 0 : index
    %c0_105 = arith.constant 0 : index
    %162 = vector.load %arg16[%c0_104, %c0_105] : memref<8x128xf32, #tpu.memory_space<vmem>>, vector<8x128xf32>
    %163 = arith.index_cast %c4_i32 : i32 to index
    %c0_106 = arith.constant 0 : index
    %c0_107 = arith.constant 0 : index
    %164 = vector.load %arg13[%163, %c0_106, %c0_107] : memref<8x8x128xf32, #tpu.memory_space<vmem>>, vector<1x8x128xf32>
    %165 = vector.shape_cast %164 : vector<1x8x128xf32> to vector<8x128xf32>
    %c0_108 = arith.constant 0 : index
    %c0_109 = arith.constant 0 : index
    %166 = vector.load %arg4[%c0_108, %c0_109] : memref<128x128xbf16, #tpu.memory_space<vmem>>, vector<128x128xbf16>
    %cst_110 = arith.constant dense<0.000000e+00> : vector<8x128xf32>
    %167 = tpu.matmul %161, %166, %cst_110 {dimension_numbers = #tpu.dot_dimension_numbers<[1], [0], [0], [1], [0, 0, 1, 1], [], []>} : vector<8x128xbf16>, vector<128x128xbf16>, vector<8x128xf32> -> vector<8x128xf32>
    %168 = arith.addf %165, %167 : vector<8x128xf32>
    %169 = arith.mulf %6, %160 : vector<8x128xf32>
    %170 = arith.subf %168, %162 : vector<8x128xf32>
    %171 = arith.mulf %9, %170 : vector<8x128xf32>
    %172 = arith.addf %169, %171 : vector<8x128xf32>
    %cst_111 = arith.constant 1.000000e+00 : f32
    %173 = vector.broadcast %cst_111 : f32 to vector<8x128xf32>
    %174 = arith.cmpf ogt, %172, %173 : vector<8x128xf32>
    %175 = arith.extui %174 : vector<8x128xi1> to vector<8x128xi32>
    %176 = arith.sitofp %175 : vector<8x128xi32> to vector<8x128xf32>
    %177 = arith.truncf %176 : vector<8x128xf32> to vector<8x128xbf16>
    %cst_112 = arith.constant 0.000000e+00 : f32
    %178 = vector.broadcast %cst_112 : f32 to vector<8x128xf32>
    %179 = arith.select %174, %178, %172 : vector<8x128xi1>, vector<8x128xf32>
    %180 = arith.mulf %12, %162 : vector<8x128xf32>
    %181 = arith.mulf %15, %160 : vector<8x128xf32>
    %182 = arith.addf %180, %181 : vector<8x128xf32>
    %183 = arith.extf %161 : vector<8x128xbf16> to vector<8x128xf32>
    %184 = arith.mulf %18, %183 : vector<8x128xf32>
    %185 = arith.addf %182, %184 : vector<8x128xf32>
    %c0_113 = arith.constant 0 : index
    %c0_114 = arith.constant 0 : index
    %186 = vector.load %arg14[%c0_113, %c0_114] : memref<8x128xf32, #tpu.memory_space<vmem>>, vector<8x128xf32>
    tpu.vector_store %arg14[%c0_113, %c0_114], %179 {strides = array<i32>} : memref<8x128xf32, #tpu.memory_space<vmem>>, vector<8x128xf32>,
    %c0_115 = arith.constant 0 : index
    %c0_116 = arith.constant 0 : index
    %187 = vector.load %arg15[%c0_115, %c0_116] : memref<8x128xbf16, #tpu.memory_space<vmem>>, vector<8x128xbf16>
    tpu.vector_store %arg15[%c0_115, %c0_116], %177 {strides = array<i32>} : memref<8x128xbf16, #tpu.memory_space<vmem>>, vector<8x128xbf16>,
    %c0_117 = arith.constant 0 : index
    %c0_118 = arith.constant 0 : index
    %188 = vector.load %arg16[%c0_117, %c0_118] : memref<8x128xf32, #tpu.memory_space<vmem>>, vector<8x128xf32>
    tpu.vector_store %arg16[%c0_117, %c0_118], %185 {strides = array<i32>} : memref<8x128xf32, #tpu.memory_space<vmem>>, vector<8x128xf32>,
    %189 = arith.index_cast %c4_i32 : i32 to index
    %c0_119 = arith.constant 0 : index
    %c0_120 = arith.constant 0 : index
    %190 = vector.load %arg9[%189, %c0_119, %c0_120] : memref<8x8x128xbf16, #tpu.memory_space<vmem>>, vector<1x8x128xbf16>
    %191 = vector.shape_cast %190 : vector<1x8x128xbf16> to vector<8x128xbf16>
    %192 = vector.shape_cast %177 : vector<8x128xbf16> to vector<1x8x128xbf16>
    tpu.vector_store %arg9[%189, %c0_119, %c0_120], %192 {strides = array<i32>} : memref<8x8x128xbf16, #tpu.memory_space<vmem>>, vector<1x8x128xbf16>,
    %c5_i32 = arith.constant 5 : i32
    %c0_121 = arith.constant 0 : index
    %c0_122 = arith.constant 0 : index
    %193 = vector.load %arg14[%c0_121, %c0_122] : memref<8x128xf32, #tpu.memory_space<vmem>>, vector<8x128xf32>
    %c0_123 = arith.constant 0 : index
    %c0_124 = arith.constant 0 : index
    %194 = vector.load %arg15[%c0_123, %c0_124] : memref<8x128xbf16, #tpu.memory_space<vmem>>, vector<8x128xbf16>
    %c0_125 = arith.constant 0 : index
    %c0_126 = arith.constant 0 : index
    %195 = vector.load %arg16[%c0_125, %c0_126] : memref<8x128xf32, #tpu.memory_space<vmem>>, vector<8x128xf32>
    %196 = arith.index_cast %c5_i32 : i32 to index
    %c0_127 = arith.constant 0 : index
    %c0_128 = arith.constant 0 : index
    %197 = vector.load %arg13[%196, %c0_127, %c0_128] : memref<8x8x128xf32, #tpu.memory_space<vmem>>, vector<1x8x128xf32>
    %198 = vector.shape_cast %197 : vector<1x8x128xf32> to vector<8x128xf32>
    %c0_129 = arith.constant 0 : index
    %c0_130 = arith.constant 0 : index
    %199 = vector.load %arg4[%c0_129, %c0_130] : memref<128x128xbf16, #tpu.memory_space<vmem>>, vector<128x128xbf16>
    %cst_131 = arith.constant dense<0.000000e+00> : vector<8x128xf32>
    %200 = tpu.matmul %194, %199, %cst_131 {dimension_numbers = #tpu.dot_dimension_numbers<[1], [0], [0], [1], [0, 0, 1, 1], [], []>} : vector<8x128xbf16>, vector<128x128xbf16>, vector<8x128xf32> -> vector<8x128xf32>
    %201 = arith.addf %198, %200 : vector<8x128xf32>
    %202 = arith.mulf %6, %193 : vector<8x128xf32>
    %203 = arith.subf %201, %195 : vector<8x128xf32>
    %204 = arith.mulf %9, %203 : vector<8x128xf32>
    %205 = arith.addf %202, %204 : vector<8x128xf32>
    %cst_132 = arith.constant 1.000000e+00 : f32
    %206 = vector.broadcast %cst_132 : f32 to vector<8x128xf32>
    %207 = arith.cmpf ogt, %205, %206 : vector<8x128xf32>
    %208 = arith.extui %207 : vector<8x128xi1> to vector<8x128xi32>
    %209 = arith.sitofp %208 : vector<8x128xi32> to vector<8x128xf32>
    %210 = arith.truncf %209 : vector<8x128xf32> to vector<8x128xbf16>
    %cst_133 = arith.constant 0.000000e+00 : f32
    %211 = vector.broadcast %cst_133 : f32 to vector<8x128xf32>
    %212 = arith.select %207, %211, %205 : vector<8x128xi1>, vector<8x128xf32>
    %213 = arith.mulf %12, %195 : vector<8x128xf32>
    %214 = arith.mulf %15, %193 : vector<8x128xf32>
    %215 = arith.addf %213, %214 : vector<8x128xf32>
    %216 = arith.extf %194 : vector<8x128xbf16> to vector<8x128xf32>
    %217 = arith.mulf %18, %216 : vector<8x128xf32>
    %218 = arith.addf %215, %217 : vector<8x128xf32>
    %c0_134 = arith.constant 0 : index
    %c0_135 = arith.constant 0 : index
    %219 = vector.load %arg14[%c0_134, %c0_135] : memref<8x128xf32, #tpu.memory_space<vmem>>, vector<8x128xf32>
    tpu.vector_store %arg14[%c0_134, %c0_135], %212 {strides = array<i32>} : memref<8x128xf32, #tpu.memory_space<vmem>>, vector<8x128xf32>,
    %c0_136 = arith.constant 0 : index
    %c0_137 = arith.constant 0 : index
    %220 = vector.load %arg15[%c0_136, %c0_137] : memref<8x128xbf16, #tpu.memory_space<vmem>>, vector<8x128xbf16>
    tpu.vector_store %arg15[%c0_136, %c0_137], %210 {strides = array<i32>} : memref<8x128xbf16, #tpu.memory_space<vmem>>, vector<8x128xbf16>,
    %c0_138 = arith.constant 0 : index
    %c0_139 = arith.constant 0 : index
    %221 = vector.load %arg16[%c0_138, %c0_139] : memref<8x128xf32, #tpu.memory_space<vmem>>, vector<8x128xf32>
    tpu.vector_store %arg16[%c0_138, %c0_139], %218 {strides = array<i32>} : memref<8x128xf32, #tpu.memory_space<vmem>>, vector<8x128xf32>,
    %222 = arith.index_cast %c5_i32 : i32 to index
    %c0_140 = arith.constant 0 : index
    %c0_141 = arith.constant 0 : index
    %223 = vector.load %arg9[%222, %c0_140, %c0_141] : memref<8x8x128xbf16, #tpu.memory_space<vmem>>, vector<1x8x128xbf16>
    %224 = vector.shape_cast %223 : vector<1x8x128xbf16> to vector<8x128xbf16>
    %225 = vector.shape_cast %210 : vector<8x128xbf16> to vector<1x8x128xbf16>
    tpu.vector_store %arg9[%222, %c0_140, %c0_141], %225 {strides = array<i32>} : memref<8x8x128xbf16, #tpu.memory_space<vmem>>, vector<1x8x128xbf16>,
    %c6_i32 = arith.constant 6 : i32
    %c0_142 = arith.constant 0 : index
    %c0_143 = arith.constant 0 : index
    %226 = vector.load %arg14[%c0_142, %c0_143] : memref<8x128xf32, #tpu.memory_space<vmem>>, vector<8x128xf32>
    %c0_144 = arith.constant 0 : index
    %c0_145 = arith.constant 0 : index
    %227 = vector.load %arg15[%c0_144, %c0_145] : memref<8x128xbf16, #tpu.memory_space<vmem>>, vector<8x128xbf16>
    %c0_146 = arith.constant 0 : index
    %c0_147 = arith.constant 0 : index
    %228 = vector.load %arg16[%c0_146, %c0_147] : memref<8x128xf32, #tpu.memory_space<vmem>>, vector<8x128xf32>
    %229 = arith.index_cast %c6_i32 : i32 to index
    %c0_148 = arith.constant 0 : index
    %c0_149 = arith.constant 0 : index
    %230 = vector.load %arg13[%229, %c0_148, %c0_149] : memref<8x8x128xf32, #tpu.memory_space<vmem>>, vector<1x8x128xf32>
    %231 = vector.shape_cast %230 : vector<1x8x128xf32> to vector<8x128xf32>
    %c0_150 = arith.constant 0 : index
    %c0_151 = arith.constant 0 : index
    %232 = vector.load %arg4[%c0_150, %c0_151] : memref<128x128xbf16, #tpu.memory_space<vmem>>, vector<128x128xbf16>
    %cst_152 = arith.constant dense<0.000000e+00> : vector<8x128xf32>
    %233 = tpu.matmul %227, %232, %cst_152 {dimension_numbers = #tpu.dot_dimension_numbers<[1], [0], [0], [1], [0, 0, 1, 1], [], []>} : vector<8x128xbf16>, vector<128x128xbf16>, vector<8x128xf32> -> vector<8x128xf32>
    %234 = arith.addf %231, %233 : vector<8x128xf32>
    %235 = arith.mulf %6, %226 : vector<8x128xf32>
    %236 = arith.subf %234, %228 : vector<8x128xf32>
    %237 = arith.mulf %9, %236 : vector<8x128xf32>
    %238 = arith.addf %235, %237 : vector<8x128xf32>
    %cst_153 = arith.constant 1.000000e+00 : f32
    %239 = vector.broadcast %cst_153 : f32 to vector<8x128xf32>
    %240 = arith.cmpf ogt, %238, %239 : vector<8x128xf32>
    %241 = arith.extui %240 : vector<8x128xi1> to vector<8x128xi32>
    %242 = arith.sitofp %241 : vector<8x128xi32> to vector<8x128xf32>
    %243 = arith.truncf %242 : vector<8x128xf32> to vector<8x128xbf16>
    %cst_154 = arith.constant 0.000000e+00 : f32
    %244 = vector.broadcast %cst_154 : f32 to vector<8x128xf32>
    %245 = arith.select %240, %244, %238 : vector<8x128xi1>, vector<8x128xf32>
    %246 = arith.mulf %12, %228 : vector<8x128xf32>
    %247 = arith.mulf %15, %226 : vector<8x128xf32>
    %248 = arith.addf %246, %247 : vector<8x128xf32>
    %249 = arith.extf %227 : vector<8x128xbf16> to vector<8x128xf32>
    %250 = arith.mulf %18, %249 : vector<8x128xf32>
    %251 = arith.addf %248, %250 : vector<8x128xf32>
    %c0_155 = arith.constant 0 : index
    %c0_156 = arith.constant 0 : index
    %252 = vector.load %arg14[%c0_155, %c0_156] : memref<8x128xf32, #tpu.memory_space<vmem>>, vector<8x128xf32>
    tpu.vector_store %arg14[%c0_155, %c0_156], %245 {strides = array<i32>} : memref<8x128xf32, #tpu.memory_space<vmem>>, vector<8x128xf32>,
    %c0_157 = arith.constant 0 : index
    %c0_158 = arith.constant 0 : index
    %253 = vector.load %arg15[%c0_157, %c0_158] : memref<8x128xbf16, #tpu.memory_space<vmem>>, vector<8x128xbf16>
    tpu.vector_store %arg15[%c0_157, %c0_158], %243 {strides = array<i32>} : memref<8x128xbf16, #tpu.memory_space<vmem>>, vector<8x128xbf16>,
    %c0_159 = arith.constant 0 : index
    %c0_160 = arith.constant 0 : index
    %254 = vector.load %arg16[%c0_159, %c0_160] : memref<8x128xf32, #tpu.memory_space<vmem>>, vector<8x128xf32>
    tpu.vector_store %arg16[%c0_159, %c0_160], %251 {strides = array<i32>} : memref<8x128xf32, #tpu.memory_space<vmem>>, vector<8x128xf32>,
    %255 = arith.index_cast %c6_i32 : i32 to index
    %c0_161 = arith.constant 0 : index
    %c0_162 = arith.constant 0 : index
    %256 = vector.load %arg9[%255, %c0_161, %c0_162] : memref<8x8x128xbf16, #tpu.memory_space<vmem>>, vector<1x8x128xbf16>
    %257 = vector.shape_cast %256 : vector<1x8x128xbf16> to vector<8x128xbf16>
    %258 = vector.shape_cast %243 : vector<8x128xbf16> to vector<1x8x128xbf16>
    tpu.vector_store %arg9[%255, %c0_161, %c0_162], %258 {strides = array<i32>} : memref<8x8x128xbf16, #tpu.memory_space<vmem>>, vector<1x8x128xbf16>,
    %c7_i32 = arith.constant 7 : i32
    %c0_163 = arith.constant 0 : index
    %c0_164 = arith.constant 0 : index
    %259 = vector.load %arg14[%c0_163, %c0_164] : memref<8x128xf32, #tpu.memory_space<vmem>>, vector<8x128xf32>
    %c0_165 = arith.constant 0 : index
    %c0_166 = arith.constant 0 : index
    %260 = vector.load %arg15[%c0_165, %c0_166] : memref<8x128xbf16, #tpu.memory_space<vmem>>, vector<8x128xbf16>
    %c0_167 = arith.constant 0 : index
    %c0_168 = arith.constant 0 : index
    %261 = vector.load %arg16[%c0_167, %c0_168] : memref<8x128xf32, #tpu.memory_space<vmem>>, vector<8x128xf32>
    %262 = arith.index_cast %c7_i32 : i32 to index
    %c0_169 = arith.constant 0 : index
    %c0_170 = arith.constant 0 : index
    %263 = vector.load %arg13[%262, %c0_169, %c0_170] : memref<8x8x128xf32, #tpu.memory_space<vmem>>, vector<1x8x128xf32>
    %264 = vector.shape_cast %263 : vector<1x8x128xf32> to vector<8x128xf32>
    %c0_171 = arith.constant 0 : index
    %c0_172 = arith.constant 0 : index
    %265 = vector.load %arg4[%c0_171, %c0_172] : memref<128x128xbf16, #tpu.memory_space<vmem>>, vector<128x128xbf16>
    %cst_173 = arith.constant dense<0.000000e+00> : vector<8x128xf32>
    %266 = tpu.matmul %260, %265, %cst_173 {dimension_numbers = #tpu.dot_dimension_numbers<[1], [0], [0], [1], [0, 0, 1, 1], [], []>} : vector<8x128xbf16>, vector<128x128xbf16>, vector<8x128xf32> -> vector<8x128xf32>
    %267 = arith.addf %264, %266 : vector<8x128xf32>
    %268 = arith.mulf %6, %259 : vector<8x128xf32>
    %269 = arith.subf %267, %261 : vector<8x128xf32>
    %270 = arith.mulf %9, %269 : vector<8x128xf32>
    %271 = arith.addf %268, %270 : vector<8x128xf32>
    %cst_174 = arith.constant 1.000000e+00 : f32
    %272 = vector.broadcast %cst_174 : f32 to vector<8x128xf32>
    %273 = arith.cmpf ogt, %271, %272 : vector<8x128xf32>
    %274 = arith.extui %273 : vector<8x128xi1> to vector<8x128xi32>
    %275 = arith.sitofp %274 : vector<8x128xi32> to vector<8x128xf32>
    %276 = arith.truncf %275 : vector<8x128xf32> to vector<8x128xbf16>
    %cst_175 = arith.constant 0.000000e+00 : f32
    %277 = vector.broadcast %cst_175 : f32 to vector<8x128xf32>
    %278 = arith.select %273, %277, %271 : vector<8x128xi1>, vector<8x128xf32>
    %279 = arith.mulf %12, %261 : vector<8x128xf32>
    %280 = arith.mulf %15, %259 : vector<8x128xf32>
    %281 = arith.addf %279, %280 : vector<8x128xf32>
    %282 = arith.extf %260 : vector<8x128xbf16> to vector<8x128xf32>
    %283 = arith.mulf %18, %282 : vector<8x128xf32>
    %284 = arith.addf %281, %283 : vector<8x128xf32>
    %c0_176 = arith.constant 0 : index
    %c0_177 = arith.constant 0 : index
    %285 = vector.load %arg14[%c0_176, %c0_177] : memref<8x128xf32, #tpu.memory_space<vmem>>, vector<8x128xf32>
    tpu.vector_store %arg14[%c0_176, %c0_177], %278 {strides = array<i32>} : memref<8x128xf32, #tpu.memory_space<vmem>>, vector<8x128xf32>,
    %c0_178 = arith.constant 0 : index
    %c0_179 = arith.constant 0 : index
    %286 = vector.load %arg15[%c0_178, %c0_179] : memref<8x128xbf16, #tpu.memory_space<vmem>>, vector<8x128xbf16>
    tpu.vector_store %arg15[%c0_178, %c0_179], %276 {strides = array<i32>} : memref<8x128xbf16, #tpu.memory_space<vmem>>, vector<8x128xbf16>,
    %c0_180 = arith.constant 0 : index
    %c0_181 = arith.constant 0 : index
    %287 = vector.load %arg16[%c0_180, %c0_181] : memref<8x128xf32, #tpu.memory_space<vmem>>, vector<8x128xf32>
    tpu.vector_store %arg16[%c0_180, %c0_181], %284 {strides = array<i32>} : memref<8x128xf32, #tpu.memory_space<vmem>>, vector<8x128xf32>,
    %288 = arith.index_cast %c7_i32 : i32 to index
    %c0_182 = arith.constant 0 : index
    %c0_183 = arith.constant 0 : index
    %289 = vector.load %arg9[%288, %c0_182, %c0_183] : memref<8x8x128xbf16, #tpu.memory_space<vmem>>, vector<1x8x128xbf16>
    %290 = vector.shape_cast %289 : vector<1x8x128xbf16> to vector<8x128xbf16>
    %291 = vector.shape_cast %276 : vector<8x128xbf16> to vector<1x8x128xbf16>
    tpu.vector_store %arg9[%288, %c0_182, %c0_183], %291 {strides = array<i32>} : memref<8x8x128xbf16, #tpu.memory_space<vmem>>, vector<1x8x128xbf16>,
    %c8_i32 = arith.constant 8 : i32
    %c0_i32_184 = arith.constant 0 : i32
    %292 = arith.cmpi eq, %arg1, %c0_i32_184 : i32
    %293 = arith.extui %292 : i1 to i32
    %c0_i32_185 = arith.constant 0 : i32
    %294 = arith.cmpi ne, %293, %c0_i32_185 : i32
    scf.if %294 {
      %c0_186 = arith.constant 0 : index
      %c0_187 = arith.constant 0 : index
      %295 = vector.load %arg14[%c0_186, %c0_187] : memref<8x128xf32, #tpu.memory_space<vmem>>, vector<8x128xf32>
      %c0_188 = arith.constant 0 : index
      %c0_189 = arith.constant 0 : index
      %296 = vector.load %arg10[%c0_188, %c0_189] : memref<8x128xf32, #tpu.memory_space<vmem>>, vector<8x128xf32>
      tpu.vector_store %arg10[%c0_188, %c0_189], %295 {strides = array<i32>} : memref<8x128xf32, #tpu.memory_space<vmem>>, vector<8x128xf32>,
      %c0_190 = arith.constant 0 : index
      %c0_191 = arith.constant 0 : index
      %297 = vector.load %arg15[%c0_190, %c0_191] : memref<8x128xbf16, #tpu.memory_space<vmem>>, vector<8x128xbf16>
      %298 = arith.extf %297 : vector<8x128xbf16> to vector<8x128xf32>
      %c0_192 = arith.constant 0 : index
      %c0_193 = arith.constant 0 : index
      %299 = vector.load %arg11[%c0_192, %c0_193] : memref<8x128xf32, #tpu.memory_space<vmem>>, vector<8x128xf32>
      tpu.vector_store %arg11[%c0_192, %c0_193], %298 {strides = array<i32>} : memref<8x128xf32, #tpu.memory_space<vmem>>, vector<8x128xf32>,
      %c0_194 = arith.constant 0 : index
      %c0_195 = arith.constant 0 : index
      %300 = vector.load %arg16[%c0_194, %c0_195] : memref<8x128xf32, #tpu.memory_space<vmem>>, vector<8x128xf32>
      %c0_196 = arith.constant 0 : index
      %c0_197 = arith.constant 0 : index
      %301 = vector.load %arg12[%c0_196, %c0_197] : memref<8x128xf32, #tpu.memory_space<vmem>>, vector<8x128xf32>
      tpu.vector_store %arg12[%c0_196, %c0_197], %300 {strides = array<i32>} : memref<8x128xf32, #tpu.memory_space<vmem>>, vector<8x128xf32>,
    } else {
    }
    return
  }
  func.func @transform_0(%arg0: i32, %arg1: i32) -> (i32, i32, i32) {
    %c0_i32 = arith.constant 0 : i32
    %c0_i32_0 = arith.constant 0 : i32
    return %arg1, %arg0, %c0_i32 : i32, i32, i32
  }
  func.func @transform_1(%arg0: i32, %arg1: i32) -> (i32, i32) {
    %c0_i32 = arith.constant 0 : i32
    %c0_i32_0 = arith.constant 0 : i32
    %c0_i32_1 = arith.constant 0 : i32
    return %c0_i32, %c0_i32_0 : i32, i32
  }
  func.func @transform_2(%arg0: i32, %arg1: i32) -> (i32, i32) {
    %c0_i32 = arith.constant 0 : i32
    %c0_i32_0 = arith.constant 0 : i32
    %c0_i32_1 = arith.constant 0 : i32
    return %c0_i32, %c0_i32_0 : i32, i32
  }
  func.func @transform_3(%arg0: i32, %arg1: i32) -> (i32, i32) {
    %c0_i32 = arith.constant 0 : i32
    %c0_i32_0 = arith.constant 0 : i32
    %c0_i32_1 = arith.constant 0 : i32
    return %c0_i32, %c0_i32_0 : i32, i32
  }
  func.func @transform_4(%arg0: i32, %arg1: i32) -> (i32, i32) {
    %c0_i32 = arith.constant 0 : i32
    %c0_i32_0 = arith.constant 0 : i32
    return %arg0, %c0_i32 : i32, i32
  }
  func.func @transform_5(%arg0: i32, %arg1: i32) -> (i32, i32) {
    %c0_i32 = arith.constant 0 : i32
    %c0_i32_0 = arith.constant 0 : i32
    return %arg0, %c0_i32 : i32, i32
  }
  func.func @transform_6(%arg0: i32, %arg1: i32) -> (i32, i32) {
    %c0_i32 = arith.constant 0 : i32
    %c0_i32_0 = arith.constant 0 : i32
    return %arg0, %c0_i32 : i32, i32
  }
  func.func @transform_7(%arg0: i32, %arg1: i32) -> (i32, i32, i32) {
    %c0_i32 = arith.constant 0 : i32
    %c0_i32_0 = arith.constant 0 : i32
    return %arg1, %arg0, %c0_i32 : i32, i32, i32
  }
  func.func @transform_8(%arg0: i32, %arg1: i32) -> (i32, i32) {
    %c0_i32 = arith.constant 0 : i32
    %c0_i32_0 = arith.constant 0 : i32
    return %arg0, %c0_i32 : i32, i32
  }
  func.func @transform_9(%arg0: i32, %arg1: i32) -> (i32, i32) {
    %c0_i32 = arith.constant 0 : i32
    %c0_i32_0 = arith.constant 0 : i32
    return %arg0, %c0_i32 : i32, i32
  }
  func.func @transform_10(%arg0: i32, %arg1: i32) -> (i32, i32) {
    %c0_i32 = arith.constant 0 : i32
    %c0_i32_0 = arith.constant 0 : i32
    return %arg0, %c0_i32 : i32, i32
  }
}

module attributes {stable_mosaic.version = 11 : i64} {
  func.func @_efadlif_chunk_kernel(%arg0: i32, %arg1: i32, %arg2: memref<8x8x32xbf16, #tpu.memory_space<vmem>>, %arg3: memref<32x128xbf16, #tpu.memory_space<vmem>>, %arg4: memref<128x128xbf16, #tpu.memory_space<vmem>>, %arg5: memref<8x128xf32, #tpu.memory_space<vmem>>, %arg6: memref<8x128xf32, #tpu.memory_space<vmem>>, %arg7: memref<8x128xf32, #tpu.memory_space<vmem>>, %arg8: memref<8x128xf32, #tpu.memory_space<vmem>>, %arg9: memref<8x8x128xbf16, #tpu.memory_space<vmem>>, %arg10: memref<8x128xf32, #tpu.memory_space<vmem>>, %arg11: memref<8x128xf32, #tpu.memory_space<vmem>>, %arg12: memref<8x128xf32, #tpu.memory_space<vmem>>, %arg13: memref<8x8x128xf32, #tpu.memory_space<vmem>>, %arg14: memref<8x128xf32, #tpu.memory_space<vmem>>, %arg15: memref<8x128xbf16, #tpu.memory_space<vmem>>, %arg16: memref<8x128xf32, #tpu.memory_space<vmem>>) attributes {dimension_semantics = [#tpu.dimension_semantics<parallel>, #tpu.dimension_semantics<arbitrary>], iteration_bounds = array<i64: 1, 1>, scalar_prefetch = 0 : i64, scratch_operands = 4 : i64, tpu.core_type = #tpu.core_type<tc>, window_params = [{transform_indices = @transform_0, window_bounds = array<i64: 8, 8, 32>}, {pipeline_mode = #tpu.pipeline_mode<synchronous>, transform_indices = @transform_1, window_bounds = array<i64: 32, 128>}, {pipeline_mode = #tpu.pipeline_mode<synchronous>, transform_indices = @transform_2, window_bounds = array<i64: 128, 128>}, {pipeline_mode = #tpu.pipeline_mode<synchronous>, transform_indices = @transform_3, window_bounds = array<i64: 8, 128>}, {transform_indices = @transform_4, window_bounds = array<i64: 8, 128>}, {transform_indices = @transform_5, window_bounds = array<i64: 8, 128>}, {transform_indices = @transform_6, window_bounds = array<i64: 8, 128>}, {transform_indices = @transform_7, window_bounds = array<i64: 8, 8, 128>}, {transform_indices = @transform_8, window_bounds = array<i64: 8, 128>}, {transform_indices = @transform_9, window_bounds = array<i64: 8, 128>}, {transform_indices = @transform_10, window_bounds = array<i64: 8, 128>}]} {
    %c0_i32 = arith.constant 0 : i32
    %0 = arith.cmpi eq, %arg1, %c0_i32 : i32
    %1 = arith.extui %0 : i1 to i32
    %c0_i32_0 = arith.constant 0 : i32
    %2 = arith.cmpi ne, %1, %c0_i32_0 : i32
    scf.if %2 {
      %c0_186 = arith.constant 0 : index
      %c0_187 = arith.constant 0 : index
      %295 = vector.load %arg6[%c0_186, %c0_187] : memref<8x128xf32, #tpu.memory_space<vmem>>, vector<8x128xf32>
      %c0_188 = arith.constant 0 : index
      %c0_189 = arith.constant 0 : index
      %296 = vector.load %arg14[%c0_188, %c0_189] : memref<8x128xf32, #tpu.memory_space<vmem>>, vector<8x128xf32>
      tpu.vector_store %arg14[%c0_188, %c0_189], %295 {strides = array<i32>} : memref<8x128xf32, #tpu.memory_space<vmem>>, vector<8x128xf32>,
      %c0_190 = arith.constant 0 : index
      %c0_191 = arith.constant 0 : index
      %297 = vector.load %arg7[%c0_190, %c0_191] : memref<8x128xf32, #tpu.memory_space<vmem>>, vector<8x128xf32>
      %298 = arith.truncf %297 : vector<8x128xf32> to vector<8x128xbf16>
      %c0_192 = arith.constant 0 : index
      %c0_193 = arith.constant 0 : index
      %299 = vector.load %arg15[%c0_192, %c0_193] : memref<8x128xbf16, #tpu.memory_space<vmem>>, vector<8x128xbf16>
      tpu.vector_store %arg15[%c0_192, %c0_193], %298 {strides = array<i32>} : memref<8x128xbf16, #tpu.memory_space<vmem>>, vector<8x128xbf16>,
      %c0_194 = arith.constant 0 : index
      %c0_195 = arith.constant 0 : index
      %300 = vector.load %arg8[%c0_194, %c0_195] : memref<8x128xf32, #tpu.memory_space<vmem>>, vector<8x128xf32>
      %c0_196 = arith.constant 0 : index
      %c0_197 = arith.constant 0 : index
      %301 = vector.load %arg16[%c0_196, %c0_197] : memref<8x128xf32, #tpu.memory_space<vmem>>, vector<8x128xf32>
      tpu.vector_store %arg16[%c0_196, %c0_197], %300 {strides = array<i32>} : memref<8x128xf32, #tpu.memory_space<vmem>>, vector<8x128xf32>,
    } else {
    }
    %c0 = arith.constant 0 : index
    %c0_1 = arith.constant 0 : index
    %3 = vector.load %arg5[%c0, %c0_1] : memref<8x128xf32, #tpu.memory_space<vmem>>, vector<1x128xf32>
    %c1 = arith.constant 1 : index
    %c0_2 = arith.constant 0 : index
    %4 = vector.load %arg5[%c1, %c0_2] : memref<8x128xf32, #tpu.memory_space<vmem>>, vector<1x128xf32>
    %5 = vector.shape_cast %4 : vector<1x128xf32> to vector<1x128xf32>
    %6 = vector.broadcast %5 : vector<1x128xf32> to vector<8x128xf32>
    %c2 = arith.constant 2 : index
    %c0_3 = arith.constant 0 : index
    %7 = vector.load %arg5[%c2, %c0_3] : memref<8x128xf32, #tpu.memory_space<vmem>>, vector<1x128xf32>
    %8 = vector.shape_cast %7 : vector<1x128xf32> to vector<1x128xf32>
    %9 = vector.broadcast %8 : vector<1x128xf32> to vector<8x128xf32>
    %c3 = arith.constant 3 : index
    %c0_4 = arith.constant 0 : index
    %10 = vector.load %arg5[%c3, %c0_4] : memref<8x128xf32, #tpu.memory_space<vmem>>, vector<1x128xf32>
    %11 = vector.shape_cast %10 : vector<1x128xf32> to vector<1x128xf32>
    %12 = vector.broadcast %11 : vector<1x128xf32> to vector<8x128xf32>
    %c4 = arith.constant 4 : index
    %c0_5 = arith.constant 0 : index
    %13 = vector.load %arg5[%c4, %c0_5] : memref<8x128xf32, #tpu.memory_space<vmem>>, vector<1x128xf32>
    %14 = vector.shape_cast %13 : vector<1x128xf32> to vector<1x128xf32>
    %15 = vector.broadcast %14 : vector<1x128xf32> to vector<8x128xf32>
    %c5 = arith.constant 5 : index
    %c0_6 = arith.constant 0 : index
    %16 = vector.load %arg5[%c5, %c0_6] : memref<8x128xf32, #tpu.memory_space<vmem>>, vector<1x128xf32>
    %17 = vector.shape_cast %16 : vector<1x128xf32> to vector<1x128xf32>
    %18 = vector.broadcast %17 : vector<1x128xf32> to vector<8x128xf32>
    %c0_7 = arith.constant 0 : index
    %c0_8 = arith.constant 0 : index
    %c0_9 = arith.constant 0 : index
    %19 = vector.load %arg2[%c0_7, %c0_8, %c0_9] : memref<8x8x32xbf16, #tpu.memory_space<vmem>>, vector<8x8x32xbf16>
    %20 = vector.shape_cast %19 : vector<8x8x32xbf16> to vector<64x32xbf16>
    %c0_10 = arith.constant 0 : index
    %c0_11 = arith.constant 0 : index
    %21 = vector.load %arg3[%c0_10, %c0_11] : memref<32x128xbf16, #tpu.memory_space<vmem>>, vector<32x128xbf16>
    %cst = arith.constant dense<0.000000e+00> : vector<64x128xf32>
    %22 = tpu.matmul %20, %21, %cst {dimension_numbers = #tpu.dot_dimension_numbers<[1], [0], [0], [1], [0, 0, 1, 1], [], []>} : vector<64x32xbf16>, vector<32x128xbf16>, vector<64x128xf32> -> vector<64x128xf32>
    %23 = vector.shape_cast %22 : vector<64x128xf32> to vector<8x8x128xf32>
    %24 = vector.shape_cast %3 : vector<1x128xf32> to vector<1x1x128xf32>
    %25 = vector.broadcast %24 : vector<1x1x128xf32> to vector<8x8x128xf32>
    %26 = arith.addf %23, %25 : vector<8x8x128xf32>
    %c0_12 = arith.constant 0 : index
    %c0_13 = arith.constant 0 : index
    %c0_14 = arith.constant 0 : index
    %27 = vector.load %arg13[%c0_12, %c0_13, %c0_14] : memref<8x8x128xf32, #tpu.memory_space<vmem>>, vector<8x8x128xf32>
    tpu.vector_store %arg13[%c0_12, %c0_13, %c0_14], %26 {strides = array<i32>} : memref<8x8x128xf32, #tpu.memory_space<vmem>>, vector<8x8x128xf32>,
    %c0_i32_15 = arith.constant 0 : i32
    %c0_16 = arith.constant 0 : index
    %c0_17 = arith.constant 0 : index
    %28 = vector.load %arg14[%c0_16, %c0_17] : memref<8x128xf32, #tpu.memory_space<vmem>>, vector<8x128xf32>
    %c0_18 = arith.constant 0 : index
    %c0_19 = arith.constant 0 : index
    %29 = vector.load %arg15[%c0_18, %c0_19] : memref<8x128xbf16, #tpu.memory_space<vmem>>, vector<8x128xbf16>
    %c0_20 = arith.constant 0 : index
    %c0_21 = arith.constant 0 : index
    %30 = vector.load %arg16[%c0_20, %c0_21] : memref<8x128xf32, #tpu.memory_space<vmem>>, vector<8x128xf32>
    %31 = arith.index_cast %c0_i32_15 : i32 to index
    %c0_22 = arith.constant 0 : index
    %c0_23 = arith.constant 0 : index
    %32 = vector.load %arg13[%31, %c0_22, %c0_23] : memref<8x8x128xf32, #tpu.memory_space<vmem>>, vector<1x8x128xf32>
    %33 = vector.shape_cast %32 : vector<1x8x128xf32> to vector<8x128xf32>
    %c0_24 = arith.constant 0 : index
    %c0_25 = arith.constant 0 : index
    %34 = vector.load %arg4[%c0_24, %c0_25] : memref<128x128xbf16, #tpu.memory_space<vmem>>, vector<128x128xbf16>
    %cst_26 = arith.constant dense<0.000000e+00> : vector<8x128xf32>
    %35 = tpu.matmul %29, %34, %cst_26 {dimension_numbers = #tpu.dot_dimension_numbers<[1], [0], [0], [1], [0, 0, 1, 1], [], []>} : vector<8x128xbf16>, vector<128x128xbf16>, vector<8x128xf32> -> vector<8x128xf32>
    %36 = arith.addf %33, %35 : vector<8x128xf32>
    %37 = arith.mulf %6, %28 : vector<8x128xf32>
    %38 = arith.subf %36, %30 : vector<8x128xf32>
    %39 = arith.mulf %9, %38 : vector<8x128xf32>
    %40 = arith.addf %37, %39 : vector<8x128xf32>
    %cst_27 = arith.constant 1.000000e+00 : f32
    %41 = vector.broadcast %cst_27 : f32 to vector<8x128xf32>
    %42 = arith.cmpf ogt, %40, %41 : vector<8x128xf32>
    %43 = arith.extui %42 : vector<8x128xi1> to vector<8x128xi32>
    %44 = arith.sitofp %43 : vector<8x128xi32> to vector<8x128xf32>
    %45 = arith.truncf %44 : vector<8x128xf32> to vector<8x128xbf16>
    %cst_28 = arith.constant 0.000000e+00 : f32
    %46 = vector.broadcast %cst_28 : f32 to vector<8x128xf32>
    %47 = arith.select %42, %46, %40 : vector<8x128xi1>, vector<8x128xf32>
    %48 = arith.mulf %12, %30 : vector<8x128xf32>
    %49 = arith.mulf %15, %28 : vector<8x128xf32>
    %50 = arith.addf %48, %49 : vector<8x128xf32>
    %51 = arith.extf %29 : vector<8x128xbf16> to vector<8x128xf32>
    %52 = arith.mulf %18, %51 : vector<8x128xf32>
    %53 = arith.addf %50, %52 : vector<8x128xf32>
    %c0_29 = arith.constant 0 : index
    %c0_30 = arith.constant 0 : index
    %54 = vector.load %arg14[%c0_29, %c0_30] : memref<8x128xf32, #tpu.memory_space<vmem>>, vector<8x128xf32>
    tpu.vector_store %arg14[%c0_29, %c0_30], %47 {strides = array<i32>} : memref<8x128xf32, #tpu.memory_space<vmem>>, vector<8x128xf32>,
    %c0_31 = arith.constant 0 : index
    %c0_32 = arith.constant 0 : index
    %55 = vector.load %arg15[%c0_31, %c0_32] : memref<8x128xbf16, #tpu.memory_space<vmem>>, vector<8x128xbf16>
    tpu.vector_store %arg15[%c0_31, %c0_32], %45 {strides = array<i32>} : memref<8x128xbf16, #tpu.memory_space<vmem>>, vector<8x128xbf16>,
    %c0_33 = arith.constant 0 : index
    %c0_34 = arith.constant 0 : index
    %56 = vector.load %arg16[%c0_33, %c0_34] : memref<8x128xf32, #tpu.memory_space<vmem>>, vector<8x128xf32>
    tpu.vector_store %arg16[%c0_33, %c0_34], %53 {strides = array<i32>} : memref<8x128xf32, #tpu.memory_space<vmem>>, vector<8x128xf32>,
    %57 = arith.index_cast %c0_i32_15 : i32 to index
    %c0_35 = arith.constant 0 : index
    %c0_36 = arith.constant 0 : index
    %58 = vector.load %arg9[%57, %c0_35, %c0_36] : memref<8x8x128xbf16, #tpu.memory_space<vmem>>, vector<1x8x128xbf16>
    %59 = vector.shape_cast %58 : vector<1x8x128xbf16> to vector<8x128xbf16>
    %60 = vector.shape_cast %45 : vector<8x128xbf16> to vector<1x8x128xbf16>
    tpu.vector_store %arg9[%57, %c0_35, %c0_36], %60 {strides = array<i32>} : memref<8x8x128xbf16, #tpu.memory_space<vmem>>, vector<1x8x128xbf16>,
    %c1_i32 = arith.constant 1 : i32
    %c0_37 = arith.constant 0 : index
    %c0_38 = arith.constant 0 : index
    %61 = vector.load %arg14[%c0_37, %c0_38] : memref<8x128xf32, #tpu.memory_space<vmem>>, vector<8x128xf32>
    %c0_39 = arith.constant 0 : index
    %c0_40 = arith.constant 0 : index
    %62 = vector.load %arg15[%c0_39, %c0_40] : memref<8x128xbf16, #tpu.memory_space<vmem>>, vector<8x128xbf16>
    %c0_41 = arith.constant 0 : index
    %c0_42 = arith.constant 0 : index
    %63 = vector.load %arg16[%c0_41, %c0_42] : memref<8x128xf32, #tpu.memory_space<vmem>>, vector<8x128xf32>
    %64 = arith.index_cast %c1_i32 : i32 to index
    %c0_43 = arith.constant 0 : index
    %c0_44 = arith.constant 0 : index
    %65 = vector.load %arg13[%64, %c0_43, %c0_44] : memref<8x8x128xf32, #tpu.memory_space<vmem>>, vector<1x8x128xf32>
    %66 = vector.shape_cast %65 : vector<1x8x128xf32> to vector<8x128xf32>
    %c0_45 = arith.constant 0 : index
    %c0_46 = arith.constant 0 : index
    %67 = vector.load %arg4[%c0_45, %c0_46] : memref<128x128xbf16, #tpu.memory_space<vmem>>, vector<128x128xbf16>
    %cst_47 = arith.constant dense<0.000000e+00> : vector<8x128xf32>
    %68 = tpu.matmul %62, %67, %cst_47 {dimension_numbers = #tpu.dot_dimension_numbers<[1], [0], [0], [1], [0, 0, 1, 1], [], []>} : vector<8x128xbf16>, vector<128x128xbf16>, vector<8x128xf32> -> vector<8x128xf32>
    %69 = arith.addf %66, %68 : vector<8x128xf32>
    %70 = arith.mulf %6, %61 : vector<8x128xf32>
    %71 = arith.subf %69, %63 : vector<8x128xf32>
    %72 = arith.mulf %9, %71 : vector<8x128xf32>
    %73 = arith.addf %70, %72 : vector<8x128xf32>
    %cst_48 = arith.constant 1.000000e+00 : f32
    %74 = vector.broadcast %cst_48 : f32 to vector<8x128xf32>
    %75 = arith.cmpf ogt, %73, %74 : vector<8x128xf32>
    %76 = arith.extui %75 : vector<8x128xi1> to vector<8x128xi32>
    %77 = arith.sitofp %76 : vector<8x128xi32> to vector<8x128xf32>
    %78 = arith.truncf %77 : vector<8x128xf32> to vector<8x128xbf16>
    %cst_49 = arith.constant 0.000000e+00 : f32
    %79 = vector.broadcast %cst_49 : f32 to vector<8x128xf32>
    %80 = arith.select %75, %79, %73 : vector<8x128xi1>, vector<8x128xf32>
    %81 = arith.mulf %12, %63 : vector<8x128xf32>
    %82 = arith.mulf %15, %61 : vector<8x128xf32>
    %83 = arith.addf %81, %82 : vector<8x128xf32>
    %84 = arith.extf %62 : vector<8x128xbf16> to vector<8x128xf32>
    %85 = arith.mulf %18, %84 : vector<8x128xf32>
    %86 = arith.addf %83, %85 : vector<8x128xf32>
    %c0_50 = arith.constant 0 : index
    %c0_51 = arith.constant 0 : index
    %87 = vector.load %arg14[%c0_50, %c0_51] : memref<8x128xf32, #tpu.memory_space<vmem>>, vector<8x128xf32>
    tpu.vector_store %arg14[%c0_50, %c0_51], %80 {strides = array<i32>} : memref<8x128xf32, #tpu.memory_space<vmem>>, vector<8x128xf32>,
    %c0_52 = arith.constant 0 : index
    %c0_53 = arith.constant 0 : index
    %88 = vector.load %arg15[%c0_52, %c0_53] : memref<8x128xbf16, #tpu.memory_space<vmem>>, vector<8x128xbf16>
    tpu.vector_store %arg15[%c0_52, %c0_53], %78 {strides = array<i32>} : memref<8x128xbf16, #tpu.memory_space<vmem>>, vector<8x128xbf16>,
    %c0_54 = arith.constant 0 : index
    %c0_55 = arith.constant 0 : index
    %89 = vector.load %arg16[%c0_54, %c0_55] : memref<8x128xf32, #tpu.memory_space<vmem>>, vector<8x128xf32>
    tpu.vector_store %arg16[%c0_54, %c0_55], %86 {strides = array<i32>} : memref<8x128xf32, #tpu.memory_space<vmem>>, vector<8x128xf32>,
    %90 = arith.index_cast %c1_i32 : i32 to index
    %c0_56 = arith.constant 0 : index
    %c0_57 = arith.constant 0 : index
    %91 = vector.load %arg9[%90, %c0_56, %c0_57] : memref<8x8x128xbf16, #tpu.memory_space<vmem>>, vector<1x8x128xbf16>
    %92 = vector.shape_cast %91 : vector<1x8x128xbf16> to vector<8x128xbf16>
    %93 = vector.shape_cast %78 : vector<8x128xbf16> to vector<1x8x128xbf16>
    tpu.vector_store %arg9[%90, %c0_56, %c0_57], %93 {strides = array<i32>} : memref<8x8x128xbf16, #tpu.memory_space<vmem>>, vector<1x8x128xbf16>,
    %c2_i32 = arith.constant 2 : i32
    %c0_58 = arith.constant 0 : index
    %c0_59 = arith.constant 0 : index
    %94 = vector.load %arg14[%c0_58, %c0_59] : memref<8x128xf32, #tpu.memory_space<vmem>>, vector<8x128xf32>
    %c0_60 = arith.constant 0 : index
    %c0_61 = arith.constant 0 : index
    %95 = vector.load %arg15[%c0_60, %c0_61] : memref<8x128xbf16, #tpu.memory_space<vmem>>, vector<8x128xbf16>
    %c0_62 = arith.constant 0 : index
    %c0_63 = arith.constant 0 : index
    %96 = vector.load %arg16[%c0_62, %c0_63] : memref<8x128xf32, #tpu.memory_space<vmem>>, vector<8x128xf32>
    %97 = arith.index_cast %c2_i32 : i32 to index
    %c0_64 = arith.constant 0 : index
    %c0_65 = arith.constant 0 : index
    %98 = vector.load %arg13[%97, %c0_64, %c0_65] : memref<8x8x128xf32, #tpu.memory_space<vmem>>, vector<1x8x128xf32>
    %99 = vector.shape_cast %98 : vector<1x8x128xf32> to vector<8x128xf32>
    %c0_66 = arith.constant 0 : index
    %c0_67 = arith.constant 0 : index
    %100 = vector.load %arg4[%c0_66, %c0_67] : memref<128x128xbf16, #tpu.memory_space<vmem>>, vector<128x128xbf16>
    %cst_68 = arith.constant dense<0.000000e+00> : vector<8x128xf32>
    %101 = tpu.matmul %95, %100, %cst_68 {dimension_numbers = #tpu.dot_dimension_numbers<[1], [0], [0], [1], [0, 0, 1, 1], [], []>} : vector<8x128xbf16>, vector<128x128xbf16>, vector<8x128xf32> -> vector<8x128xf32>
    %102 = arith.addf %99, %101 : vector<8x128xf32>
    %103 = arith.mulf %6, %94 : vector<8x128xf32>
    %104 = arith.subf %102, %96 : vector<8x128xf32>
    %105 = arith.mulf %9, %104 : vector<8x128xf32>
    %106 = arith.addf %103, %105 : vector<8x128xf32>
    %cst_69 = arith.constant 1.000000e+00 : f32
    %107 = vector.broadcast %cst_69 : f32 to vector<8x128xf32>
    %108 = arith.cmpf ogt, %106, %107 : vector<8x128xf32>
    %109 = arith.extui %108 : vector<8x128xi1> to vector<8x128xi32>
    %110 = arith.sitofp %109 : vector<8x128xi32> to vector<8x128xf32>
    %111 = arith.truncf %110 : vector<8x128xf32> to vector<8x128xbf16>
    %cst_70 = arith.constant 0.000000e+00 : f32
    %112 = vector.broadcast %cst_70 : f32 to vector<8x128xf32>
    %113 = arith.select %108, %112, %106 : vector<8x128xi1>, vector<8x128xf32>
    %114 = arith.mulf %12, %96 : vector<8x128xf32>
    %115 = arith.mulf %15, %94 : vector<8x128xf32>
    %116 = arith.addf %114, %115 : vector<8x128xf32>
    %117 = arith.extf %95 : vector<8x128xbf16> to vector<8x128xf32>
    %118 = arith.mulf %18, %117 : vector<8x128xf32>
    %119 = arith.addf %116, %118 : vector<8x128xf32>
    %c0_71 = arith.constant 0 : index
    %c0_72 = arith.constant 0 : index
    %120 = vector.load %arg14[%c0_71, %c0_72] : memref<8x128xf32, #tpu.memory_space<vmem>>, vector<8x128xf32>
    tpu.vector_store %arg14[%c0_71, %c0_72], %113 {strides = array<i32>} : memref<8x128xf32, #tpu.memory_space<vmem>>, vector<8x128xf32>,
    %c0_73 = arith.constant 0 : index
    %c0_74 = arith.constant 0 : index
    %121 = vector.load %arg15[%c0_73, %c0_74] : memref<8x128xbf16, #tpu.memory_space<vmem>>, vector<8x128xbf16>
    tpu.vector_store %arg15[%c0_73, %c0_74], %111 {strides = array<i32>} : memref<8x128xbf16, #tpu.memory_space<vmem>>, vector<8x128xbf16>,
    %c0_75 = arith.constant 0 : index
    %c0_76 = arith.constant 0 : index
    %122 = vector.load %arg16[%c0_75, %c0_76] : memref<8x128xf32, #tpu.memory_space<vmem>>, vector<8x128xf32>
    tpu.vector_store %arg16[%c0_75, %c0_76], %119 {strides = array<i32>} : memref<8x128xf32, #tpu.memory_space<vmem>>, vector<8x128xf32>,
    %123 = arith.index_cast %c2_i32 : i32 to index
    %c0_77 = arith.constant 0 : index
    %c0_78 = arith.constant 0 : index
    %124 = vector.load %arg9[%123, %c0_77, %c0_78] : memref<8x8x128xbf16, #tpu.memory_space<vmem>>, vector<1x8x128xbf16>
    %125 = vector.shape_cast %124 : vector<1x8x128xbf16> to vector<8x128xbf16>
    %126 = vector.shape_cast %111 : vector<8x128xbf16> to vector<1x8x128xbf16>
    tpu.vector_store %arg9[%123, %c0_77, %c0_78], %126 {strides = array<i32>} : memref<8x8x128xbf16, #tpu.memory_space<vmem>>, vector<1x8x128xbf16>,
    %c3_i32 = arith.constant 3 : i32
    %c0_79 = arith.constant 0 : index
    %c0_80 = arith.constant 0 : index
    %127 = vector.load %arg14[%c0_79, %c0_80] : memref<8x128xf32, #tpu.memory_space<vmem>>, vector<8x128xf32>
    %c0_81 = arith.constant 0 : index
    %c0_82 = arith.constant 0 : index
    %128 = vector.load %arg15[%c0_81, %c0_82] : memref<8x128xbf16, #tpu.memory_space<vmem>>, vector<8x128xbf16>
    %c0_83 = arith.constant 0 : index
    %c0_84 = arith.constant 0 : index
    %129 = vector.load %arg16[%c0_83, %c0_84] : memref<8x128xf32, #tpu.memory_space<vmem>>, vector<8x128xf32>
    %130 = arith.index_cast %c3_i32 : i32 to index
    %c0_85 = arith.constant 0 : index
    %c0_86 = arith.constant 0 : index
    %131 = vector.load %arg13[%130, %c0_85, %c0_86] : memref<8x8x128xf32, #tpu.memory_space<vmem>>, vector<1x8x128xf32>
    %132 = vector.shape_cast %131 : vector<1x8x128xf32> to vector<8x128xf32>
    %c0_87 = arith.constant 0 : index
    %c0_88 = arith.constant 0 : index
    %133 = vector.load %arg4[%c0_87, %c0_88] : memref<128x128xbf16, #tpu.memory_space<vmem>>, vector<128x128xbf16>
    %cst_89 = arith.constant dense<0.000000e+00> : vector<8x128xf32>
    %134 = tpu.matmul %128, %133, %cst_89 {dimension_numbers = #tpu.dot_dimension_numbers<[1], [0], [0], [1], [0, 0, 1, 1], [], []>} : vector<8x128xbf16>, vector<128x128xbf16>, vector<8x128xf32> -> vector<8x128xf32>
    %135 = arith.addf %132, %134 : vector<8x128xf32>
    %136 = arith.mulf %6, %127 : vector<8x128xf32>
    %137 = arith.subf %135, %129 : vector<8x128xf32>
    %138 = arith.mulf %9, %137 : vector<8x128xf32>
    %139 = arith.addf %136, %138 : vector<8x128xf32>
    %cst_90 = arith.constant 1.000000e+00 : f32
    %140 = vector.broadcast %cst_90 : f32 to vector<8x128xf32>
    %141 = arith.cmpf ogt, %139, %140 : vector<8x128xf32>
    %142 = arith.extui %141 : vector<8x128xi1> to vector<8x128xi32>
    %143 = arith.sitofp %142 : vector<8x128xi32> to vector<8x128xf32>
    %144 = arith.truncf %143 : vector<8x128xf32> to vector<8x128xbf16>
    %cst_91 = arith.constant 0.000000e+00 : f32
    %145 = vector.broadcast %cst_91 : f32 to vector<8x128xf32>
    %146 = arith.select %141, %145, %139 : vector<8x128xi1>, vector<8x128xf32>
    %147 = arith.mulf %12, %129 : vector<8x128xf32>
    %148 = arith.mulf %15, %127 : vector<8x128xf32>
    %149 = arith.addf %147, %148 : vector<8x128xf32>
    %150 = arith.extf %128 : vector<8x128xbf16> to vector<8x128xf32>
    %151 = arith.mulf %18, %150 : vector<8x128xf32>
    %152 = arith.addf %149, %151 : vector<8x128xf32>
    %c0_92 = arith.constant 0 : index
    %c0_93 = arith.constant 0 : index
    %153 = vector.load %arg14[%c0_92, %c0_93] : memref<8x128xf32, #tpu.memory_space<vmem>>, vector<8x128xf32>
    tpu.vector_store %arg14[%c0_92, %c0_93], %146 {strides = array<i32>} : memref<8x128xf32, #tpu.memory_space<vmem>>, vector<8x128xf32>,
    %c0_94 = arith.constant 0 : index
    %c0_95 = arith.constant 0 : index
    %154 = vector.load %arg15[%c0_94, %c0_95] : memref<8x128xbf16, #tpu.memory_space<vmem>>, vector<8x128xbf16>
    tpu.vector_store %arg15[%c0_94, %c0_95], %144 {strides = array<i32>} : memref<8x128xbf16, #tpu.memory_space<vmem>>, vector<8x128xbf16>,
    %c0_96 = arith.constant 0 : index
    %c0_97 = arith.constant 0 : index
    %155 = vector.load %arg16[%c0_96, %c0_97] : memref<8x128xf32, #tpu.memory_space<vmem>>, vector<8x128xf32>
    tpu.vector_store %arg16[%c0_96, %c0_97], %152 {strides = array<i32>} : memref<8x128xf32, #tpu.memory_space<vmem>>, vector<8x128xf32>,
    %156 = arith.index_cast %c3_i32 : i32 to index
    %c0_98 = arith.constant 0 : index
    %c0_99 = arith.constant 0 : index
    %157 = vector.load %arg9[%156, %c0_98, %c0_99] : memref<8x8x128xbf16, #tpu.memory_space<vmem>>, vector<1x8x128xbf16>
    %158 = vector.shape_cast %157 : vector<1x8x128xbf16> to vector<8x128xbf16>
    %159 = vector.shape_cast %144 : vector<8x128xbf16> to vector<1x8x128xbf16>
    tpu.vector_store %arg9[%156, %c0_98, %c0_99], %159 {strides = array<i32>} : memref<8x8x128xbf16, #tpu.memory_space<vmem>>, vector<1x8x128xbf16>,
    %c4_i32 = arith.constant 4 : i32
    %c0_100 = arith.constant 0 : index
    %c0_101 = arith.constant 0 : index
    %160 = vector.load %arg14[%c0_100, %c0_101] : memref<8x128xf32, #tpu.memory_space<vmem>>, vector<8x128xf32>
    %c0_102 = arith.constant 0 : index
    %c0_103 = arith.constant 0 : index
    %161 = vector.load %arg15[%c0_102, %c0_103] : memref<8x128xbf16, #tpu.memory_space<vmem>>, vector<8x128xbf16>
    %c0_104 = arith.constant 0 : index
    %c0_105 = arith.constant 0 : index
    %162 = vector.load %arg16[%c0_104, %c0_105] : memref<8x128xf32, #tpu.memory_space<vmem>>, vector<8x128xf32>
    %163 = arith.index_cast %c4_i32 : i32 to index
    %c0_106 = arith.constant 0 : index
    %c0_107 = arith.constant 0 : index
    %164 = vector.load %arg13[%163, %c0_106, %c0_107] : memref<8x8x128xf32, #tpu.memory_space<vmem>>, vector<1x8x128xf32>
    %165 = vector.shape_cast %164 : vector<1x8x128xf32> to vector<8x128xf32>
    %c0_108 = arith.constant 0 : index
    %c0_109 = arith.constant 0 : index
    %166 = vector.load %arg4[%c0_108, %c0_109] : memref<128x128xbf16, #tpu.memory_space<vmem>>, vector<128x128xbf16>
    %cst_110 = arith.constant dense<0.000000e+00> : vector<8x128xf32>
    %167 = tpu.matmul %161, %166, %cst_110 {dimension_numbers = #tpu.dot_dimension_numbers<[1], [0], [0], [1], [0, 0, 1, 1], [], []>} : vector<8x128xbf16>, vector<128x128xbf16>, vector<8x128xf32> -> vector<8x128xf32>
    %168 = arith.addf %165, %167 : vector<8x128xf32>
    %169 = arith.mulf %6, %160 : vector<8x128xf32>
    %170 = arith.subf %168, %162 : vector<8x128xf32>
    %171 = arith.mulf %9, %170 : vector<8x128xf32>
    %172 = arith.addf %169, %171 : vector<8x128xf32>
    %cst_111 = arith.constant 1.000000e+00 : f32
    %173 = vector.broadcast %cst_111 : f32 to vector<8x128xf32>
    %174 = arith.cmpf ogt, %172, %173 : vector<8x128xf32>
    %175 = arith.extui %174 : vector<8x128xi1> to vector<8x128xi32>
    %176 = arith.sitofp %175 : vector<8x128xi32> to vector<8x128xf32>
    %177 = arith.truncf %176 : vector<8x128xf32> to vector<8x128xbf16>
    %cst_112 = arith.constant 0.000000e+00 : f32
    %178 = vector.broadcast %cst_112 : f32 to vector<8x128xf32>
    %179 = arith.select %174, %178, %172 : vector<8x128xi1>, vector<8x128xf32>
    %180 = arith.mulf %12, %162 : vector<8x128xf32>
    %181 = arith.mulf %15, %160 : vector<8x128xf32>
    %182 = arith.addf %180, %181 : vector<8x128xf32>
    %183 = arith.extf %161 : vector<8x128xbf16> to vector<8x128xf32>
    %184 = arith.mulf %18, %183 : vector<8x128xf32>
    %185 = arith.addf %182, %184 : vector<8x128xf32>
    %c0_113 = arith.constant 0 : index
    %c0_114 = arith.constant 0 : index
    %186 = vector.load %arg14[%c0_113, %c0_114] : memref<8x128xf32, #tpu.memory_space<vmem>>, vector<8x128xf32>
    tpu.vector_store %arg14[%c0_113, %c0_114], %179 {strides = array<i32>} : memref<8x128xf32, #tpu.memory_space<vmem>>, vector<8x128xf32>,
    %c0_115 = arith.constant 0 : index
    %c0_116 = arith.constant 0 : index
    %187 = vector.load %arg15[%c0_115, %c0_116] : memref<8x128xbf16, #tpu.memory_space<vmem>>, vector<8x128xbf16>
    tpu.vector_store %arg15[%c0_115, %c0_116], %177 {strides = array<i32>} : memref<8x128xbf16, #tpu.memory_space<vmem>>, vector<8x128xbf16>,
    %c0_117 = arith.constant 0 : index
    %c0_118 = arith.constant 0 : index
    %188 = vector.load %arg16[%c0_117, %c0_118] : memref<8x128xf32, #tpu.memory_space<vmem>>, vector<8x128xf32>
    tpu.vector_store %arg16[%c0_117, %c0_118], %185 {strides = array<i32>} : memref<8x128xf32, #tpu.memory_space<vmem>>, vector<8x128xf32>,
    %189 = arith.index_cast %c4_i32 : i32 to index
    %c0_119 = arith.constant 0 : index
    %c0_120 = arith.constant 0 : index
    %190 = vector.load %arg9[%189, %c0_119, %c0_120] : memref<8x8x128xbf16, #tpu.memory_space<vmem>>, vector<1x8x128xbf16>
    %191 = vector.shape_cast %190 : vector<1x8x128xbf16> to vector<8x128xbf16>
    %192 = vector.shape_cast %177 : vector<8x128xbf16> to vector<1x8x128xbf16>
    tpu.vector_store %arg9[%189, %c0_119, %c0_120], %192 {strides = array<i32>} : memref<8x8x128xbf16, #tpu.memory_space<vmem>>, vector<1x8x128xbf16>,
    %c5_i32 = arith.constant 5 : i32
    %c0_121 = arith.constant 0 : index
    %c0_122 = arith.constant 0 : index
    %193 = vector.load %arg14[%c0_121, %c0_122] : memref<8x128xf32, #tpu.memory_space<vmem>>, vector<8x128xf32>
    %c0_123 = arith.constant 0 : index
    %c0_124 = arith.constant 0 : index
    %194 = vector.load %arg15[%c0_123, %c0_124] : memref<8x128xbf16, #tpu.memory_space<vmem>>, vector<8x128xbf16>
    %c0_125 = arith.constant 0 : index
    %c0_126 = arith.constant 0 : index
    %195 = vector.load %arg16[%c0_125, %c0_126] : memref<8x128xf32, #tpu.memory_space<vmem>>, vector<8x128xf32>
    %196 = arith.index_cast %c5_i32 : i32 to index
    %c0_127 = arith.constant 0 : index
    %c0_128 = arith.constant 0 : index
    %197 = vector.load %arg13[%196, %c0_127, %c0_128] : memref<8x8x128xf32, #tpu.memory_space<vmem>>, vector<1x8x128xf32>
    %198 = vector.shape_cast %197 : vector<1x8x128xf32> to vector<8x128xf32>
    %c0_129 = arith.constant 0 : index
    %c0_130 = arith.constant 0 : index
    %199 = vector.load %arg4[%c0_129, %c0_130] : memref<128x128xbf16, #tpu.memory_space<vmem>>, vector<128x128xbf16>
    %cst_131 = arith.constant dense<0.000000e+00> : vector<8x128xf32>
    %200 = tpu.matmul %194, %199, %cst_131 {dimension_numbers = #tpu.dot_dimension_numbers<[1], [0], [0], [1], [0, 0, 1, 1], [], []>} : vector<8x128xbf16>, vector<128x128xbf16>, vector<8x128xf32> -> vector<8x128xf32>
    %201 = arith.addf %198, %200 : vector<8x128xf32>
    %202 = arith.mulf %6, %193 : vector<8x128xf32>
    %203 = arith.subf %201, %195 : vector<8x128xf32>
    %204 = arith.mulf %9, %203 : vector<8x128xf32>
    %205 = arith.addf %202, %204 : vector<8x128xf32>
    %cst_132 = arith.constant 1.000000e+00 : f32
    %206 = vector.broadcast %cst_132 : f32 to vector<8x128xf32>
    %207 = arith.cmpf ogt, %205, %206 : vector<8x128xf32>
    %208 = arith.extui %207 : vector<8x128xi1> to vector<8x128xi32>
    %209 = arith.sitofp %208 : vector<8x128xi32> to vector<8x128xf32>
    %210 = arith.truncf %209 : vector<8x128xf32> to vector<8x128xbf16>
    %cst_133 = arith.constant 0.000000e+00 : f32
    %211 = vector.broadcast %cst_133 : f32 to vector<8x128xf32>
    %212 = arith.select %207, %211, %205 : vector<8x128xi1>, vector<8x128xf32>
    %213 = arith.mulf %12, %195 : vector<8x128xf32>
    %214 = arith.mulf %15, %193 : vector<8x128xf32>
    %215 = arith.addf %213, %214 : vector<8x128xf32>
    %216 = arith.extf %194 : vector<8x128xbf16> to vector<8x128xf32>
    %217 = arith.mulf %18, %216 : vector<8x128xf32>
    %218 = arith.addf %215, %217 : vector<8x128xf32>
    %c0_134 = arith.constant 0 : index
    %c0_135 = arith.constant 0 : index
    %219 = vector.load %arg14[%c0_134, %c0_135] : memref<8x128xf32, #tpu.memory_space<vmem>>, vector<8x128xf32>
    tpu.vector_store %arg14[%c0_134, %c0_135], %212 {strides = array<i32>} : memref<8x128xf32, #tpu.memory_space<vmem>>, vector<8x128xf32>,
    %c0_136 = arith.constant 0 : index
    %c0_137 = arith.constant 0 : index
    %220 = vector.load %arg15[%c0_136, %c0_137] : memref<8x128xbf16, #tpu.memory_space<vmem>>, vector<8x128xbf16>
    tpu.vector_store %arg15[%c0_136, %c0_137], %210 {strides = array<i32>} : memref<8x128xbf16, #tpu.memory_space<vmem>>, vector<8x128xbf16>,
    %c0_138 = arith.constant 0 : index
    %c0_139 = arith.constant 0 : index
    %221 = vector.load %arg16[%c0_138, %c0_139] : memref<8x128xf32, #tpu.memory_space<vmem>>, vector<8x128xf32>
    tpu.vector_store %arg16[%c0_138, %c0_139], %218 {strides = array<i32>} : memref<8x128xf32, #tpu.memory_space<vmem>>, vector<8x128xf32>,
    %222 = arith.index_cast %c5_i32 : i32 to index
    %c0_140 = arith.constant 0 : index
    %c0_141 = arith.constant 0 : index
    %223 = vector.load %arg9[%222, %c0_140, %c0_141] : memref<8x8x128xbf16, #tpu.memory_space<vmem>>, vector<1x8x128xbf16>
    %224 = vector.shape_cast %223 : vector<1x8x128xbf16> to vector<8x128xbf16>
    %225 = vector.shape_cast %210 : vector<8x128xbf16> to vector<1x8x128xbf16>
    tpu.vector_store %arg9[%222, %c0_140, %c0_141], %225 {strides = array<i32>} : memref<8x8x128xbf16, #tpu.memory_space<vmem>>, vector<1x8x128xbf16>,
    %c6_i32 = arith.constant 6 : i32
    %c0_142 = arith.constant 0 : index
    %c0_143 = arith.constant 0 : index
    %226 = vector.load %arg14[%c0_142, %c0_143] : memref<8x128xf32, #tpu.memory_space<vmem>>, vector<8x128xf32>
    %c0_144 = arith.constant 0 : index
    %c0_145 = arith.constant 0 : index
    %227 = vector.load %arg15[%c0_144, %c0_145] : memref<8x128xbf16, #tpu.memory_space<vmem>>, vector<8x128xbf16>
    %c0_146 = arith.constant 0 : index
    %c0_147 = arith.constant 0 : index
    %228 = vector.load %arg16[%c0_146, %c0_147] : memref<8x128xf32, #tpu.memory_space<vmem>>, vector<8x128xf32>
    %229 = arith.index_cast %c6_i32 : i32 to index
    %c0_148 = arith.constant 0 : index
    %c0_149 = arith.constant 0 : index
    %230 = vector.load %arg13[%229, %c0_148, %c0_149] : memref<8x8x128xf32, #tpu.memory_space<vmem>>, vector<1x8x128xf32>
    %231 = vector.shape_cast %230 : vector<1x8x128xf32> to vector<8x128xf32>
    %c0_150 = arith.constant 0 : index
    %c0_151 = arith.constant 0 : index
    %232 = vector.load %arg4[%c0_150, %c0_151] : memref<128x128xbf16, #tpu.memory_space<vmem>>, vector<128x128xbf16>
    %cst_152 = arith.constant dense<0.000000e+00> : vector<8x128xf32>
    %233 = tpu.matmul %227, %232, %cst_152 {dimension_numbers = #tpu.dot_dimension_numbers<[1], [0], [0], [1], [0, 0, 1, 1], [], []>} : vector<8x128xbf16>, vector<128x128xbf16>, vector<8x128xf32> -> vector<8x128xf32>
    %234 = arith.addf %231, %233 : vector<8x128xf32>
    %235 = arith.mulf %6, %226 : vector<8x128xf32>
    %236 = arith.subf %234, %228 : vector<8x128xf32>
    %237 = arith.mulf %9, %236 : vector<8x128xf32>
    %238 = arith.addf %235, %237 : vector<8x128xf32>
    %cst_153 = arith.constant 1.000000e+00 : f32
    %239 = vector.broadcast %cst_153 : f32 to vector<8x128xf32>
    %240 = arith.cmpf ogt, %238, %239 : vector<8x128xf32>
    %241 = arith.extui %240 : vector<8x128xi1> to vector<8x128xi32>
    %242 = arith.sitofp %241 : vector<8x128xi32> to vector<8x128xf32>
    %243 = arith.truncf %242 : vector<8x128xf32> to vector<8x128xbf16>
    %cst_154 = arith.constant 0.000000e+00 : f32
    %244 = vector.broadcast %cst_154 : f32 to vector<8x128xf32>
    %245 = arith.select %240, %244, %238 : vector<8x128xi1>, vector<8x128xf32>
    %246 = arith.mulf %12, %228 : vector<8x128xf32>
    %247 = arith.mulf %15, %226 : vector<8x128xf32>
    %248 = arith.addf %246, %247 : vector<8x128xf32>
    %249 = arith.extf %227 : vector<8x128xbf16> to vector<8x128xf32>
    %250 = arith.mulf %18, %249 : vector<8x128xf32>
    %251 = arith.addf %248, %250 : vector<8x128xf32>
    %c0_155 = arith.constant 0 : index
    %c0_156 = arith.constant 0 : index
    %252 = vector.load %arg14[%c0_155, %c0_156] : memref<8x128xf32, #tpu.memory_space<vmem>>, vector<8x128xf32>
    tpu.vector_store %arg14[%c0_155, %c0_156], %245 {strides = array<i32>} : memref<8x128xf32, #tpu.memory_space<vmem>>, vector<8x128xf32>,
    %c0_157 = arith.constant 0 : index
    %c0_158 = arith.constant 0 : index
    %253 = vector.load %arg15[%c0_157, %c0_158] : memref<8x128xbf16, #tpu.memory_space<vmem>>, vector<8x128xbf16>
    tpu.vector_store %arg15[%c0_157, %c0_158], %243 {strides = array<i32>} : memref<8x128xbf16, #tpu.memory_space<vmem>>, vector<8x128xbf16>,
    %c0_159 = arith.constant 0 : index
    %c0_160 = arith.constant 0 : index
    %254 = vector.load %arg16[%c0_159, %c0_160] : memref<8x128xf32, #tpu.memory_space<vmem>>, vector<8x128xf32>
    tpu.vector_store %arg16[%c0_159, %c0_160], %251 {strides = array<i32>} : memref<8x128xf32, #tpu.memory_space<vmem>>, vector<8x128xf32>,
    %255 = arith.index_cast %c6_i32 : i32 to index
    %c0_161 = arith.constant 0 : index
    %c0_162 = arith.constant 0 : index
    %256 = vector.load %arg9[%255, %c0_161, %c0_162] : memref<8x8x128xbf16, #tpu.memory_space<vmem>>, vector<1x8x128xbf16>
    %257 = vector.shape_cast %256 : vector<1x8x128xbf16> to vector<8x128xbf16>
    %258 = vector.shape_cast %243 : vector<8x128xbf16> to vector<1x8x128xbf16>
    tpu.vector_store %arg9[%255, %c0_161, %c0_162], %258 {strides = array<i32>} : memref<8x8x128xbf16, #tpu.memory_space<vmem>>, vector<1x8x128xbf16>,
    %c7_i32 = arith.constant 7 : i32
    %c0_163 = arith.constant 0 : index
    %c0_164 = arith.constant 0 : index
    %259 = vector.load %arg14[%c0_163, %c0_164] : memref<8x128xf32, #tpu.memory_space<vmem>>, vector<8x128xf32>
    %c0_165 = arith.constant 0 : index
    %c0_166 = arith.constant 0 : index
    %260 = vector.load %arg15[%c0_165, %c0_166] : memref<8x128xbf16, #tpu.memory_space<vmem>>, vector<8x128xbf16>
    %c0_167 = arith.constant 0 : index
    %c0_168 = arith.constant 0 : index
    %261 = vector.load %arg16[%c0_167, %c0_168] : memref<8x128xf32, #tpu.memory_space<vmem>>, vector<8x128xf32>
    %262 = arith.index_cast %c7_i32 : i32 to index
    %c0_169 = arith.constant 0 : index
    %c0_170 = arith.constant 0 : index
    %263 = vector.load %arg13[%262, %c0_169, %c0_170] : memref<8x8x128xf32, #tpu.memory_space<vmem>>, vector<1x8x128xf32>
    %264 = vector.shape_cast %263 : vector<1x8x128xf32> to vector<8x128xf32>
    %c0_171 = arith.constant 0 : index
    %c0_172 = arith.constant 0 : index
    %265 = vector.load %arg4[%c0_171, %c0_172] : memref<128x128xbf16, #tpu.memory_space<vmem>>, vector<128x128xbf16>
    %cst_173 = arith.constant dense<0.000000e+00> : vector<8x128xf32>
    %266 = tpu.matmul %260, %265, %cst_173 {dimension_numbers = #tpu.dot_dimension_numbers<[1], [0], [0], [1], [0, 0, 1, 1], [], []>} : vector<8x128xbf16>, vector<128x128xbf16>, vector<8x128xf32> -> vector<8x128xf32>
    %267 = arith.addf %264, %266 : vector<8x128xf32>
    %268 = arith.mulf %6, %259 : vector<8x128xf32>
    %269 = arith.subf %267, %261 : vector<8x128xf32>
    %270 = arith.mulf %9, %269 : vector<8x128xf32>
    %271 = arith.addf %268, %270 : vector<8x128xf32>
    %cst_174 = arith.constant 1.000000e+00 : f32
    %272 = vector.broadcast %cst_174 : f32 to vector<8x128xf32>
    %273 = arith.cmpf ogt, %271, %272 : vector<8x128xf32>
    %274 = arith.extui %273 : vector<8x128xi1> to vector<8x128xi32>
    %275 = arith.sitofp %274 : vector<8x128xi32> to vector<8x128xf32>
    %276 = arith.truncf %275 : vector<8x128xf32> to vector<8x128xbf16>
    %cst_175 = arith.constant 0.000000e+00 : f32
    %277 = vector.broadcast %cst_175 : f32 to vector<8x128xf32>
    %278 = arith.select %273, %277, %271 : vector<8x128xi1>, vector<8x128xf32>
    %279 = arith.mulf %12, %261 : vector<8x128xf32>
    %280 = arith.mulf %15, %259 : vector<8x128xf32>
    %281 = arith.addf %279, %280 : vector<8x128xf32>
    %282 = arith.extf %260 : vector<8x128xbf16> to vector<8x128xf32>
    %283 = arith.mulf %18, %282 : vector<8x128xf32>
    %284 = arith.addf %281, %283 : vector<8x128xf32>
    %c0_176 = arith.constant 0 : index
    %c0_177 = arith.constant 0 : index
    %285 = vector.load %arg14[%c0_176, %c0_177] : memref<8x128xf32, #tpu.memory_space<vmem>>, vector<8x128xf32>
    tpu.vector_store %arg14[%c0_176, %c0_177], %278 {strides = array<i32>} : memref<8x128xf32, #tpu.memory_space<vmem>>, vector<8x128xf32>,
    %c0_178 = arith.constant 0 : index
    %c0_179 = arith.constant 0 : index
    %286 = vector.load %arg15[%c0_178, %c0_179] : memref<8x128xbf16, #tpu.memory_space<vmem>>, vector<8x128xbf16>
    tpu.vector_store %arg15[%c0_178, %c0_179], %276 {strides = array<i32>} : memref<8x128xbf16, #tpu.memory_space<vmem>>, vector<8x128xbf16>,
    %c0_180 = arith.constant 0 : index
    %c0_181 = arith.constant 0 : index
    %287 = vector.load %arg16[%c0_180, %c0_181] : memref<8x128xf32, #tpu.memory_space<vmem>>, vector<8x128xf32>
    tpu.vector_store %arg16[%c0_180, %c0_181], %284 {strides = array<i32>} : memref<8x128xf32, #tpu.memory_space<vmem>>, vector<8x128xf32>,
    %288 = arith.index_cast %c7_i32 : i32 to index
    %c0_182 = arith.constant 0 : index
    %c0_183 = arith.constant 0 : index
    %289 = vector.load %arg9[%288, %c0_182, %c0_183] : memref<8x8x128xbf16, #tpu.memory_space<vmem>>, vector<1x8x128xbf16>
    %290 = vector.shape_cast %289 : vector<1x8x128xbf16> to vector<8x128xbf16>
    %291 = vector.shape_cast %276 : vector<8x128xbf16> to vector<1x8x128xbf16>
    tpu.vector_store %arg9[%288, %c0_182, %c0_183], %291 {strides = array<i32>} : memref<8x8x128xbf16, #tpu.memory_space<vmem>>, vector<1x8x128xbf16>,
    %c8_i32 = arith.constant 8 : i32
    %c0_i32_184 = arith.constant 0 : i32
    %292 = arith.cmpi eq, %arg1, %c0_i32_184 : i32
    %293 = arith.extui %292 : i1 to i32
    %c0_i32_185 = arith.constant 0 : i32
    %294 = arith.cmpi ne, %293, %c0_i32_185 : i32
    scf.if %294 {
      %c0_186 = arith.constant 0 : index
      %c0_187 = arith.constant 0 : index
      %295 = vector.load %arg14[%c0_186, %c0_187] : memref<8x128xf32, #tpu.memory_space<vmem>>, vector<8x128xf32>
      %c0_188 = arith.constant 0 : index
      %c0_189 = arith.constant 0 : index
      %296 = vector.load %arg10[%c0_188, %c0_189] : memref<8x128xf32, #tpu.memory_space<vmem>>, vector<8x128xf32>
      tpu.vector_store %arg10[%c0_188, %c0_189], %295 {strides = array<i32>} : memref<8x128xf32, #tpu.memory_space<vmem>>, vector<8x128xf32>,
      %c0_190 = arith.constant 0 : index
      %c0_191 = arith.constant 0 : index
      %297 = vector.load %arg15[%c0_190, %c0_191] : memref<8x128xbf16, #tpu.memory_space<vmem>>, vector<8x128xbf16>
      %298 = arith.extf %297 : vector<8x128xbf16> to vector<8x128xf32>
      %c0_192 = arith.constant 0 : index
      %c0_193 = arith.constant 0 : index
      %299 = vector.load %arg11[%c0_192, %c0_193] : memref<8x128xf32, #tpu.memory_space<vmem>>, vector<8x128xf32>
      tpu.vector_store %arg11[%c0_192, %c0_193], %298 {strides = array<i32>} : memref<8x128xf32, #tpu.memory_space<vmem>>, vector<8x128xf32>,
      %c0_194 = arith.constant 0 : index
      %c0_195 = arith.constant 0 : index
      %300 = vector.load %arg16[%c0_194, %c0_195] : memref<8x128xf32, #tpu.memory_space<vmem>>, vector<8x128xf32>
      %c0_196 = arith.constant 0 : index
      %c0_197 = arith.constant 0 : index
      %301 = vector.load %arg12[%c0_196, %c0_197] : memref<8x128xf32, #tpu.memory_space<vmem>>, vector<8x128xf32>
      tpu.vector_store %arg12[%c0_196, %c0_197], %300 {strides = array<i32>} : memref<8x128xf32, #tpu.memory_space<vmem>>, vector<8x128xf32>,
    } else {
    }
    return
  }
  func.func @transform_0(%arg0: i32, %arg1: i32) -> (i32, i32, i32) {
    %c0_i32 = arith.constant 0 : i32
    %c0_i32_0 = arith.constant 0 : i32
    return %arg1, %arg0, %c0_i32 : i32, i32, i32
  }
  func.func @transform_1(%arg0: i32, %arg1: i32) -> (i32, i32) {
    %c0_i32 = arith.constant 0 : i32
    %c0_i32_0 = arith.constant 0 : i32
    %c0_i32_1 = arith.constant 0 : i32
    return %c0_i32, %c0_i32_0 : i32, i32
  }
  func.func @transform_2(%arg0: i32, %arg1: i32) -> (i32, i32) {
    %c0_i32 = arith.constant 0 : i32
    %c0_i32_0 = arith.constant 0 : i32
    %c0_i32_1 = arith.constant 0 : i32
    return %c0_i32, %c0_i32_0 : i32, i32
  }
  func.func @transform_3(%arg0: i32, %arg1: i32) -> (i32, i32) {
    %c0_i32 = arith.constant 0 : i32
    %c0_i32_0 = arith.constant 0 : i32
    %c0_i32_1 = arith.constant 0 : i32
    return %c0_i32, %c0_i32_0 : i32, i32
  }
  func.func @transform_4(%arg0: i32, %arg1: i32) -> (i32, i32) {
    %c0_i32 = arith.constant 0 : i32
    %c0_i32_0 = arith.constant 0 : i32
    return %arg0, %c0_i32 : i32, i32
  }
  func.func @transform_5(%arg0: i32, %arg1: i32) -> (i32, i32) {
    %c0_i32 = arith.constant 0 : i32
    %c0_i32_0 = arith.constant 0 : i32
    return %arg0, %c0_i32 : i32, i32
  }
  func.func @transform_6(%arg0: i32, %arg1: i32) -> (i32, i32) {
    %c0_i32 = arith.constant 0 : i32
    %c0_i32_0 = arith.constant 0 : i32
    return %arg0, %c0_i32 : i32, i32
  }
  func.func @transform_7(%arg0: i32, %arg1: i32) -> (i32, i32, i32) {
    %c0_i32 = arith.constant 0 : i32
    %c0_i32_0 = arith.constant 0 : i32
    return %arg1, %arg0, %c0_i32 : i32, i32, i32
  }
  func.func @transform_8(%arg0: i32, %arg1: i32) -> (i32, i32) {
    %c0_i32 = arith.constant 0 : i32
    %c0_i32_0 = arith.constant 0 : i32
    return %arg0, %c0_i32 : i32, i32
  }
  func.func @transform_9(%arg0: i32, %arg1: i32) -> (i32, i32) {
    %c0_i32 = arith.constant 0 : i32
    %c0_i32_0 = arith.constant 0 : i32
    return %arg0, %c0_i32 : i32, i32
  }
  func.func @transform_10(%arg0: i32, %arg1: i32) -> (i32, i32) {
    %c0_i32 = arith.constant 0 : i32
    %c0_i32_0 = arith.constant 0 : i32
    return %arg0, %c0_i32 : i32, i32
  }
}

</mosaic_0001>

<bundles_post_ra>
// kernel: tpu_custom_call.1
= control target key start
LH: loop header
LB: loop body
LE: loop exit
PB: predicated region body
PF: predicated region fallthrough
CT: control target
= control target key end

     0   :  { %16 = vsyncpa [#allocation7], 0  ;;  %s2035_s0 = inlined_call_operand.hbm [shape: bf16[8,8,32], index: 0, kind: input, shape index: {}]   ;;  %s2036_s1 = inlined_call_operand.hbm [shape: bf16[32,128], index: 1, kind: input, shape index: {}]   ;;  %s2037_s2 = inlined_call_operand.hbm [shape: bf16[128,128], index: 2, kind: input, shape index: {}]   ;;  %s2038_s3 = inlined_call_operand.hbm [shape: f32[8,128], index: 3, kind: input, shape index: {}]   ;;  %s2039_s4 = inlined_call_operand.hbm [shape: f32[8,128], index: 4, kind: input, shape index: {}]   ;;  %s2040_s5 = inlined_call_operand.hbm [shape: f32[8,128], index: 5, kind: input, shape index: {}]   ;;  %s2041_s6 = inlined_call_operand.hbm [shape: f32[8,128], index: 6, kind: input, shape index: {}]   ;;  %s2042_s7 = inlined_call_operand.hbm [shape: bf16[8,8,128], index: 7, kind: output, shape index: {0}]   ;;  %s2043_s8 = inlined_call_operand.hbm [shape: f32[8,128], index: 8, kind: output, shape index: {1}]   ;;  %s2044_s9 = inlined_call_operand.hbm [shape: f32[8,128], index: 9, kind: output, shape index: {2}]   ;;  %s2045_s10 = inlined_call_operand.hbm [shape: f32[8,128], index: 10, kind: output, shape index: {3}]  }
   0x1   :  { %17 = vsyncpa [#allocation10], 0 }
   0x2   :  { %18 = vsyncpa [#allocation13], 0 }
   0x3   :  { %19 = vsyncpa [#allocation16], 0 }
   0x4   :  { %20 = vsyncpa [#allocation8], 0 }
   0x5   :  { %21 = vsyncpa [#allocation20], 0 }
   0x6   :  { %22 = vsyncpa [#allocation23], 0  ;;  %s40_s15 = sshll.u32 %s2036_s1, 4  ;;  %s1821_s16 = smov [#allocation9]   ;;  %s41_s15 = int_to_ptr.hbm [resolvable:$true] %s40_s15 }
   0x7   :  { %s42_s17 = sshll.u32 %s1821_s16, 4  ;;  %s67_s20 = sshll.u32 %s2038_s3, 4  ;;  %s43_s17 = int_to_ptr.vmem [resolvable:$true] %s42_s17  ;;  %s68_s20 = int_to_ptr.hbm [resolvable:$true] %s67_s20 }
   0x8   :  { %s1822_s21 = smov 64   ;;  %s1823_s22 = smov 4  }
   0x9   :  { %48 = dma.hbm_to_vmem [thread:$0]  %s41_s15, 256, %s43_s17, [#allocation10], %s1822_s21, %s1822_s21, %s1823_s22  }
   0xa   :  { %s1824_s23 = smov [#allocation12]   ;;  %s89_s1 = sshll.u32 %s2040_s5, 4  ;;  %s90_s1 = int_to_ptr.hbm [resolvable:$true] %s89_s1 }
   0xb   :  { %s69_s24 = sshll.u32 %s1824_s23, 4  ;;  %s27_s3 = sshll.u32 %s2035_s0, 4  ;;  %s70_s24 = int_to_ptr.vmem [resolvable:$true] %s69_s24  ;;  %s28_s3 = int_to_ptr.hbm [resolvable:$true] %s27_s3 }
   0xc   :  { %72 = dma.hbm_to_vmem [thread:$0]  %s68_s20, 128, %s70_s24, [#allocation13]  }
   0xd   :  { %s1825_s29 = smov [#allocation15]   ;;  %s1826_s11 = smov [#allocation6]  }
   0xe   :  { %s91_s30 = sshll.u32 %s1825_s29, 4  ;;  %s29_s12 = sshll.u32 %s1826_s11, 4  ;;  %s92_s30 = int_to_ptr.vmem [resolvable:$true] %s91_s30  ;;  %s30_s12 = int_to_ptr.vmem [resolvable:$true] %s29_s12 }
   0xf   :  { %94 = dma.hbm_to_vmem [thread:$0]  %s90_s1, 128, %s92_s30, [#allocation16]  }
  0x10   :  { %s53_s15 = sshll.u32 %s2037_s2, 4  ;;  %s78_s0 = sshll.u32 %s2039_s4, 4  ;;  %s54_s15 = int_to_ptr.hbm [resolvable:$true] %s53_s15  ;;  %s79_s0 = int_to_ptr.hbm [resolvable:$true] %s78_s0 }
  0x11   :  { %35 = dma.hbm_to_vmem [thread:$0]  %s28_s3, 512, %s30_s12, [#allocation7], %s1822_s21, %s1822_s21, %s1823_s22  }
  0x12   :  { %s1827_s17 = smov [#allocation11]   ;;  %s1828_s19 = smov [#allocation14]  }
  0x13   :  { %s55_s18 = sshll.u32 %s1827_s17, 4  ;;  %s80_s2 = sshll.u32 %s1828_s19, 4  ;;  %s56_s18 = int_to_ptr.vmem [resolvable:$true] %s55_s18  ;;  %s81_s2 = int_to_ptr.vmem [resolvable:$true] %s80_s2 }
  0x14   :  { %61 = dma.hbm_to_vmem [thread:$0]  %s54_s15, 1024, %s56_s18, [#allocation10], %s1822_s21, %s1822_s21, %s1823_s22  }
  0x15   :  { %s100_s24 = sshll.u32 %s2041_s6, 4  ;;  %s1829_s25 = smov [#allocation17]   ;;  %s101_s24 = int_to_ptr.hbm [resolvable:$true] %s100_s24 }
  0x16   :  { %83 = dma.hbm_to_vmem [thread:$0]  %s79_s0, 128, %s81_s2, [#allocation13]  }
  0x17   :  { %s102_s26 = sshll.u32 %s1829_s25, 4  ;;  %s103_s26 = int_to_ptr.vmem [resolvable:$true] %s102_s26 }
  0x18   :  { %105 = dma.hbm_to_vmem [thread:$0]  %s101_s24, 128, %s103_s26, [#allocation16]  }
  0x19   :  { %1807 = dma.done.wait [#allocation7], 512  }
  0x1a   :  { %1808 = vsyncadd [#allocation7], 4294966784 }
  0x1b   :  { %1809 = dma.done.wait [#allocation10], 1280  }
  0x1c   :  { %1810 = vsyncadd [#allocation10], 4294966016 }
  0x1d   :  { %1811 = dma.done.wait [#allocation13], 256  }
  0x1e   :  { %1812 = vsyncadd [#allocation13], 4294967040 }
  0x1f   :  { %1813 = dma.done.wait [#allocation16], 256  }
  0x20   :  { %1814 = vsyncadd [#allocation16], 4294967040  ;;  %v1466_v0 = vld [vmem:[#allocation11 + $0x38] sm:$0xff]  ;;  %v1465_v2 = vld [vmem:[#allocation11 + $0x30] sm:$0xff]  ;;  %vm201_vm0 = vcmask 261120   ;;  %v1830_v44 = vmov 0.0  }
  0x21   :  { %v1458_v1 = vld [vmem:[#allocation9 + $0x8] sm:$0xff]  ;;  %328 = vmatpush.bf16.msra.mxu1 %v1466_v0  ;;  %v1457_v3 = vld [vmem:[#allocation9] sm:$0xff]  ;;  %v1464_v6 = vld [vmem:[#allocation11 + $0x28] sm:$0xff]  ;;  %s1831_s4 = smov [#allocation22]   ;;  %s1134_s28 = sshll.u32 %s2045_s10, 4  ;;  %s1135_s28 = int_to_ptr.hbm [resolvable:$true] %s1134_s28 }
  0x22   :  { %220 = vmatpush.bf16.msra.mxu0 %v1458_v1  ;;  %v141_v4 = vld [vmem:[#allocation15] sm:$0xff]  ;;  %v1463_v8 = vld [vmem:[#allocation11 + $0x20] sm:$0xff]  ;;  %v1462_v9 = vld [vmem:[#allocation11 + $0x18] sm:$0xff]  ;;  %s1132_s6 = sshll.u32 %s1831_s4, 4  ;;  %s1832_s3 = smov [#allocation19]   ;;  %s1133_s6 = int_to_ptr.vmem [resolvable:$true] %s1132_s6 }
  0x23   :  { %v142_v5 = vpack.c.bf16 %v141_v4, %v141_v4  ;;  %v1453_v7 = vld [vmem:[#allocation6] sm:$0xff]  ;;  %v1460_v11 = vld [vmem:[#allocation11 + $0x8] sm:$0xff]  ;;  %v1459_v12 = vld [vmem:[#allocation11] sm:$0xff]  ;;  %s1110_s29 = sshll.u32 %s1832_s3, 4  ;;  %s1112_s12 = sshll.u32 %s2043_s8, 4  ;;  %s1111_s29 = int_to_ptr.vmem [resolvable:$true] %s1110_s29  ;;  %s1113_s12 = int_to_ptr.hbm [resolvable:$true] %s1112_s12 }
  0x24   :  { %v1461_v10 = vld [vmem:[#allocation11 + $0x10] sm:$0xff]  ;;  %v1474_v14 = vld [vmem:[#allocation11 + $0x38] sm:$0xff]  ;;  %v1472_v16 = vld [vmem:[#allocation11 + $0x28] sm:$0xff]  ;;  %s1833_s10 = smov [#allocation18]   ;;  %s1098_s5 = sshll.u32 %s2042_s7, 4  ;;  %s1099_s5 = int_to_ptr.hbm [resolvable:$true] %s1098_s5 }
  0x25   :  { %329 = vmatpush.bf16.msra.mxu1 %v1465_v2  ;;  %143 = vst [vmem:[#allocation4] sm:$0xf] %v142_v5  ;;  %430 = vmatpush.bf16.msra.mxu2 %v1474_v14  ;;  %v1473_v15 = vld [vmem:[#allocation11 + $0x30] sm:$0xff]  ;;  %v1924_v17 = vld [vmem:[#allocation12 + $0x3] ss:$0 sm:$0xff]  ;;  %v139_v19 = vld [vmem:[#allocation14] sm:$0xff] }
  0x26   :  { %221 = vmatpush.bf16.msra.mxu0 %v1457_v3  ;;  %v1471_v18 = vld [vmem:[#allocation11 + $0x20] sm:$0xff]  ;;  %v144_v20 = vld [vmem:[#allocation17] sm:$0xff]  ;;  %v1469_v26 = vld [vmem:[#allocation11 + $0x10] sm:$0xff]  ;;  %s1096_s13 = sshll.u32 %s1833_s10, 4  ;;  %s1834_s8 = smov [#allocation21]   ;;  %s1097_s13 = int_to_ptr.vmem [resolvable:$true] %s1096_s13 }
  0x27   :  { %v1926_v21 = vld [vmem:[#allocation12 + $0x4] ss:$0 sm:$0xff]  ;;  %v351_v22 = vmul.f32 %v1924_v17, %v144_v20  ;;  %v1470_v23 = vld [vmem:[#allocation11 + $0x18] sm:$0xff]  ;;  %v1468_v27 = vld [vmem:[#allocation11 + $0x8] sm:$0xff]  ;;  %s1121_s16 = sshll.u32 %s1834_s8, 4  ;;  %s1123_s17 = sshll.u32 %s2044_s9, 4  ;;  %s1122_s16 = int_to_ptr.vmem [resolvable:$true] %s1121_s16  ;;  %s1124_s17 = int_to_ptr.hbm [resolvable:$true] %s1123_s17 }
  0x28   :  { %v352_v24 = vmul.f32 %v1926_v21, %v139_v19  ;;  %v1467_v28 = vld [vmem:[#allocation11] sm:$0xff]  ;;  %v1482_v29 = vld [vmem:[#allocation11 + $0x38] sm:$0xff]  ;;  %v1481_v30 = vld [vmem:[#allocation11 + $0x30] sm:$0xff] }
  0x29   :  { %330 = vmatpush.bf16.msra.mxu1 %v1464_v6  ;;  %1185 = vmatmul.msk.bf16.vlgmr.msra.gmra.mxu0 %vm201_vm0, %v1453_v7  ;;  %v1930_v31 = vld [vmem:[#allocation12] ss:$0 sm:$0xff]  ;;  %v1480_v32 = vld [vmem:[#allocation11 + $0x28] sm:$0xff]  ;;  %v1933_v35 = vld [vmem:[#allocation12 + $0x1] ss:$0 sm:$0xff] }
  0x2a   :  { %431 = vmatpush.bf16.msra.mxu2 %v1473_v15  ;;  %v353_v25 = vadd.f32 %v352_v24, %v351_v22  ;;  %533 = vmatpush.bf16.msra.mxu3 %v1482_v29  ;;  %v1935_v37 = vld [vmem:[#allocation12 + $0x2] ss:$0 sm:$0xff]  ;;  %v342_v39 = vmul.f32 %v1933_v35, %v139_v19  ;;  %v1478_v50 = vld [vmem:[#allocation11 + $0x18] sm:$0xff]  ;;  %v1477_v51 = vld [vmem:[#allocation11 + $0x10] sm:$0xff] }
  0x2b   :  { %v1479_v49 = vld [vmem:[#allocation11 + $0x20] sm:$0xff]  ;;  %v1476_v52 = vld [vmem:[#allocation11 + $0x8] sm:$0xff]  ;;  %v1454_v53 = vld [vmem:[#allocation6 + $0x8] sm:$0xff] }
  0x2c   :  { %v1921_v13 = vld [vmem:[#allocation4] sm:$0xf]  ;;  %v1475_v54 = vld [vmem:[#allocation11] sm:$0xff] }
  0x2d   :  { %331 = vmatpush.bf16.msra.mxu1 %v1463_v8  ;;  %v1941_v55 = vld [vmem:[#allocation12 + $0x5] ss:$0 sm:$0xff]  ;;  %v354_v56 = vunpack.c.l.bf16 %v1921_v13  ;;  %v1490_v8 = vld [vmem:[#allocation11 + $0x38] sm:$0xff]  ;;  %v1484_v14 = vld [vmem:[#allocation11 + $0x8] sm:$0xff] }
  0x2e   :  { %432 = vmatpush.bf16.msra.mxu2 %v1472_v16  ;;  %534 = vmatpush.bf16.msra.mxu3 %v1481_v30  ;;  %v1483_v15 = vld [vmem:[#allocation11] sm:$0xff]  ;;  %v1498_v16 = vld [vmem:[#allocation11 + $0x38] sm:$0xff] }
  0x2f   :  { %v355_v58 = vmul.f32 %v1941_v55, %v354_v56 }
  0x31   :  { %332 = vmatpush.bf16.msra.mxu1 %v1462_v9  ;;  %v356_v61 = vadd.f32 %v355_v58, %v353_v25  ;;  %v1489_v9 = vld [vmem:[#allocation11 + $0x30] sm:$0xff] }
  0x32   :  { %433 = vmatpush.bf16.msra.mxu2 %v1471_v18  ;;  %535 = vmatpush.bf16.msra.mxu3 %v1480_v32  ;;  %v1497_v18 = vld [vmem:[#allocation11 + $0x30] sm:$0xff] }
  0x35   :  { %333 = vmatpush.bf16.msra.mxu1 %v1461_v10  ;;  %v1488_v10 = vld [vmem:[#allocation11 + $0x28] sm:$0xff] }
  0x36   :  { %434 = vmatpush.bf16.msra.mxu2 %v1470_v23  ;;  %536 = vmatpush.bf16.msra.mxu3 %v1479_v49  ;;  %v1496_v23 = vld [vmem:[#allocation11 + $0x28] sm:$0xff]  ;;  %v1491_v49 = vld [vmem:[#allocation11] sm:$0xff] }
  0x39   :  { %334 = vmatpush.bf16.msra.mxu1 %v1460_v11  ;;  %1186 = vmatmul.msk.bf16.gmra.mxu0 %vm201_vm0, %v1454_v53  ;;  %v1487_v11 = vld [vmem:[#allocation11 + $0x20] sm:$0xff] }
  0x3a   :  { %435 = vmatpush.bf16.msra.mxu2 %v1469_v26  ;;  %537 = vmatpush.bf16.msra.mxu3 %v1478_v50 }
  0x3d   :  { %335 = vmatpush.bf16.msra.mxu1 %v1459_v12  ;;  %v1486_v12 = vld [vmem:[#allocation11 + $0x18] sm:$0xff] }
  0x3e   :  { %436 = vmatpush.bf16.msra.mxu2 %v1468_v27  ;;  %538 = vmatpush.bf16.msra.mxu3 %v1477_v51 }
  0x40   :  { %336 = vmatmul.bf16.vlgmr.msra.gmra.mxu1 %v1921_v13  ;;  %v1485_v13 = vld [vmem:[#allocation11 + $0x10] sm:$0xff] }
  0x41   :  { %636 = vmatpush.bf16.msrb.mxu1 %v1490_v8  ;;  %v1504_v8 = vld [vmem:[#allocation11 + $0x28] sm:$0xff] }
  0x42   :  { %437 = vmatpush.bf16.msra.mxu2 %v1467_v28  ;;  %539 = vmatpush.bf16.msra.mxu3 %v1476_v52 }
  0x45   :  { %637 = vmatpush.bf16.msrb.mxu1 %v1489_v9  ;;  %v1503_v9 = vld [vmem:[#allocation11 + $0x20] sm:$0xff] }
  0x46   :  { %540 = vmatpush.bf16.msra.mxu3 %v1475_v54  ;;  %739 = vmatpush.bf16.msrb.mxu2 %v1498_v16  ;;  %v1513_v16 = vld [vmem:[#allocation11 + $0x30] sm:$0xff] }
  0x49   :  { %638 = vmatpush.bf16.msrb.mxu1 %v1488_v10  ;;  %v1502_v10 = vld [vmem:[#allocation11 + $0x18] sm:$0xff] }
  0x4a   :  { %740 = vmatpush.bf16.msrb.mxu2 %v1497_v18 }
  0x4d   :  { %639 = vmatpush.bf16.msrb.mxu1 %v1487_v11  ;;  %v1501_v11 = vld [vmem:[#allocation11 + $0x10] sm:$0xff] }
  0x4e   :  { %741 = vmatpush.bf16.msrb.mxu2 %v1496_v23 }
  0x51   :  { %640 = vmatpush.bf16.msrb.mxu1 %v1486_v12  ;;  %v1500_v12 = vld [vmem:[#allocation11 + $0x8] sm:$0xff] }
  0x55   :  { %641 = vmatpush.bf16.msrb.mxu1 %v1485_v13  ;;  %v1499_v13 = vld [vmem:[#allocation11] sm:$0xff] }
  0x59   :  { %642 = vmatpush.bf16.msrb.mxu1 %v1484_v14  ;;  %v1514_v14 = vld [vmem:[#allocation11 + $0x38] sm:$0xff] }
  0x5a   :  { %945 = vmatpush.bf16.msrb.mxu0 %v1514_v14 }
  0x5d   :  { %643 = vmatpush.bf16.msrb.mxu1 %v1483_v15  ;;  %v1456_v15 = vld [vmem:[#allocation6 + $0x18] sm:$0xff] }
  0x5e   :  { %946 = vmatpush.bf16.msrb.mxu0 %v1513_v16  ;;  %v1519_v16 = vld [vmem:[#allocation11 + $0x20] sm:$0xff] }
  0xa6   :  { %v223_v33 = vpop.f32.mrf.mxu0 }
  0xa7   :  { %v244_v34 = vadd.f32 %v1930_v31, %v223_v33 }
  0xae   :  { %v225_v57 = vpop.f32.mrf.mxu0 }
  0xaf   :  { %v245_v59 = vadd.f32 %v1930_v31, %v225_v57 }
  0xb6   :  { %v228_v24 = vpop.f32.mrf.mxu0 }
  0xb7   :  { %v246_v25 = vadd.f32 %v1930_v31, %v228_v24 }
  0xbd   :  { %v337_v36 = vpop.f32.mrf.mxu1 }
  0xbe   :  { %v341_v38 = vadd.f32 %v337_v36, %v244_v34  ;;  %v230_v52 = vpop.f32.mrf.mxu0 }
  0xbf   :  { %v247_v56 = vadd.f32 %v1930_v31, %v230_v52 }
  0xc0   :  { %v343_v40 = vsub.f32 %v341_v38, %v144_v20  ;;  %v453_v20 = vmul.f32 %v1924_v17, %v356_v61 }
  0xc2   :  { %v344_v41 = vmul.f32 %v1935_v37, %v343_v40 }
  0xc4   :  { %v345_v42 = vadd.f32 %v344_v41, %v342_v39 }
  0xc5   :  { %v339_v43 = vpop.f32.mrf.mxu1 }
  0xc6   :  { %vm346_vm1 = vcmp.gt.f32.partialorder %v345_v42, 1.0  ;;  %v1495_v43 = vld [vmem:[#allocation11 + $0x20] sm:$0xff] }
  0xc7   :  { %v1221_v45 = vsel %vm346_vm1, 1.0, %v1830_v44  ;;  %v350_v46 = vsel %vm346_vm1, 0.0, %v345_v42  ;;  %742 = vmatpush.bf16.msrb.mxu2 %v1495_v43 }
  0xc8   :  { %v349_v47 = vpack.c.bf16 %v1221_v45, %v1221_v45  ;;  %v444_v0 = vmul.f32 %v1933_v35, %v350_v46  ;;  %v454_v22 = vmul.f32 %v1926_v21, %v350_v46  ;;  %v1494_v45 = vld [vmem:[#allocation11 + $0x18] sm:$0xff]  ;;  %v1493_v46 = vld [vmem:[#allocation11 + $0x10] sm:$0xff] }
  0xca   :  { %358 = vst [vmem:[#allocation4] sm:$0xf] %v349_v47  ;;  %v455_v27 = vadd.f32 %v454_v22, %v453_v20  ;;  %v1512_v22 = vld [vmem:[#allocation11 + $0x28] sm:$0xff] }
  0xcb   :  { %360 = vst [vmem:[#allocation18] sm:$0xf] %v349_v47  ;;  %743 = vmatpush.bf16.msrb.mxu2 %v1494_v45  ;;  %v1492_v47 = vld [vmem:[#allocation11 + $0x8] sm:$0xff]  ;;  %947 = vmatpush.bf16.msrb.mxu0 %v1512_v22 }
  0xcf   :  { %744 = vmatpush.bf16.msrb.mxu2 %v1493_v46  ;;  %v1508_v46 = vld [vmem:[#allocation11 + $0x8] sm:$0xff] }
  0xd1   :  { %v362_v48 = vld [vmem:[#allocation4] sm:$0xf] }
  0xd2   :  { %438 = vmatmul.bf16.vlgmr.msra.gmra.mxu2 %v362_v48  ;;  %v456_v19 = vunpack.c.l.bf16 %v362_v48  ;;  %v1455_v48 = vld [vmem:[#allocation6 + $0x10] sm:$0xff] }
  0xd3   :  { %745 = vmatpush.bf16.msrb.mxu2 %v1492_v47  ;;  %1187 = vmatmul.msk.bf16.gmra.mxu0 %vm201_vm0, %v1455_v48  ;;  %v1507_v47 = vld [vmem:[#allocation11] sm:$0xff]  ;;  %v1522_v48 = vld [vmem:[#allocation11 + $0x38] sm:$0xff] }
  0xd4   :  { %v457_v26 = vmul.f32 %v1941_v55, %v456_v19  ;;  %1048 = vmatpush.bf16.msra.mxu1 %v1522_v48 }
  0xd6   :  { %v458_v29 = vadd.f32 %v457_v26, %v455_v27 }
  0xd7   :  { %746 = vmatpush.bf16.msrb.mxu2 %v1491_v49 }
  0xd8   :  { %v556_v53 = vmul.f32 %v1924_v17, %v458_v29 }
  0xe3   :  { %1188 = vmatmul.msk.bf16.gmra.mxu0 %vm201_vm0, %v1456_v15 }
 0x150   :  { %v233_v20 = vpop.f32.mrf.mxu0 }
 0x151   :  { %v248_v24 = vadd.f32 %v1930_v31, %v233_v20  ;;  %v1516_v20 = vld [vmem:[#allocation11 + $0x8] sm:$0xff] }
 0x155   :  { %v439_v60 = vpop.f32.mrf.mxu2 }
 0x156   :  { %v443_v62 = vadd.f32 %v439_v60, %v245_v59 }
 0x158   :  { %v445_v63 = vsub.f32 %v443_v62, %v356_v61 }
 0x15a   :  { %v446_v1 = vmul.f32 %v1935_v37, %v445_v63 }
 0x15c   :  { %v447_v2 = vadd.f32 %v446_v1, %v444_v0 }
 0x15d   :  { %v441_v3 = vpop.f32.mrf.mxu2 }
 0x15e   :  { %vm448_vm2 = vcmp.gt.f32.partialorder %v447_v2, 1.0 }
 0x15f   :  { %v1254_v4 = vsel %vm448_vm2, 1.0, %v1830_v44  ;;  %v1949_v5 = vsel %vm448_vm2, 0.0, %v447_v2 }
 0x160   :  { %v451_v6 = vpack.c.bf16 %v1254_v4, %v1254_v4  ;;  %v547_v33 = vmul.f32 %v1933_v35, %v1949_v5  ;;  %v557_v51 = vmul.f32 %v1926_v21, %v1949_v5 }
 0x162   :  { %460 = vst [vmem:[#allocation4] sm:$0xf] %v451_v6  ;;  %v558_v57 = vadd.f32 %v557_v51, %v556_v53 }
 0x163   :  { %463 = vst [vmem:[#allocation18 + $0x4] sm:$0xf] %v451_v6  ;;  %v1506_v6 = vld [vmem:[#allocation11 + $0x38] sm:$0xff] }
 0x164   :  { %842 = vmatpush.bf16.msrb.mxu3 %v1506_v6 }
 0x169   :  { %v1951_v7 = vld [vmem:[#allocation4] sm:$0xf] }
 0x16a   :  { %541 = vmatmul.bf16.vlgmr.msra.gmra.mxu3 %v1951_v7  ;;  %v559_v50 = vunpack.c.l.bf16 %v1951_v7  ;;  %v1505_v7 = vld [vmem:[#allocation11 + $0x30] sm:$0xff] }
 0x16b   :  { %843 = vmatpush.bf16.msrb.mxu3 %v1505_v7 }
 0x16c   :  { %v560_v54 = vmul.f32 %v1941_v55, %v559_v50  ;;  %v1521_v50 = vld [vmem:[#allocation11 + $0x30] sm:$0xff] }
 0x16d   :  { %1049 = vmatpush.bf16.msra.mxu1 %v1521_v50 }
 0x16e   :  { %v561_v59 = vadd.f32 %v560_v54, %v558_v57  ;;  %v235_v54 = vpop.f32.mrf.mxu0 }
 0x16f   :  { %844 = vmatpush.bf16.msrb.mxu3 %v1504_v8 }
 0x170   :  { %v659_v23 = vmul.f32 %v1924_v17, %v561_v59 }
 0x173   :  { %845 = vmatpush.bf16.msrb.mxu3 %v1503_v9 }
 0x176   :  { %v238_v22 = vpop.f32.mrf.mxu0 }
 0x177   :  { %846 = vmatpush.bf16.msrb.mxu3 %v1502_v10 }
 0x17b   :  { %847 = vmatpush.bf16.msrb.mxu3 %v1501_v11 }
 0x17f   :  { %848 = vmatpush.bf16.msrb.mxu3 %v1500_v12 }
 0x183   :  { %849 = vmatpush.bf16.msrb.mxu3 %v1499_v13 }
 0x1ed   :  { %v542_v28 = vpop.f32.mrf.mxu3 }
 0x1ee   :  { %v546_v30 = vadd.f32 %v542_v28, %v246_v25  ;;  %v1511_v28 = vld [vmem:[#allocation11 + $0x20] sm:$0xff] }
 0x1ef   :  { %948 = vmatpush.bf16.msrb.mxu0 %v1511_v28 }
 0x1f0   :  { %v548_v32 = vsub.f32 %v546_v30, %v458_v29 }
 0x1f2   :  { %v549_v34 = vmul.f32 %v1935_v37, %v548_v32 }
 0x1f4   :  { %v550_v36 = vadd.f32 %v549_v34, %v547_v33  ;;  %v1510_v33 = vld [vmem:[#allocation11 + $0x18] sm:$0xff] }
 0x1f5   :  { %v544_v38 = vpop.f32.mrf.mxu3  ;;  %949 = vmatpush.bf16.msrb.mxu0 %v1510_v33 }
 0x1f6   :  { %vm551_vm3 = vcmp.gt.f32.partialorder %v550_v36, 1.0 }
 0x1f7   :  { %v1287_v39 = vsel %vm551_vm3, 1.0, %v1830_v44  ;;  %v1962_v40 = vsel %vm551_vm3, 0.0, %v550_v36 }
 0x1f8   :  { %v554_v41 = vpack.c.bf16 %v1287_v39, %v1287_v39  ;;  %v650_v62 = vmul.f32 %v1933_v35, %v1962_v40  ;;  %v660_v19 = vmul.f32 %v1926_v21, %v1962_v40  ;;  %v1509_v40 = vld [vmem:[#allocation11 + $0x10] sm:$0xff] }
 0x1f9   :  { %950 = vmatpush.bf16.msrb.mxu0 %v1509_v40 }
 0x1fa   :  { %563 = vst [vmem:[#allocation4] sm:$0xf] %v554_v41  ;;  %v661_v26 = vadd.f32 %v660_v19, %v659_v23  ;;  %v1517_v19 = vld [vmem:[#allocation11 + $0x10] sm:$0xff]  ;;  %v1515_v23 = vld [vmem:[#allocation11] sm:$0xff] }
 0x1fb   :  { %566 = vst [vmem:[#allocation18 + $0x8] sm:$0xf] %v554_v41 }
 0x1fd   :  { %951 = vmatpush.bf16.msrb.mxu0 %v1508_v46 }
 0x201   :  { %v1964_v42 = vld [vmem:[#allocation4] sm:$0xf]  ;;  %952 = vmatpush.bf16.msrb.mxu0 %v1507_v47 }
 0x202   :  { %644 = vmatmul.bf16.vlgmr.msrb.gmra.mxu1 %v1964_v42  ;;  %v662_v18 = vunpack.c.l.bf16 %v1964_v42 }
 0x204   :  { %v663_v25 = vmul.f32 %v1941_v55, %v662_v18  ;;  %v1518_v18 = vld [vmem:[#allocation11 + $0x18] sm:$0xff] }
 0x206   :  { %v664_v29 = vadd.f32 %v663_v25, %v661_v26  ;;  %v250_v25 = vadd.f32 %v1930_v31, %v238_v22 }
 0x208   :  { %v762_v52 = vmul.f32 %v1924_v17, %v664_v29 }
 0x27f   :  { %v645_v58 = vpop.f32.mrf.mxu1 }
 0x280   :  { %v649_v60 = vadd.f32 %v645_v58, %v247_v56  ;;  %v1520_v56 = vld [vmem:[#allocation11 + $0x28] sm:$0xff]  ;;  %v249_v58 = vadd.f32 %v1930_v31, %v235_v54 }
 0x281   :  { %1050 = vmatpush.bf16.msra.mxu1 %v1520_v56 }
 0x282   :  { %v651_v61 = vsub.f32 %v649_v60, %v561_v59 }
 0x284   :  { %v652_v63 = vmul.f32 %v1935_v37, %v651_v61 }
 0x285   :  { %1051 = vmatpush.bf16.msra.mxu1 %v1519_v16 }
 0x286   :  { %v653_v0 = vadd.f32 %v652_v63, %v650_v62 }
 0x287   :  { %v647_v1 = vpop.f32.mrf.mxu1 }
 0x288   :  { %vm654_vm4 = vcmp.gt.f32.partialorder %v653_v0, 1.0 }
 0x289   :  { %v1320_v2 = vsel %vm654_vm4, 1.0, %v1830_v44  ;;  %v1978_v3 = vsel %vm654_vm4, 0.0, %v653_v0  ;;  %1052 = vmatpush.bf16.msra.mxu1 %v1518_v18 }
 0x28a   :  { %v657_v4 = vpack.c.bf16 %v1320_v2, %v1320_v2  ;;  %v753_v34 = vmul.f32 %v1933_v35, %v1978_v3  ;;  %v763_v51 = vmul.f32 %v1926_v21, %v1978_v3 }
 0x28c   :  { %666 = vst [vmem:[#allocation4] sm:$0xf] %v657_v4  ;;  %v764_v57 = vadd.f32 %v763_v51, %v762_v52 }
 0x28d   :  { %669 = vst [vmem:[#allocation18 + $0xc] sm:$0xf] %v657_v4  ;;  %1053 = vmatpush.bf16.msra.mxu1 %v1517_v19 }
 0x291   :  { %1054 = vmatpush.bf16.msra.mxu1 %v1516_v20 }
 0x293   :  { %v1980_v5 = vld [vmem:[#allocation4] sm:$0xf] }
 0x294   :  { %747 = vmatmul.bf16.vlgmr.msrb.gmra.mxu2 %v1980_v5  ;;  %v765_v49 = vunpack.c.l.bf16 %v1980_v5 }
 0x295   :  { %1055 = vmatpush.bf16.msra.mxu1 %v1515_v23 }
 0x296   :  { %v766_v53 = vmul.f32 %v1941_v55, %v765_v49 }
 0x298   :  { %v767_v59 = vadd.f32 %v766_v53, %v764_v57 }
 0x29a   :  { %v865_v1 = vmul.f32 %v1924_v17, %v767_v59 }
 0x317   :  { %v748_v27 = vpop.f32.mrf.mxu2 }
 0x318   :  { %v752_v30 = vadd.f32 %v748_v27, %v248_v24  ;;  %v240_v24 = vpop.f32.mrf.mxu0 }
 0x31a   :  { %v754_v32 = vsub.f32 %v752_v30, %v664_v29 }
 0x31c   :  { %v755_v36 = vmul.f32 %v1935_v37, %v754_v32 }
 0x31e   :  { %v756_v38 = vadd.f32 %v755_v36, %v753_v34 }
 0x31f   :  { %v750_v39 = vpop.f32.mrf.mxu2 }
 0x320   :  { %vm757_vm5 = vcmp.gt.f32.partialorder %v756_v38, 1.0 }
 0x321   :  { %v1353_v41 = vsel %vm757_vm5, 1.0, %v1830_v44  ;;  %v761_v42 = vsel %vm757_vm5, 0.0, %v756_v38 }
 0x322   :  { %v760_v43 = vpack.c.bf16 %v1353_v41, %v1353_v41  ;;  %v866_v63 = vmul.f32 %v1926_v21, %v761_v42  ;;  %v856_v3 = vmul.f32 %v1933_v35, %v761_v42 }
 0x324   :  { %772 = vst [vmem:[#allocation18 + $0x10] sm:$0xf] %v760_v43  ;;  %v867_v5 = vadd.f32 %v866_v63, %v865_v1 }
 0x325   :  { %769 = vst [vmem:[#allocation4] sm:$0xf] %v760_v43 }
 0x32c   :  { %v774_v45 = vld [vmem:[#allocation4] sm:$0xf] }
 0x32d   :  { %850 = vmatmul.bf16.vlgmr.msrb.gmra.mxu3 %v774_v45  ;;  %v868_v60 = vunpack.c.l.bf16 %v774_v45 }
 0x32f   :  { %v869_v2 = vmul.f32 %v1941_v55, %v868_v60 }
 0x331   :  { %v870_v7 = vadd.f32 %v869_v2, %v867_v5 }
 0x333   :  { %v968_v12 = vmul.f32 %v1924_v17, %v870_v7 }
 0x3b0   :  { %v851_v61 = vpop.f32.mrf.mxu3 }
 0x3b1   :  { %v855_v62 = vadd.f32 %v851_v61, %v249_v58 }
 0x3b3   :  { %v857_v0 = vsub.f32 %v855_v62, %v767_v59 }
 0x3b5   :  { %v858_v4 = vmul.f32 %v1935_v37, %v857_v0 }
 0x3b7   :  { %v859_v6 = vadd.f32 %v858_v4, %v856_v3 }
 0x3b8   :  { %v853_v8 = vpop.f32.mrf.mxu3 }
 0x3b9   :  { %vm860_vm6 = vcmp.gt.f32.partialorder %v859_v6, 1.0 }
 0x3ba   :  { %v1386_v9 = vsel %vm860_vm6, 1.0, %v1830_v44  ;;  %v864_v10 = vsel %vm860_vm6, 0.0, %v859_v6 }
 0x3bb   :  { %v863_v11 = vpack.c.bf16 %v1386_v9, %v1386_v9  ;;  %v969_v13 = vmul.f32 %v1926_v21, %v864_v10  ;;  %v959_v29 = vmul.f32 %v1933_v35, %v864_v10 }
 0x3bd   :  { %875 = vst [vmem:[#allocation18 + $0x14] sm:$0xf] %v863_v11  ;;  %v970_v14 = vadd.f32 %v969_v13, %v968_v12 }
 0x3be   :  { %872 = vst [vmem:[#allocation4] sm:$0xf] %v863_v11 }
 0x3c5   :  { %v877_v15 = vld [vmem:[#allocation4] sm:$0xf] }
 0x3c6   :  { %953 = vmatmul.bf16.vlgmr.msrb.gmra.mxu0 %v877_v15  ;;  %v971_v34 = vunpack.c.l.bf16 %v877_v15 }
 0x3c8   :  { %v972_v39 = vmul.f32 %v1941_v55, %v971_v34 }
 0x3ca   :  { %v973_v41 = vadd.f32 %v972_v39, %v970_v14 }
 0x3cc   :  { %v1071_v46 = vmul.f32 %v1924_v17, %v973_v41 }
 0x443   :  { %v954_v26 = vpop.f32.mrf.mxu0 }
 0x444   :  { %v958_v27 = vadd.f32 %v954_v26, %v250_v25 }
 0x446   :  { %v960_v28 = vsub.f32 %v958_v27, %v870_v7 }
 0x448   :  { %v961_v30 = vmul.f32 %v1935_v37, %v960_v28 }
 0x44a   :  { %v962_v32 = vadd.f32 %v961_v30, %v959_v29 }
 0x44b   :  { %v956_v33 = vpop.f32.mrf.mxu0 }
 0x44c   :  { %vm963_vm7 = vcmp.gt.f32.partialorder %v962_v32, 1.0 }
 0x44d   :  { %v1419_v36 = vsel %vm963_vm7, 1.0, %v1830_v44  ;;  %v967_v40 = vsel %vm963_vm7, 0.0, %v962_v32 }
 0x44e   :  { %v966_v38 = vpack.c.bf16 %v1419_v36, %v1419_v36  ;;  %v1072_v42 = vmul.f32 %v1926_v21, %v967_v40  ;;  %v251_v21 = vadd.f32 %v1930_v31, %v240_v24 }
 0x450   :  { %978 = vst [vmem:[#allocation18 + $0x18] sm:$0xf] %v966_v38  ;;  %v1073_v47 = vadd.f32 %v1072_v42, %v1071_v46 }
 0x451   :  { %975 = vst [vmem:[#allocation4] sm:$0xf] %v966_v38 }
 0x458   :  { %v980_v43 = vld [vmem:[#allocation4] sm:$0xf] }
 0x459   :  { %1056 = vmatmul.bf16.vlgmr.msra.gmra.mxu1 %v980_v43  ;;  %v1074_v45 = vunpack.c.l.bf16 %v980_v43 }
 0x45b   :  { %v1075_v48 = vmul.f32 %v1941_v55, %v1074_v45  ;;  %v1062_v55 = vmul.f32 %v1933_v35, %v967_v40 }
 0x45d   :  { %v1076_v49 = vadd.f32 %v1075_v48, %v1073_v47 }
 0x45f   :  { %1091 = vst [vmem:[#allocation22] sm:$0xff] %v1076_v49 }
 0x460   :  { %1137 = dma.vmem_to_hbm [thread:$0]  %s1133_s6, 128, %s1135_s28, [#allocation23]  }
 0x4d6   :  { %v1057_v50 = vpop.f32.mrf.mxu1 }
 0x4d7   :  { %v1061_v51 = vadd.f32 %v1057_v50, %v251_v21 }
 0x4d9   :  { %v1063_v52 = vsub.f32 %v1061_v51, %v973_v41 }
 0x4db   :  { %v1064_v17 = vmul.f32 %v1935_v37, %v1063_v52 }
 0x4dd   :  { %v1065_v53 = vadd.f32 %v1064_v17, %v1062_v55 }
 0x4de   :  { %v1059_v54 = vpop.f32.mrf.mxu1 }
 0x4df   :  { %vm1066_vm8 = vcmp.gt.f32.partialorder %v1065_v53, 1.0 }
 0x4e0   :  { %v1452_v31 = vsel %vm1066_vm8, 1.0, %v1830_v44  ;;  %v1070_v35 = vsel %vm1066_vm8, 0.0, %v1065_v53 }
 0x4e1   :  { %v1069_v37 = vpack.c.bf16 %v1452_v31, %v1452_v31  ;;  %1086 = vst [vmem:[#allocation19] sm:$0xff] %v1070_v35 }
 0x4e2   :  { %1115 = dma.vmem_to_hbm [thread:$0]  %s1111_s29, 128, %s1113_s12, [#allocation20]  }
 0x4e3   :  { %1081 = vst [vmem:[#allocation18 + $0x1c] sm:$0xf] %v1069_v37 }
 0x4e4   :  { %1078 = vst [vmem:[#allocation4] sm:$0xf] %v1069_v37  ;;  %1104 = dma.vmem_to_hbm [thread:$0]  %s1097_s13, 512, %s1099_s5, [#allocation8], %s1822_s21, %s1822_s21, %s1823_s22  }
 0x4eb   :  { %v1087_v56 = vld [vmem:[#allocation4] sm:$0xf] }
 0x4ec   :  { %v1088_v44 = vunpack.c.l.bf16 %v1087_v56 }
 0x4ee   :  { %1089 = vst [vmem:[#allocation21] sm:$0xff] %v1088_v44 }
 0x4ef   :  { %1126 = dma.vmem_to_hbm [thread:$0]  %s1122_s16, 128, %s1124_s17, [#allocation20]  }
 0x4f0   :  { %1815 = dma.done.wait [#allocation8], 512  }
 0x4f1   :  { %1816 = vsyncadd [#allocation8], 4294966784 }
 0x4f2   :  { %1817 = dma.done.wait [#allocation20], 256  }
 0x4f3   :  { %1818 = vsyncadd [#allocation20], 4294967040 }
 0x4f4   :  { %1819 = dma.done.wait [#allocation23], 128  }
 0x4f5   :  { %1820 = vsyncadd [#allocation23], 4294967168 }
 0x4f6   :  { %1154 = vsyncpa [#allocation7], 1 }
 0x4f7   :  { %1155 = vsyncpa [#allocation10], 1 }
 0x4f8   :  { %1156 = vsyncpa [#allocation13], 1 }
 0x4f9   :  { %1157 = vsyncpa [#allocation16], 1 }
 0x4fa   :  { %1158 = vsyncpa [#allocation8], 1 }
 0x4fb   :  { %1159 = vsyncpa [#allocation20], 1 }
 0x4fc   :  { %1160 = vsyncpa [#allocation23], 1 }

// kernel: tpu_custom_call.1
= control target key start
LH: loop header
LB: loop body
LE: loop exit
PB: predicated region body
PF: predicated region fallthrough
CT: control target
= control target key end

     0   :  { %16 = vsyncpa [#allocation7], 0  ;;  %s2035_s0 = inlined_call_operand.hbm [shape: bf16[8,8,32], index: 0, kind: input, shape index: {}]   ;;  %s2036_s1 = inlined_call_operand.hbm [shape: bf16[32,128], index: 1, kind: input, shape index: {}]   ;;  %s2037_s2 = inlined_call_operand.hbm [shape: bf16[128,128], index: 2, kind: input, shape index: {}]   ;;  %s2038_s3 = inlined_call_operand.hbm [shape: f32[8,128], index: 3, kind: input, shape index: {}]   ;;  %s2039_s4 = inlined_call_operand.hbm [shape: f32[8,128], index: 4, kind: input, shape index: {}]   ;;  %s2040_s5 = inlined_call_operand.hbm [shape: f32[8,128], index: 5, kind: input, shape index: {}]   ;;  %s2041_s6 = inlined_call_operand.hbm [shape: f32[8,128], index: 6, kind: input, shape index: {}]   ;;  %s2042_s7 = inlined_call_operand.hbm [shape: bf16[8,8,128], index: 7, kind: output, shape index: {0}]   ;;  %s2043_s8 = inlined_call_operand.hbm [shape: f32[8,128], index: 8, kind: output, shape index: {1}]   ;;  %s2044_s9 = inlined_call_operand.hbm [shape: f32[8,128], index: 9, kind: output, shape index: {2}]   ;;  %s2045_s10 = inlined_call_operand.hbm [shape: f32[8,128], index: 10, kind: output, shape index: {3}]  }
   0x1   :  { %17 = vsyncpa [#allocation10], 0 }
   0x2   :  { %18 = vsyncpa [#allocation13], 0 }
   0x3   :  { %19 = vsyncpa [#allocation16], 0 }
   0x4   :  { %20 = vsyncpa [#allocation8], 0 }
   0x5   :  { %21 = vsyncpa [#allocation20], 0 }
   0x6   :  { %22 = vsyncpa [#allocation23], 0  ;;  %s40_s15 = sshll.u32 %s2036_s1, 4  ;;  %s1821_s16 = smov [#allocation9]   ;;  %s41_s15 = int_to_ptr.hbm [resolvable:$true] %s40_s15 }
   0x7   :  { %s42_s17 = sshll.u32 %s1821_s16, 4  ;;  %s67_s20 = sshll.u32 %s2038_s3, 4  ;;  %s43_s17 = int_to_ptr.vmem [resolvable:$true] %s42_s17  ;;  %s68_s20 = int_to_ptr.hbm [resolvable:$true] %s67_s20 }
   0x8   :  { %s1822_s21 = smov 64   ;;  %s1823_s22 = smov 4  }
   0x9   :  { %48 = dma.hbm_to_vmem [thread:$0]  %s41_s15, 256, %s43_s17, [#allocation10], %s1822_s21, %s1822_s21, %s1823_s22  }
   0xa   :  { %s1824_s23 = smov [#allocation12]   ;;  %s89_s1 = sshll.u32 %s2040_s5, 4  ;;  %s90_s1 = int_to_ptr.hbm [resolvable:$true] %s89_s1 }
   0xb   :  { %s69_s24 = sshll.u32 %s1824_s23, 4  ;;  %s27_s3 = sshll.u32 %s2035_s0, 4  ;;  %s70_s24 = int_to_ptr.vmem [resolvable:$true] %s69_s24  ;;  %s28_s3 = int_to_ptr.hbm [resolvable:$true] %s27_s3 }
   0xc   :  { %72 = dma.hbm_to_vmem [thread:$0]  %s68_s20, 128, %s70_s24, [#allocation13]  }
   0xd   :  { %s1825_s29 = smov [#allocation15]   ;;  %s1826_s11 = smov [#allocation6]  }
   0xe   :  { %s91_s30 = sshll.u32 %s1825_s29, 4  ;;  %s29_s12 = sshll.u32 %s1826_s11, 4  ;;  %s92_s30 = int_to_ptr.vmem [resolvable:$true] %s91_s30  ;;  %s30_s12 = int_to_ptr.vmem [resolvable:$true] %s29_s12 }
   0xf   :  { %94 = dma.hbm_to_vmem [thread:$0]  %s90_s1, 128, %s92_s30, [#allocation16]  }
  0x10   :  { %s53_s15 = sshll.u32 %s2037_s2, 4  ;;  %s78_s0 = sshll.u32 %s2039_s4, 4  ;;  %s54_s15 = int_to_ptr.hbm [resolvable:$true] %s53_s15  ;;  %s79_s0 = int_to_ptr.hbm [resolvable:$true] %s78_s0 }
  0x11   :  { %35 = dma.hbm_to_vmem [thread:$0]  %s28_s3, 512, %s30_s12, [#allocation7], %s1822_s21, %s1822_s21, %s1823_s22  }
  0x12   :  { %s1827_s17 = smov [#allocation11]   ;;  %s1828_s19 = smov [#allocation14]  }
  0x13   :  { %s55_s18 = sshll.u32 %s1827_s17, 4  ;;  %s80_s2 = sshll.u32 %s1828_s19, 4  ;;  %s56_s18 = int_to_ptr.vmem [resolvable:$true] %s55_s18  ;;  %s81_s2 = int_to_ptr.vmem [resolvable:$true] %s80_s2 }
  0x14   :  { %61 = dma.hbm_to_vmem [thread:$0]  %s54_s15, 1024, %s56_s18, [#allocation10], %s1822_s21, %s1822_s21, %s1823_s22  }
  0x15   :  { %s100_s24 = sshll.u32 %s2041_s6, 4  ;;  %s1829_s25 = smov [#allocation17]   ;;  %s101_s24 = int_to_ptr.hbm [resolvable:$true] %s100_s24 }
  0x16   :  { %83 = dma.hbm_to_vmem [thread:$0]  %s79_s0, 128, %s81_s2, [#allocation13]  }
  0x17   :  { %s102_s26 = sshll.u32 %s1829_s25, 4  ;;  %s103_s26 = int_to_ptr.vmem [resolvable:$true] %s102_s26 }
  0x18   :  { %105 = dma.hbm_to_vmem [thread:$0]  %s101_s24, 128, %s103_s26, [#allocation16]  }
  0x19   :  { %1807 = dma.done.wait [#allocation7], 512  }
  0x1a   :  { %1808 = vsyncadd [#allocation7], 4294966784 }
  0x1b   :  { %1809 = dma.done.wait [#allocation10], 1280  }
  0x1c   :  { %1810 = vsyncadd [#allocation10], 4294966016 }
  0x1d   :  { %1811 = dma.done.wait [#allocation13], 256  }
  0x1e   :  { %1812 = vsyncadd [#allocation13], 4294967040 }
  0x1f   :  { %1813 = dma.done.wait [#allocation16], 256  }
  0x20   :  { %1814 = vsyncadd [#allocation16], 4294967040  ;;  %v1466_v0 = vld [vmem:[#allocation11 + $0x38] sm:$0xff]  ;;  %v1465_v2 = vld [vmem:[#allocation11 + $0x30] sm:$0xff]  ;;  %vm201_vm0 = vcmask 261120   ;;  %v1830_v44 = vmov 0.0  }
  0x21   :  { %v1458_v1 = vld [vmem:[#allocation9 + $0x8] sm:$0xff]  ;;  %328 = vmatpush.bf16.msra.mxu1 %v1466_v0  ;;  %v1457_v3 = vld [vmem:[#allocation9] sm:$0xff]  ;;  %v1464_v6 = vld [vmem:[#allocation11 + $0x28] sm:$0xff]  ;;  %s1831_s4 = smov [#allocation22]   ;;  %s1134_s28 = sshll.u32 %s2045_s10, 4  ;;  %s1135_s28 = int_to_ptr.hbm [resolvable:$true] %s1134_s28 }
  0x22   :  { %220 = vmatpush.bf16.msra.mxu0 %v1458_v1  ;;  %v141_v4 = vld [vmem:[#allocation15] sm:$0xff]  ;;  %v1463_v8 = vld [vmem:[#allocation11 + $0x20] sm:$0xff]  ;;  %v1462_v9 = vld [vmem:[#allocation11 + $0x18] sm:$0xff]  ;;  %s1132_s6 = sshll.u32 %s1831_s4, 4  ;;  %s1832_s3 = smov [#allocation19]   ;;  %s1133_s6 = int_to_ptr.vmem [resolvable:$true] %s1132_s6 }
  0x23   :  { %v142_v5 = vpack.c.bf16 %v141_v4, %v141_v4  ;;  %v1453_v7 = vld [vmem:[#allocation6] sm:$0xff]  ;;  %v1460_v11 = vld [vmem:[#allocation11 + $0x8] sm:$0xff]  ;;  %v1459_v12 = vld [vmem:[#allocation11] sm:$0xff]  ;;  %s1110_s29 = sshll.u32 %s1832_s3, 4  ;;  %s1112_s12 = sshll.u32 %s2043_s8, 4  ;;  %s1111_s29 = int_to_ptr.vmem [resolvable:$true] %s1110_s29  ;;  %s1113_s12 = int_to_ptr.hbm [resolvable:$true] %s1112_s12 }
  0x24   :  { %v1461_v10 = vld [vmem:[#allocation11 + $0x10] sm:$0xff]  ;;  %v1474_v14 = vld [vmem:[#allocation11 + $0x38] sm:$0xff]  ;;  %v1472_v16 = vld [vmem:[#allocation11 + $0x28] sm:$0xff]  ;;  %s1833_s10 = smov [#allocation18]   ;;  %s1098_s5 = sshll.u32 %s2042_s7, 4  ;;  %s1099_s5 = int_to_ptr.hbm [resolvable:$true] %s1098_s5 }
  0x25   :  { %329 = vmatpush.bf16.msra.mxu1 %v1465_v2  ;;  %143 = vst [vmem:[#allocation4] sm:$0xf] %v142_v5  ;;  %430 = vmatpush.bf16.msra.mxu2 %v1474_v14  ;;  %v1473_v15 = vld [vmem:[#allocation11 + $0x30] sm:$0xff]  ;;  %v1924_v17 = vld [vmem:[#allocation12 + $0x3] ss:$0 sm:$0xff]  ;;  %v139_v19 = vld [vmem:[#allocation14] sm:$0xff] }
  0x26   :  { %221 = vmatpush.bf16.msra.mxu0 %v1457_v3  ;;  %v1471_v18 = vld [vmem:[#allocation11 + $0x20] sm:$0xff]  ;;  %v144_v20 = vld [vmem:[#allocation17] sm:$0xff]  ;;  %v1469_v26 = vld [vmem:[#allocation11 + $0x10] sm:$0xff]  ;;  %s1096_s13 = sshll.u32 %s1833_s10, 4  ;;  %s1834_s8 = smov [#allocation21]   ;;  %s1097_s13 = int_to_ptr.vmem [resolvable:$true] %s1096_s13 }
  0x27   :  { %v1926_v21 = vld [vmem:[#allocation12 + $0x4] ss:$0 sm:$0xff]  ;;  %v351_v22 = vmul.f32 %v1924_v17, %v144_v20  ;;  %v1470_v23 = vld [vmem:[#allocation11 + $0x18] sm:$0xff]  ;;  %v1468_v27 = vld [vmem:[#allocation11 + $0x8] sm:$0xff]  ;;  %s1121_s16 = sshll.u32 %s1834_s8, 4  ;;  %s1123_s17 = sshll.u32 %s2044_s9, 4  ;;  %s1122_s16 = int_to_ptr.vmem [resolvable:$true] %s1121_s16  ;;  %s1124_s17 = int_to_ptr.hbm [resolvable:$true] %s1123_s17 }
  0x28   :  { %v352_v24 = vmul.f32 %v1926_v21, %v139_v19  ;;  %v1467_v28 = vld [vmem:[#allocation11] sm:$0xff]  ;;  %v1482_v29 = vld [vmem:[#allocation11 + $0x38] sm:$0xff]  ;;  %v1481_v30 = vld [vmem:[#allocation11 + $0x30] sm:$0xff] }
  0x29   :  { %330 = vmatpush.bf16.msra.mxu1 %v1464_v6  ;;  %1185 = vmatmul.msk.bf16.vlgmr.msra.gmra.mxu0 %vm201_vm0, %v1453_v7  ;;  %v1930_v31 = vld [vmem:[#allocation12] ss:$0 sm:$0xff]  ;;  %v1480_v32 = vld [vmem:[#allocation11 + $0x28] sm:$0xff]  ;;  %v1933_v35 = vld [vmem:[#allocation12 + $0x1] ss:$0 sm:$0xff] }
  0x2a   :  { %431 = vmatpush.bf16.msra.mxu2 %v1473_v15  ;;  %v353_v25 = vadd.f32 %v352_v24, %v351_v22  ;;  %533 = vmatpush.bf16.msra.mxu3 %v1482_v29  ;;  %v1935_v37 = vld [vmem:[#allocation12 + $0x2] ss:$0 sm:$0xff]  ;;  %v342_v39 = vmul.f32 %v1933_v35, %v139_v19  ;;  %v1478_v50 = vld [vmem:[#allocation11 + $0x18] sm:$0xff]  ;;  %v1477_v51 = vld [vmem:[#allocation11 + $0x10] sm:$0xff] }
  0x2b   :  { %v1479_v49 = vld [vmem:[#allocation11 + $0x20] sm:$0xff]  ;;  %v1476_v52 = vld [vmem:[#allocation11 + $0x8] sm:$0xff]  ;;  %v1454_v53 = vld [vmem:[#allocation6 + $0x8] sm:$0xff] }
  0x2c   :  { %v1921_v13 = vld [vmem:[#allocation4] sm:$0xf]  ;;  %v1475_v54 = vld [vmem:[#allocation11] sm:$0xff] }
  0x2d   :  { %331 = vmatpush.bf16.msra.mxu1 %v1463_v8  ;;  %v1941_v55 = vld [vmem:[#allocation12 + $0x5] ss:$0 sm:$0xff]  ;;  %v354_v56 = vunpack.c.l.bf16 %v1921_v13  ;;  %v1490_v8 = vld [vmem:[#allocation11 + $0x38] sm:$0xff]  ;;  %v1484_v14 = vld [vmem:[#allocation11 + $0x8] sm:$0xff] }
  0x2e   :  { %432 = vmatpush.bf16.msra.mxu2 %v1472_v16  ;;  %534 = vmatpush.bf16.msra.mxu3 %v1481_v30  ;;  %v1483_v15 = vld [vmem:[#allocation11] sm:$0xff]  ;;  %v1498_v16 = vld [vmem:[#allocation11 + $0x38] sm:$0xff] }
  0x2f   :  { %v355_v58 = vmul.f32 %v1941_v55, %v354_v56 }
  0x31   :  { %332 = vmatpush.bf16.msra.mxu1 %v1462_v9  ;;  %v356_v61 = vadd.f32 %v355_v58, %v353_v25  ;;  %v1489_v9 = vld [vmem:[#allocation11 + $0x30] sm:$0xff] }
  0x32   :  { %433 = vmatpush.bf16.msra.mxu2 %v1471_v18  ;;  %535 = vmatpush.bf16.msra.mxu3 %v1480_v32  ;;  %v1497_v18 = vld [vmem:[#allocation11 + $0x30] sm:$0xff] }
  0x35   :  { %333 = vmatpush.bf16.msra.mxu1 %v1461_v10  ;;  %v1488_v10 = vld [vmem:[#allocation11 + $0x28] sm:$0xff] }
  0x36   :  { %434 = vmatpush.bf16.msra.mxu2 %v1470_v23  ;;  %536 = vmatpush.bf16.msra.mxu3 %v1479_v49  ;;  %v1496_v23 = vld [vmem:[#allocation11 + $0x28] sm:$0xff]  ;;  %v1491_v49 = vld [vmem:[#allocation11] sm:$0xff] }
  0x39   :  { %334 = vmatpush.bf16.msra.mxu1 %v1460_v11  ;;  %1186 = vmatmul.msk.bf16.gmra.mxu0 %vm201_vm0, %v1454_v53  ;;  %v1487_v11 = vld [vmem:[#allocation11 + $0x20] sm:$0xff] }
  0x3a   :  { %435 = vmatpush.bf16.msra.mxu2 %v1469_v26  ;;  %537 = vmatpush.bf16.msra.mxu3 %v1478_v50 }
  0x3d   :  { %335 = vmatpush.bf16.msra.mxu1 %v1459_v12  ;;  %v1486_v12 = vld [vmem:[#allocation11 + $0x18] sm:$0xff] }
  0x3e   :  { %436 = vmatpush.bf16.msra.mxu2 %v1468_v27  ;;  %538 = vmatpush.bf16.msra.mxu3 %v1477_v51 }
  0x40   :  { %336 = vmatmul.bf16.vlgmr.msra.gmra.mxu1 %v1921_v13  ;;  %v1485_v13 = vld [vmem:[#allocation11 + $0x10] sm:$0xff] }
  0x41   :  { %636 = vmatpush.bf16.msrb.mxu1 %v1490_v8  ;;  %v1504_v8 = vld [vmem:[#allocation11 + $0x28] sm:$0xff] }
  0x42   :  { %437 = vmatpush.bf16.msra.mxu2 %v1467_v28  ;;  %539 = vmatpush.bf16.msra.mxu3 %v1476_v52 }
  0x45   :  { %637 = vmatpush.bf16.msrb.mxu1 %v1489_v9  ;;  %v1503_v9 = vld [vmem:[#allocation11 + $0x20] sm:$0xff] }
  0x46   :  { %540 = vmatpush.bf16.msra.mxu3 %v1475_v54  ;;  %739 = vmatpush.bf16.msrb.mxu2 %v1498_v16  ;;  %v1513_v16 = vld [vmem:[#allocation11 + $0x30] sm:$0xff] }
  0x49   :  { %638 = vmatpush.bf16.msrb.mxu1 %v1488_v10  ;;  %v1502_v10 = vld [vmem:[#allocation11 + $0x18] sm:$0xff] }
  0x4a   :  { %740 = vmatpush.bf16.msrb.mxu2 %v1497_v18 }
  0x4d   :  { %639 = vmatpush.bf16.msrb.mxu1 %v1487_v11  ;;  %v1501_v11 = vld [vmem:[#allocation11 + $0x10] sm:$0xff] }
  0x4e   :  { %741 = vmatpush.bf16.msrb.mxu2 %v1496_v23 }
  0x51   :  { %640 = vmatpush.bf16.msrb.mxu1 %v1486_v12  ;;  %v1500_v12 = vld [vmem:[#allocation11 + $0x8] sm:$0xff] }
  0x55   :  { %641 = vmatpush.bf16.msrb.mxu1 %v1485_v13  ;;  %v1499_v13 = vld [vmem:[#allocation11] sm:$0xff] }
  0x59   :  { %642 = vmatpush.bf16.msrb.mxu1 %v1484_v14  ;;  %v1514_v14 = vld [vmem:[#allocation11 + $0x38] sm:$0xff] }
  0x5a   :  { %945 = vmatpush.bf16.msrb.mxu0 %v1514_v14 }
  0x5d   :  { %643 = vmatpush.bf16.msrb.mxu1 %v1483_v15  ;;  %v1456_v15 = vld [vmem:[#allocation6 + $0x18] sm:$0xff] }
  0x5e   :  { %946 = vmatpush.bf16.msrb.mxu0 %v1513_v16  ;;  %v1519_v16 = vld [vmem:[#allocation11 + $0x20] sm:$0xff] }
  0xa6   :  { %v223_v33 = vpop.f32.mrf.mxu0 }
  0xa7   :  { %v244_v34 = vadd.f32 %v1930_v31, %v223_v33 }
  0xae   :  { %v225_v57 = vpop.f32.mrf.mxu0 }
  0xaf   :  { %v245_v59 = vadd.f32 %v1930_v31, %v225_v57 }
  0xb6   :  { %v228_v24 = vpop.f32.mrf.mxu0 }
  0xb7   :  { %v246_v25 = vadd.f32 %v1930_v31, %v228_v24 }
  0xbd   :  { %v337_v36 = vpop.f32.mrf.mxu1 }
  0xbe   :  { %v341_v38 = vadd.f32 %v337_v36, %v244_v34  ;;  %v230_v52 = vpop.f32.mrf.mxu0 }
  0xbf   :  { %v247_v56 = vadd.f32 %v1930_v31, %v230_v52 }
  0xc0   :  { %v343_v40 = vsub.f32 %v341_v38, %v144_v20  ;;  %v453_v20 = vmul.f32 %v1924_v17, %v356_v61 }
  0xc2   :  { %v344_v41 = vmul.f32 %v1935_v37, %v343_v40 }
  0xc4   :  { %v345_v42 = vadd.f32 %v344_v41, %v342_v39 }
  0xc5   :  { %v339_v43 = vpop.f32.mrf.mxu1 }
  0xc6   :  { %vm346_vm1 = vcmp.gt.f32.partialorder %v345_v42, 1.0  ;;  %v1495_v43 = vld [vmem:[#allocation11 + $0x20] sm:$0xff] }
  0xc7   :  { %v1221_v45 = vsel %vm346_vm1, 1.0, %v1830_v44  ;;  %v350_v46 = vsel %vm346_vm1, 0.0, %v345_v42  ;;  %742 = vmatpush.bf16.msrb.mxu2 %v1495_v43 }
  0xc8   :  { %v349_v47 = vpack.c.bf16 %v1221_v45, %v1221_v45  ;;  %v444_v0 = vmul.f32 %v1933_v35, %v350_v46  ;;  %v454_v22 = vmul.f32 %v1926_v21, %v350_v46  ;;  %v1494_v45 = vld [vmem:[#allocation11 + $0x18] sm:$0xff]  ;;  %v1493_v46 = vld [vmem:[#allocation11 + $0x10] sm:$0xff] }
  0xca   :  { %358 = vst [vmem:[#allocation4] sm:$0xf] %v349_v47  ;;  %v455_v27 = vadd.f32 %v454_v22, %v453_v20  ;;  %v1512_v22 = vld [vmem:[#allocation11 + $0x28] sm:$0xff] }
  0xcb   :  { %360 = vst [vmem:[#allocation18] sm:$0xf] %v349_v47  ;;  %743 = vmatpush.bf16.msrb.mxu2 %v1494_v45  ;;  %v1492_v47 = vld [vmem:[#allocation11 + $0x8] sm:$0xff]  ;;  %947 = vmatpush.bf16.msrb.mxu0 %v1512_v22 }
  0xcf   :  { %744 = vmatpush.bf16.msrb.mxu2 %v1493_v46  ;;  %v1508_v46 = vld [vmem:[#allocation11 + $0x8] sm:$0xff] }
  0xd1   :  { %v362_v48 = vld [vmem:[#allocation4] sm:$0xf] }
  0xd2   :  { %438 = vmatmul.bf16.vlgmr.msra.gmra.mxu2 %v362_v48  ;;  %v456_v19 = vunpack.c.l.bf16 %v362_v48  ;;  %v1455_v48 = vld [vmem:[#allocation6 + $0x10] sm:$0xff] }
  0xd3   :  { %745 = vmatpush.bf16.msrb.mxu2 %v1492_v47  ;;  %1187 = vmatmul.msk.bf16.gmra.mxu0 %vm201_vm0, %v1455_v48  ;;  %v1507_v47 = vld [vmem:[#allocation11] sm:$0xff]  ;;  %v1522_v48 = vld [vmem:[#allocation11 + $0x38] sm:$0xff] }
  0xd4   :  { %v457_v26 = vmul.f32 %v1941_v55, %v456_v19  ;;  %1048 = vmatpush.bf16.msra.mxu1 %v1522_v48 }
  0xd6   :  { %v458_v29 = vadd.f32 %v457_v26, %v455_v27 }
  0xd7   :  { %746 = vmatpush.bf16.msrb.mxu2 %v1491_v49 }
  0xd8   :  { %v556_v53 = vmul.f32 %v1924_v17, %v458_v29 }
  0xe3   :  { %1188 = vmatmul.msk.bf16.gmra.mxu0 %vm201_vm0, %v1456_v15 }
 0x150   :  { %v233_v20 = vpop.f32.mrf.mxu0 }
 0x151   :  { %v248_v24 = vadd.f32 %v1930_v31, %v233_v20  ;;  %v1516_v20 = vld [vmem:[#allocation11 + $0x8] sm:$0xff] }
 0x155   :  { %v439_v60 = vpop.f32.mrf.mxu2 }
 0x156   :  { %v443_v62 = vadd.f32 %v439_v60, %v245_v59 }
 0x158   :  { %v445_v63 = vsub.f32 %v443_v62, %v356_v61 }
 0x15a   :  { %v446_v1 = vmul.f32 %v1935_v37, %v445_v63 }
 0x15c   :  { %v447_v2 = vadd.f32 %v446_v1, %v444_v0 }
 0x15d   :  { %v441_v3 = vpop.f32.mrf.mxu2 }
 0x15e   :  { %vm448_vm2 = vcmp.gt.f32.partialorder %v447_v2, 1.0 }
 0x15f   :  { %v1254_v4 = vsel %vm448_vm2, 1.0, %v1830_v44  ;;  %v1949_v5 = vsel %vm448_vm2, 0.0, %v447_v2 }
 0x160   :  { %v451_v6 = vpack.c.bf16 %v1254_v4, %v1254_v4  ;;  %v547_v33 = vmul.f32 %v1933_v35, %v1949_v5  ;;  %v557_v51 = vmul.f32 %v1926_v21, %v1949_v5 }
 0x162   :  { %460 = vst [vmem:[#allocation4] sm:$0xf] %v451_v6  ;;  %v558_v57 = vadd.f32 %v557_v51, %v556_v53 }
 0x163   :  { %463 = vst [vmem:[#allocation18 + $0x4] sm:$0xf] %v451_v6  ;;  %v1506_v6 = vld [vmem:[#allocation11 + $0x38] sm:$0xff] }
 0x164   :  { %842 = vmatpush.bf16.msrb.mxu3 %v1506_v6 }
 0x169   :  { %v1951_v7 = vld [vmem:[#allocation4] sm:$0xf] }
 0x16a   :  { %541 = vmatmul.bf16.vlgmr.msra.gmra.mxu3 %v1951_v7  ;;  %v559_v50 = vunpack.c.l.bf16 %v1951_v7  ;;  %v1505_v7 = vld [vmem:[#allocation11 + $0x30] sm:$0xff] }
 0x16b   :  { %843 = vmatpush.bf16.msrb.mxu3 %v1505_v7 }
 0x16c   :  { %v560_v54 = vmul.f32 %v1941_v55, %v559_v50  ;;  %v1521_v50 = vld [vmem:[#allocation11 + $0x30] sm:$0xff] }
 0x16d   :  { %1049 = vmatpush.bf16.msra.mxu1 %v1521_v50 }
 0x16e   :  { %v561_v59 = vadd.f32 %v560_v54, %v558_v57  ;;  %v235_v54 = vpop.f32.mrf.mxu0 }
 0x16f   :  { %844 = vmatpush.bf16.msrb.mxu3 %v1504_v8 }
 0x170   :  { %v659_v23 = vmul.f32 %v1924_v17, %v561_v59 }
 0x173   :  { %845 = vmatpush.bf16.msrb.mxu3 %v1503_v9 }
 0x176   :  { %v238_v22 = vpop.f32.mrf.mxu0 }
 0x177   :  { %846 = vmatpush.bf16.msrb.mxu3 %v1502_v10 }
 0x17b   :  { %847 = vmatpush.bf16.msrb.mxu3 %v1501_v11 }
 0x17f   :  { %848 = vmatpush.bf16.msrb.mxu3 %v1500_v12 }
 0x183   :  { %849 = vmatpush.bf16.msrb.mxu3 %v1499_v13 }
 0x1ed   :  { %v542_v28 = vpop.f32.mrf.mxu3 }
 0x1ee   :  { %v546_v30 = vadd.f32 %v542_v28, %v246_v25  ;;  %v1511_v28 = vld [vmem:[#allocation11 + $0x20] sm:$0xff] }
 0x1ef   :  { %948 = vmatpush.bf16.msrb.mxu0 %v1511_v28 }
 0x1f0   :  { %v548_v32 = vsub.f32 %v546_v30, %v458_v29 }
 0x1f2   :  { %v549_v34 = vmul.f32 %v1935_v37, %v548_v32 }
 0x1f4   :  { %v550_v36 = vadd.f32 %v549_v34, %v547_v33  ;;  %v1510_v33 = vld [vmem:[#allocation11 + $0x18] sm:$0xff] }
 0x1f5   :  { %v544_v38 = vpop.f32.mrf.mxu3  ;;  %949 = vmatpush.bf16.msrb.mxu0 %v1510_v33 }
 0x1f6   :  { %vm551_vm3 = vcmp.gt.f32.partialorder %v550_v36, 1.0 }
 0x1f7   :  { %v1287_v39 = vsel %vm551_vm3, 1.0, %v1830_v44  ;;  %v1962_v40 = vsel %vm551_vm3, 0.0, %v550_v36 }
 0x1f8   :  { %v554_v41 = vpack.c.bf16 %v1287_v39, %v1287_v39  ;;  %v650_v62 = vmul.f32 %v1933_v35, %v1962_v40  ;;  %v660_v19 = vmul.f32 %v1926_v21, %v1962_v40  ;;  %v1509_v40 = vld [vmem:[#allocation11 + $0x10] sm:$0xff] }
 0x1f9   :  { %950 = vmatpush.bf16.msrb.mxu0 %v1509_v40 }
 0x1fa   :  { %563 = vst [vmem:[#allocation4] sm:$0xf] %v554_v41  ;;  %v661_v26 = vadd.f32 %v660_v19, %v659_v23  ;;  %v1517_v19 = vld [vmem:[#allocation11 + $0x10] sm:$0xff]  ;;  %v1515_v23 = vld [vmem:[#allocation11] sm:$0xff] }
 0x1fb   :  { %566 = vst [vmem:[#allocation18 + $0x8] sm:$0xf] %v554_v41 }
 0x1fd   :  { %951 = vmatpush.bf16.msrb.mxu0 %v1508_v46 }
 0x201   :  { %v1964_v42 = vld [vmem:[#allocation4] sm:$0xf]  ;;  %952 = vmatpush.bf16.msrb.mxu0 %v1507_v47 }
 0x202   :  { %644 = vmatmul.bf16.vlgmr.msrb.gmra.mxu1 %v1964_v42  ;;  %v662_v18 = vunpack.c.l.bf16 %v1964_v42 }
 0x204   :  { %v663_v25 = vmul.f32 %v1941_v55, %v662_v18  ;;  %v1518_v18 = vld [vmem:[#allocation11 + $0x18] sm:$0xff] }
 0x206   :  { %v664_v29 = vadd.f32 %v663_v25, %v661_v26  ;;  %v250_v25 = vadd.f32 %v1930_v31, %v238_v22 }
 0x208   :  { %v762_v52 = vmul.f32 %v1924_v17, %v664_v29 }
 0x27f   :  { %v645_v58 = vpop.f32.mrf.mxu1 }
 0x280   :  { %v649_v60 = vadd.f32 %v645_v58, %v247_v56  ;;  %v1520_v56 = vld [vmem:[#allocation11 + $0x28] sm:$0xff]  ;;  %v249_v58 = vadd.f32 %v1930_v31, %v235_v54 }
 0x281   :  { %1050 = vmatpush.bf16.msra.mxu1 %v1520_v56 }
 0x282   :  { %v651_v61 = vsub.f32 %v649_v60, %v561_v59 }
 0x284   :  { %v652_v63 = vmul.f32 %v1935_v37, %v651_v61 }
 0x285   :  { %1051 = vmatpush.bf16.msra.mxu1 %v1519_v16 }
 0x286   :  { %v653_v0 = vadd.f32 %v652_v63, %v650_v62 }
 0x287   :  { %v647_v1 = vpop.f32.mrf.mxu1 }
 0x288   :  { %vm654_vm4 = vcmp.gt.f32.partialorder %v653_v0, 1.0 }
 0x289   :  { %v1320_v2 = vsel %vm654_vm4, 1.0, %v1830_v44  ;;  %v1978_v3 = vsel %vm654_vm4, 0.0, %v653_v0  ;;  %1052 = vmatpush.bf16.msra.mxu1 %v1518_v18 }
 0x28a   :  { %v657_v4 = vpack.c.bf16 %v1320_v2, %v1320_v2  ;;  %v753_v34 = vmul.f32 %v1933_v35, %v1978_v3  ;;  %v763_v51 = vmul.f32 %v1926_v21, %v1978_v3 }
 0x28c   :  { %666 = vst [vmem:[#allocation4] sm:$0xf] %v657_v4  ;;  %v764_v57 = vadd.f32 %v763_v51, %v762_v52 }
 0x28d   :  { %669 = vst [vmem:[#allocation18 + $0xc] sm:$0xf] %v657_v4  ;;  %1053 = vmatpush.bf16.msra.mxu1 %v1517_v19 }
 0x291   :  { %1054 = vmatpush.bf16.msra.mxu1 %v1516_v20 }
 0x293   :  { %v1980_v5 = vld [vmem:[#allocation4] sm:$0xf] }
 0x294   :  { %747 = vmatmul.bf16.vlgmr.msrb.gmra.mxu2 %v1980_v5  ;;  %v765_v49 = vunpack.c.l.bf16 %v1980_v5 }
 0x295   :  { %1055 = vmatpush.bf16.msra.mxu1 %v1515_v23 }
 0x296   :  { %v766_v53 = vmul.f32 %v1941_v55, %v765_v49 }
 0x298   :  { %v767_v59 = vadd.f32 %v766_v53, %v764_v57 }
 0x29a   :  { %v865_v1 = vmul.f32 %v1924_v17, %v767_v59 }
 0x317   :  { %v748_v27 = vpop.f32.mrf.mxu2 }
 0x318   :  { %v752_v30 = vadd.f32 %v748_v27, %v248_v24  ;;  %v240_v24 = vpop.f32.mrf.mxu0 }
 0x31a   :  { %v754_v32 = vsub.f32 %v752_v30, %v664_v29 }
 0x31c   :  { %v755_v36 = vmul.f32 %v1935_v37, %v754_v32 }
 0x31e   :  { %v756_v38 = vadd.f32 %v755_v36, %v753_v34 }
 0x31f   :  { %v750_v39 = vpop.f32.mrf.mxu2 }
 0x320   :  { %vm757_vm5 = vcmp.gt.f32.partialorder %v756_v38, 1.0 }
 0x321   :  { %v1353_v41 = vsel %vm757_vm5, 1.0, %v1830_v44  ;;  %v761_v42 = vsel %vm757_vm5, 0.0, %v756_v38 }
 0x322   :  { %v760_v43 = vpack.c.bf16 %v1353_v41, %v1353_v41  ;;  %v866_v63 = vmul.f32 %v1926_v21, %v761_v42  ;;  %v856_v3 = vmul.f32 %v1933_v35, %v761_v42 }
 0x324   :  { %772 = vst [vmem:[#allocation18 + $0x10] sm:$0xf] %v760_v43  ;;  %v867_v5 = vadd.f32 %v866_v63, %v865_v1 }
 0x325   :  { %769 = vst [vmem:[#allocation4] sm:$0xf] %v760_v43 }
 0x32c   :  { %v774_v45 = vld [vmem:[#allocation4] sm:$0xf] }
 0x32d   :  { %850 = vmatmul.bf16.vlgmr.msrb.gmra.mxu3 %v774_v45  ;;  %v868_v60 = vunpack.c.l.bf16 %v774_v45 }
 0x32f   :  { %v869_v2 = vmul.f32 %v1941_v55, %v868_v60 }
 0x331   :  { %v870_v7 = vadd.f32 %v869_v2, %v867_v5 }
 0x333   :  { %v968_v12 = vmul.f32 %v1924_v17, %v870_v7 }
 0x3b0   :  { %v851_v61 = vpop.f32.mrf.mxu3 }
 0x3b1   :  { %v855_v62 = vadd.f32 %v851_v61, %v249_v58 }
 0x3b3   :  { %v857_v0 = vsub.f32 %v855_v62, %v767_v59 }
 0x3b5   :  { %v858_v4 = vmul.f32 %v1935_v37, %v857_v0 }
 0x3b7   :  { %v859_v6 = vadd.f32 %v858_v4, %v856_v3 }
 0x3b8   :  { %v853_v8 = vpop.f32.mrf.mxu3 }
 0x3b9   :  { %vm860_vm6 = vcmp.gt.f32.partialorder %v859_v6, 1.0 }
 0x3ba   :  { %v1386_v9 = vsel %vm860_vm6, 1.0, %v1830_v44  ;;  %v864_v10 = vsel %vm860_vm6, 0.0, %v859_v6 }
 0x3bb   :  { %v863_v11 = vpack.c.bf16 %v1386_v9, %v1386_v9  ;;  %v969_v13 = vmul.f32 %v1926_v21, %v864_v10  ;;  %v959_v29 = vmul.f32 %v1933_v35, %v864_v10 }
 0x3bd   :  { %875 = vst [vmem:[#allocation18 + $0x14] sm:$0xf] %v863_v11  ;;  %v970_v14 = vadd.f32 %v969_v13, %v968_v12 }
 0x3be   :  { %872 = vst [vmem:[#allocation4] sm:$0xf] %v863_v11 }
 0x3c5   :  { %v877_v15 = vld [vmem:[#allocation4] sm:$0xf] }
 0x3c6   :  { %953 = vmatmul.bf16.vlgmr.msrb.gmra.mxu0 %v877_v15  ;;  %v971_v34 = vunpack.c.l.bf16 %v877_v15 }
 0x3c8   :  { %v972_v39 = vmul.f32 %v1941_v55, %v971_v34 }
 0x3ca   :  { %v973_v41 = vadd.f32 %v972_v39, %v970_v14 }
 0x3cc   :  { %v1071_v46 = vmul.f32 %v1924_v17, %v973_v41 }
 0x443   :  { %v954_v26 = vpop.f32.mrf.mxu0 }
 0x444   :  { %v958_v27 = vadd.f32 %v954_v26, %v250_v25 }
 0x446   :  { %v960_v28 = vsub.f32 %v958_v27, %v870_v7 }
 0x448   :  { %v961_v30 = vmul.f32 %v1935_v37, %v960_v28 }
 0x44a   :  { %v962_v32 = vadd.f32 %v961_v30, %v959_v29 }
 0x44b   :  { %v956_v33 = vpop.f32.mrf.mxu0 }
 0x44c   :  { %vm963_vm7 = vcmp.gt.f32.partialorder %v962_v32, 1.0 }
 0x44d   :  { %v1419_v36 = vsel %vm963_vm7, 1.0, %v1830_v44  ;;  %v967_v40 = vsel %vm963_vm7, 0.0, %v962_v32 }
 0x44e   :  { %v966_v38 = vpack.c.bf16 %v1419_v36, %v1419_v36  ;;  %v1072_v42 = vmul.f32 %v1926_v21, %v967_v40  ;;  %v251_v21 = vadd.f32 %v1930_v31, %v240_v24 }
 0x450   :  { %978 = vst [vmem:[#allocation18 + $0x18] sm:$0xf] %v966_v38  ;;  %v1073_v47 = vadd.f32 %v1072_v42, %v1071_v46 }
 0x451   :  { %975 = vst [vmem:[#allocation4] sm:$0xf] %v966_v38 }
 0x458   :  { %v980_v43 = vld [vmem:[#allocation4] sm:$0xf] }
 0x459   :  { %1056 = vmatmul.bf16.vlgmr.msra.gmra.mxu1 %v980_v43  ;;  %v1074_v45 = vunpack.c.l.bf16 %v980_v43 }
 0x45b   :  { %v1075_v48 = vmul.f32 %v1941_v55, %v1074_v45  ;;  %v1062_v55 = vmul.f32 %v1933_v35, %v967_v40 }
 0x45d   :  { %v1076_v49 = vadd.f32 %v1075_v48, %v1073_v47 }
 0x45f   :  { %1091 = vst [vmem:[#allocation22] sm:$0xff] %v1076_v49 }
 0x460   :  { %1137 = dma.vmem_to_hbm [thread:$0]  %s1133_s6, 128, %s1135_s28, [#allocation23]  }
 0x4d6   :  { %v1057_v50 = vpop.f32.mrf.mxu1 }
 0x4d7   :  { %v1061_v51 = vadd.f32 %v1057_v50, %v251_v21 }
 0x4d9   :  { %v1063_v52 = vsub.f32 %v1061_v51, %v973_v41 }
 0x4db   :  { %v1064_v17 = vmul.f32 %v1935_v37, %v1063_v52 }
 0x4dd   :  { %v1065_v53 = vadd.f32 %v1064_v17, %v1062_v55 }
 0x4de   :  { %v1059_v54 = vpop.f32.mrf.mxu1 }
 0x4df   :  { %vm1066_vm8 = vcmp.gt.f32.partialorder %v1065_v53, 1.0 }
 0x4e0   :  { %v1452_v31 = vsel %vm1066_vm8, 1.0, %v1830_v44  ;;  %v1070_v35 = vsel %vm1066_vm8, 0.0, %v1065_v53 }
 0x4e1   :  { %v1069_v37 = vpack.c.bf16 %v1452_v31, %v1452_v31  ;;  %1086 = vst [vmem:[#allocation19] sm:$0xff] %v1070_v35 }
 0x4e2   :  { %1115 = dma.vmem_to_hbm [thread:$0]  %s1111_s29, 128, %s1113_s12, [#allocation20]  }
 0x4e3   :  { %1081 = vst [vmem:[#allocation18 + $0x1c] sm:$0xf] %v1069_v37 }
 0x4e4   :  { %1078 = vst [vmem:[#allocation4] sm:$0xf] %v1069_v37  ;;  %1104 = dma.vmem_to_hbm [thread:$0]  %s1097_s13, 512, %s1099_s5, [#allocation8], %s1822_s21, %s1822_s21, %s1823_s22  }
 0x4eb   :  { %v1087_v56 = vld [vmem:[#allocation4] sm:$0xf] }
 0x4ec   :  { %v1088_v44 = vunpack.c.l.bf16 %v1087_v56 }
 0x4ee   :  { %1089 = vst [vmem:[#allocation21] sm:$0xff] %v1088_v44 }
 0x4ef   :  { %1126 = dma.vmem_to_hbm [thread:$0]  %s1122_s16, 128, %s1124_s17, [#allocation20]  }
 0x4f0   :  { %1815 = dma.done.wait [#allocation8], 512  }
 0x4f1   :  { %1816 = vsyncadd [#allocation8], 4294966784 }
 0x4f2   :  { %1817 = dma.done.wait [#allocation20], 256  }
 0x4f3   :  { %1818 = vsyncadd [#allocation20], 4294967040 }
 0x4f4   :  { %1819 = dma.done.wait [#allocation23], 128  }
 0x4f5   :  { %1820 = vsyncadd [#allocation23], 4294967168 }
 0x4f6   :  { %1154 = vsyncpa [#allocation7], 1 }
 0x4f7   :  { %1155 = vsyncpa [#allocation10], 1 }
 0x4f8   :  { %1156 = vsyncpa [#allocation13], 1 }
 0x4f9   :  { %1157 = vsyncpa [#allocation16], 1 }
 0x4fa   :  { %1158 = vsyncpa [#allocation8], 1 }
 0x4fb   :  { %1159 = vsyncpa [#allocation20], 1 }
 0x4fc   :  { %1160 = vsyncpa [#allocation23], 1 }

</bundles_post_ra>
